<compile_context>
chip_gen: v7x
topology: tpu7x:2x2x1
jax: 0.10.0
libtpu: 0.0.40
codegen_flags: <defaults>
</compile_context>

<pallas_src>
import jax
import jax.numpy as jnp
from jax.experimental import pallas as pl
from jax.experimental.pallas import tpu as pltpu

LANE = 128  # TPU lane width; every feature dim is zero-padded to this.

# Weight-slab row-block order (each block is a zero-padded 128x128 tile).
_LAYERS = ("fc1", "fc2", "fc3", "fc_mu", "fc_sigma", "fc6", "fc7", "fc10", "fc11")
# Only layers NOT followed by affine=False BatchNorm keep their bias.
_BIAS_LAYERS = frozenset({"fc_sigma", "fc11"})


def _generator_kernel(x_ref, drop_ref, eps_ref, w_ref, b_ref, out_ref):
    """Whole Generator forward; everything resident in VMEM, one invocation."""
    w_dtype = w_ref.dtype  # bf16 by default (native MXU input); f32 also works.

    def linear(h, layer, with_bias=False):
        # Each layer is a tile-aligned 128x128 block of the weight slab
        # -> static, zero-cost ref views.
        w = w_ref[layer * LANE:(layer + 1) * LANE, :]
        y = jnp.dot(h.astype(w_dtype), w, preferred_element_type=jnp.float32)
        if with_bias:
            y = y + b_ref[layer:layer + 1, :]
        return y

    def batchnorm(h):
        # BatchNorm1d(affine=False), training-mode (biased) batch stats.
        # Fused single-pass stats: both reductions act on h (no serial
        # mean -> subtract -> mean(c*c) chain); var clamped at 0 to guard the
        # E[h^2] - m^2 cancellation.  Elementwise math kept in f32.
        m = jnp.mean(h, axis=0, keepdims=True)
        m2 = jnp.mean(h * h, axis=0, keepdims=True)
        v = jnp.maximum(m2 - m * m, 0.0)
        return (h - m) * jax.lax.rsqrt(v + 1e-10)

    def relu(h):
        return jnp.maximum(h, 0.0)

    # Dropout: mask arrives pre-scaled by 1/keep_prob -> a single multiply.
    x = x_ref[...] * drop_ref[...]

    # ---- encoder -------------------------------------------------------------
    h = relu(batchnorm(linear(x, 0)))        # fc1  (bias cancelled by BN)
    h = relu(batchnorm(linear(h, 1)))        # fc2
    h = relu(batchnorm(linear(h, 2)))        # fc3

    # ---- latent head + reparameterization trick (all lane-aligned) ------------
    mu = batchnorm(linear(h, 3))                           # fc_mu   (pad lanes -> 0)
    sigma = jax.nn.sigmoid(linear(h, 4, with_bias=True))   # fc_sigma(pad lanes -> 0.5)
    s = mu + sigma * eps_ref[...]                          # eps pad lanes are 0 -> s pad = 0

    # ---- decoder ---------------------------------------------------------------
    h = relu(batchnorm(linear(s, 5)))        # fc6
    h = relu(batchnorm(linear(h, 6)))        # fc7
    h = relu(batchnorm(linear(h, 7)))        # fc10
    x_out = relu(linear(h, 8, with_bias=True))   # fc11   (n_zim == 1 branch)

    # Lane-dense output slab: [ s (128 cols, zero-padded) | recon (128 cols) ].
    out_ref[:, :LANE] = s.astype(out_ref.dtype)
    out_ref[:, LANE:] = x_out.astype(out_ref.dtype)


def pack_generator_params(params, weights_dtype=jnp.bfloat16):
    """Pack the 9 Linear layers into one (9*128,128) weight slab + (9,128) bias slab.

    Every block is zero-padded to (128, 128) so in-kernel slices are tile-aligned
    views.  Biases of BN-followed layers are zeroed (BN cancels them and the
    kernel skips the add).  bf16 weights are the native single-pass MXU input on
    v5e/v6e/v7x and halve the weight DMA; pass weights_dtype=jnp.float32 only if
    bit-parity with the f32 PyTorch module is required.
    """
    w_rows, b_rows = [], []
    for name in _LAYERS:
        w, b = params[name]
        assert w.shape[0] <= LANE and w.shape[1] <= LANE
        w_rows.append(jnp.pad(w, ((0, LANE - w.shape[0]), (0, LANE - w.shape[1]))))
        if name in _BIAS_LAYERS:
            b_rows.append(jnp.pad(b, ((0, 0), (0, LANE - b.shape[1]))))
        else:
            b_rows.append(jnp.zeros((1, LANE), jnp.float32))
    w_slab = jnp.concatenate(w_rows, axis=0).astype(weights_dtype)   # (9*128, 128)
    b_slab = jnp.concatenate(b_rows, axis=0).astype(jnp.float32)     # (9, 128)
    latent_dim = params["fc_mu"][0].shape[1]
    return w_slab, b_slab, latent_dim


def generator_forward(x, rng_key, w_slab, b_slab, latent_dim, p_drop=0.1):
    """Single grid-less pallas_call; whole batch + all weights resident in VMEM."""
    batch, input_dim = x.shape
    assert input_dim <= LANE and latent_dim <= LANE
    keep_prob = 1.0 - p_drop

    # Dropout mask + reparameterization noise via jax.random in the wrapper
    # (the TPU hardware PRNG has no interpret/CPU lowering).  Pre-scaled and
    # zero-padded so the kernel only does one multiply and one FMA with them.
    k_drop, k_eps = jax.random.split(rng_key)
    keep = jax.random.bernoulli(k_drop, keep_prob, (batch, input_dim))
    drop = keep.astype(jnp.float32) * (1.0 / keep_prob)
    drop = jnp.pad(drop, ((0, 0), (0, LANE - input_dim)))
    eps = jax.random.normal(k_eps, (batch, latent_dim), jnp.float32)
    eps = jnp.pad(eps, ((0, 0), (0, LANE - latent_dim)))

    x_pad = jnp.pad(x.astype(jnp.float32), ((0, 0), (0, LANE - input_dim)))

    vmem = pl.BlockSpec(memory_space=pltpu.MemorySpace.VMEM)
    out = pl.pallas_call(
        _generator_kernel,
        out_shape=jax.ShapeDtypeStruct((batch, 2 * LANE), jnp.float32),
        in_specs=[vmem, vmem, vmem, vmem, vmem],
        out_specs=vmem,
    )(x_pad, drop, eps, w_slab, b_slab)

    s = out[:, :latent_dim]
    x_rec = out[:, LANE:LANE + input_dim]
    return s, x_rec


def init_params(key, input_dim, n_dim, latent_dim):
    """Deterministic synthetic parameters. Weights stored as (in, out)."""
    shapes = {
        "fc1": (input_dim, n_dim),
        "fc2": (n_dim, n_dim),
        "fc3": (n_dim, n_dim),
        "fc_mu": (n_dim, latent_dim),
        "fc_sigma": (n_dim, latent_dim),
        "fc6": (latent_dim, n_dim),
        "fc7": (n_dim, n_dim),
        "fc10": (n_dim, n_dim),
        "fc11": (n_dim, input_dim),
    }
    params = {}
    for name, (fan_in, fan_out) in shapes.items():
        key, kw, kb = jax.random.split(key, 3)
        bound = 1.0 / jnp.sqrt(fan_in)
        w = jax.random.uniform(kw, (fan_in, fan_out), jnp.float32, -bound, bound)
        b = jax.random.uniform(kb, (1, fan_out), jnp.float32, -bound, bound)
        params[name] = (w, b)
    return params


if __name__ == "__main__":
    # Module-consistent small shapes; batch = 256 fills the v6e/v7x MXU M-dim
    # (and the 128x128 v5e MXU twice) while keeping the whole batch resident in
    # VMEM, which full-batch BatchNorm requires anyway (< 1 MiB total).
    batch = 256
    input_dim = 32
    n_dim = 100          # module default
    latent_dim = 16
    p_drop = 0.1

    root = jax.random.PRNGKey(0)
    k_x, k_params, k_rng = jax.random.split(root, 3)

    x = jax.random.normal(k_x, (batch, input_dim), jnp.float32)
    params = init_params(k_params, input_dim, n_dim, latent_dim)

    # bf16 weights: native single-pass MXU on all generations, half the weight DMA.
    w_slab, b_slab, lat = pack_generator_params(params, weights_dtype=jnp.bfloat16)

    s, out = generator_forward(x, k_rng, w_slab=w_slab, b_slab=b_slab,
                               latent_dim=lat, p_drop=p_drop)
    jax.block_until_ready((s, out))

    assert s.shape == (batch, latent_dim) and out.shape == (batch, input_dim)
    assert bool(jnp.all(jnp.isfinite(s))) and bool(jnp.all(jnp.isfinite(out)))
    assert bool(jnp.all(out >= 0.0))      # final ReLU
    print("KERNEL_OK")
</pallas_src>

<mosaic_0001>
module attributes {stable_mosaic.version = 11 : i64} {
  func.func @_generator_kernel(%arg0: memref<256x128xf32, #tpu.memory_space<vmem>>, %arg1: memref<256x128xf32, #tpu.memory_space<vmem>>, %arg2: memref<256x128xf32, #tpu.memory_space<vmem>>, %arg3: memref<1152x128xbf16, #tpu.memory_space<vmem>>, %arg4: memref<9x128xf32, #tpu.memory_space<vmem>>, %arg5: memref<256x256xf32, #tpu.memory_space<vmem>>) attributes {dimension_semantics = [], scalar_prefetch = 0 : i64, scratch_operands = 0 : i64, tpu.core_type = #tpu.core_type<tc>} {
    %c0 = arith.constant 0 : index
    %c0_0 = arith.constant 0 : index
    %0 = vector.load %arg0[%c0, %c0_0] : memref<256x128xf32, #tpu.memory_space<vmem>>, vector<256x128xf32>
    %c0_1 = arith.constant 0 : index
    %c0_2 = arith.constant 0 : index
    %1 = vector.load %arg1[%c0_1, %c0_2] : memref<256x128xf32, #tpu.memory_space<vmem>>, vector<256x128xf32>
    %2 = arith.mulf %0, %1 : vector<256x128xf32>
    %c0_3 = arith.constant 0 : index
    %c0_4 = arith.constant 0 : index
    %3 = vector.load %arg3[%c0_3, %c0_4] : memref<1152x128xbf16, #tpu.memory_space<vmem>>, vector<128x128xbf16>
    %4 = arith.truncf %2 : vector<256x128xf32> to vector<256x128xbf16>
    %cst = arith.constant dense<0.000000e+00> : vector<256x128xf32>
    %5 = tpu.matmul %4, %3, %cst {dimension_numbers = #tpu.dot_dimension_numbers<[1], [0], [0], [1], [0, 0, 1, 1], [], []>} : vector<256x128xbf16>, vector<128x128xbf16>, vector<256x128xf32> -> vector<256x128xf32>
    %cst_5 = arith.constant dense<0.000000e+00> : vector<128xf32>
    %6 = vector.multi_reduction <add>, %5, %cst_5 [0] : vector<256x128xf32> to vector<128xf32>
    %7 = vector.shape_cast %6 : vector<128xf32> to vector<1x128xf32>
    %cst_6 = arith.constant 2.560000e+02 : f32
    %8 = vector.broadcast %cst_6 : f32 to vector<1x128xf32>
    %9 = arith.divf %7, %8 : vector<1x128xf32>
    %10 = arith.mulf %5, %5 : vector<256x128xf32>
    %cst_7 = arith.constant dense<0.000000e+00> : vector<128xf32>
    %11 = vector.multi_reduction <add>, %10, %cst_7 [0] : vector<256x128xf32> to vector<128xf32>
    %12 = vector.shape_cast %11 : vector<128xf32> to vector<1x128xf32>
    %cst_8 = arith.constant 2.560000e+02 : f32
    %13 = vector.broadcast %cst_8 : f32 to vector<1x128xf32>
    %14 = arith.divf %12, %13 : vector<1x128xf32>
    %15 = arith.mulf %9, %9 : vector<1x128xf32>
    %16 = arith.subf %14, %15 : vector<1x128xf32>
    %cst_9 = arith.constant 0.000000e+00 : f32
    %17 = vector.broadcast %cst_9 : f32 to vector<1x128xf32>
    %18 = arith.maximumf %16, %17 : vector<1x128xf32>
    %19 = vector.broadcast %9 : vector<1x128xf32> to vector<256x128xf32>
    %20 = arith.subf %5, %19 : vector<256x128xf32>
    %cst_10 = arith.constant 1.000000e-10 : f32
    %21 = vector.broadcast %cst_10 : f32 to vector<1x128xf32>
    %22 = arith.addf %18, %21 : vector<1x128xf32>
    %23 = math.rsqrt %22 : vector<1x128xf32>
    %24 = vector.broadcast %23 : vector<1x128xf32> to vector<256x128xf32>
    %25 = arith.mulf %20, %24 : vector<256x128xf32>
    %cst_11 = arith.constant 0.000000e+00 : f32
    %26 = vector.broadcast %cst_11 : f32 to vector<256x128xf32>
    %27 = arith.maximumf %25, %26 : vector<256x128xf32>
    %c128 = arith.constant 128 : index
    %c0_12 = arith.constant 0 : index
    %28 = vector.load %arg3[%c128, %c0_12] : memref<1152x128xbf16, #tpu.memory_space<vmem>>, vector<128x128xbf16>
    %29 = arith.truncf %27 : vector<256x128xf32> to vector<256x128xbf16>
    %cst_13 = arith.constant dense<0.000000e+00> : vector<256x128xf32>
    %30 = tpu.matmul %29, %28, %cst_13 {dimension_numbers = #tpu.dot_dimension_numbers<[1], [0], [0], [1], [0, 0, 1, 1], [], []>} : vector<256x128xbf16>, vector<128x128xbf16>, vector<256x128xf32> -> vector<256x128xf32>
    %cst_14 = arith.constant dense<0.000000e+00> : vector<128xf32>
    %31 = vector.multi_reduction <add>, %30, %cst_14 [0] : vector<256x128xf32> to vector<128xf32>
    %32 = vector.shape_cast %31 : vector<128xf32> to vector<1x128xf32>
    %cst_15 = arith.constant 2.560000e+02 : f32
    %33 = vector.broadcast %cst_15 : f32 to vector<1x128xf32>
    %34 = arith.divf %32, %33 : vector<1x128xf32>
    %35 = arith.mulf %30, %30 : vector<256x128xf32>
    %cst_16 = arith.constant dense<0.000000e+00> : vector<128xf32>
    %36 = vector.multi_reduction <add>, %35, %cst_16 [0] : vector<256x128xf32> to vector<128xf32>
    %37 = vector.shape_cast %36 : vector<128xf32> to vector<1x128xf32>
    %cst_17 = arith.constant 2.560000e+02 : f32
    %38 = vector.broadcast %cst_17 : f32 to vector<1x128xf32>
    %39 = arith.divf %37, %38 : vector<1x128xf32>
    %40 = arith.mulf %34, %34 : vector<1x128xf32>
    %41 = arith.subf %39, %40 : vector<1x128xf32>
    %cst_18 = arith.constant 0.000000e+00 : f32
    %42 = vector.broadcast %cst_18 : f32 to vector<1x128xf32>
    %43 = arith.maximumf %41, %42 : vector<1x128xf32>
    %44 = vector.broadcast %34 : vector<1x128xf32> to vector<256x128xf32>
    %45 = arith.subf %30, %44 : vector<256x128xf32>
    %cst_19 = arith.constant 1.000000e-10 : f32
    %46 = vector.broadcast %cst_19 : f32 to vector<1x128xf32>
    %47 = arith.addf %43, %46 : vector<1x128xf32>
    %48 = math.rsqrt %47 : vector<1x128xf32>
    %49 = vector.broadcast %48 : vector<1x128xf32> to vector<256x128xf32>
    %50 = arith.mulf %45, %49 : vector<256x128xf32>
    %cst_20 = arith.constant 0.000000e+00 : f32
    %51 = vector.broadcast %cst_20 : f32 to vector<256x128xf32>
    %52 = arith.maximumf %50, %51 : vector<256x128xf32>
    %c256 = arith.constant 256 : index
    %c0_21 = arith.constant 0 : index
    %53 = vector.load %arg3[%c256, %c0_21] : memref<1152x128xbf16, #tpu.memory_space<vmem>>, vector<128x128xbf16>
    %54 = arith.truncf %52 : vector<256x128xf32> to vector<256x128xbf16>
    %cst_22 = arith.constant dense<0.000000e+00> : vector<256x128xf32>
    %55 = tpu.matmul %54, %53, %cst_22 {dimension_numbers = #tpu.dot_dimension_numbers<[1], [0], [0], [1], [0, 0, 1, 1], [], []>} : vector<256x128xbf16>, vector<128x128xbf16>, vector<256x128xf32> -> vector<256x128xf32>
    %cst_23 = arith.constant dense<0.000000e+00> : vector<128xf32>
    %56 = vector.multi_reduction <add>, %55, %cst_23 [0] : vector<256x128xf32> to vector<128xf32>
    %57 = vector.shape_cast %56 : vector<128xf32> to vector<1x128xf32>
    %cst_24 = arith.constant 2.560000e+02 : f32
    %58 = vector.broadcast %cst_24 : f32 to vector<1x128xf32>
    %59 = arith.divf %57, %58 : vector<1x128xf32>
    %60 = arith.mulf %55, %55 : vector<256x128xf32>
    %cst_25 = arith.constant dense<0.000000e+00> : vector<128xf32>
    %61 = vector.multi_reduction <add>, %60, %cst_25 [0] : vector<256x128xf32> to vector<128xf32>
    %62 = vector.shape_cast %61 : vector<128xf32> to vector<1x128xf32>
    %cst_26 = arith.constant 2.560000e+02 : f32
    %63 = vector.broadcast %cst_26 : f32 to vector<1x128xf32>
    %64 = arith.divf %62, %63 : vector<1x128xf32>
    %65 = arith.mulf %59, %59 : vector<1x128xf32>
    %66 = arith.subf %64, %65 : vector<1x128xf32>
    %cst_27 = arith.constant 0.000000e+00 : f32
    %67 = vector.broadcast %cst_27 : f32 to vector<1x128xf32>
    %68 = arith.maximumf %66, %67 : vector<1x128xf32>
    %69 = vector.broadcast %59 : vector<1x128xf32> to vector<256x128xf32>
    %70 = arith.subf %55, %69 : vector<256x128xf32>
    %cst_28 = arith.constant 1.000000e-10 : f32
    %71 = vector.broadcast %cst_28 : f32 to vector<1x128xf32>
    %72 = arith.addf %68, %71 : vector<1x128xf32>
    %73 = math.rsqrt %72 : vector<1x128xf32>
    %74 = vector.broadcast %73 : vector<1x128xf32> to vector<256x128xf32>
    %75 = arith.mulf %70, %74 : vector<256x128xf32>
    %cst_29 = arith.constant 0.000000e+00 : f32
    %76 = vector.broadcast %cst_29 : f32 to vector<256x128xf32>
    %77 = arith.maximumf %75, %76 : vector<256x128xf32>
    %c384 = arith.constant 384 : index
    %c0_30 = arith.constant 0 : index
    %78 = vector.load %arg3[%c384, %c0_30] : memref<1152x128xbf16, #tpu.memory_space<vmem>>, vector<128x128xbf16>
    %79 = arith.truncf %77 : vector<256x128xf32> to vector<256x128xbf16>
    %cst_31 = arith.constant dense<0.000000e+00> : vector<256x128xf32>
    %80 = tpu.matmul %79, %78, %cst_31 {dimension_numbers = #tpu.dot_dimension_numbers<[1], [0], [0], [1], [0, 0, 1, 1], [], []>} : vector<256x128xbf16>, vector<128x128xbf16>, vector<256x128xf32> -> vector<256x128xf32>
    %cst_32 = arith.constant dense<0.000000e+00> : vector<128xf32>
    %81 = vector.multi_reduction <add>, %80, %cst_32 [0] : vector<256x128xf32> to vector<128xf32>
    %82 = vector.shape_cast %81 : vector<128xf32> to vector<1x128xf32>
    %cst_33 = arith.constant 2.560000e+02 : f32
    %83 = vector.broadcast %cst_33 : f32 to vector<1x128xf32>
    %84 = arith.divf %82, %83 : vector<1x128xf32>
    %85 = arith.mulf %80, %80 : vector<256x128xf32>
    %cst_34 = arith.constant dense<0.000000e+00> : vector<128xf32>
    %86 = vector.multi_reduction <add>, %85, %cst_34 [0] : vector<256x128xf32> to vector<128xf32>
    %87 = vector.shape_cast %86 : vector<128xf32> to vector<1x128xf32>
    %cst_35 = arith.constant 2.560000e+02 : f32
    %88 = vector.broadcast %cst_35 : f32 to vector<1x128xf32>
    %89 = arith.divf %87, %88 : vector<1x128xf32>
    %90 = arith.mulf %84, %84 : vector<1x128xf32>
    %91 = arith.subf %89, %90 : vector<1x128xf32>
    %cst_36 = arith.constant 0.000000e+00 : f32
    %92 = vector.broadcast %cst_36 : f32 to vector<1x128xf32>
    %93 = arith.maximumf %91, %92 : vector<1x128xf32>
    %94 = vector.broadcast %84 : vector<1x128xf32> to vector<256x128xf32>
    %95 = arith.subf %80, %94 : vector<256x128xf32>
    %cst_37 = arith.constant 1.000000e-10 : f32
    %96 = vector.broadcast %cst_37 : f32 to vector<1x128xf32>
    %97 = arith.addf %93, %96 : vector<1x128xf32>
    %98 = math.rsqrt %97 : vector<1x128xf32>
    %99 = vector.broadcast %98 : vector<1x128xf32> to vector<256x128xf32>
    %100 = arith.mulf %95, %99 : vector<256x128xf32>
    %c512 = arith.constant 512 : index
    %c0_38 = arith.constant 0 : index
    %101 = vector.load %arg3[%c512, %c0_38] : memref<1152x128xbf16, #tpu.memory_space<vmem>>, vector<128x128xbf16>
    %102 = arith.truncf %77 : vector<256x128xf32> to vector<256x128xbf16>
    %cst_39 = arith.constant dense<0.000000e+00> : vector<256x128xf32>
    %103 = tpu.matmul %102, %101, %cst_39 {dimension_numbers = #tpu.dot_dimension_numbers<[1], [0], [0], [1], [0, 0, 1, 1], [], []>} : vector<256x128xbf16>, vector<128x128xbf16>, vector<256x128xf32> -> vector<256x128xf32>
    %c4 = arith.constant 4 : index
    %c0_40 = arith.constant 0 : index
    %104 = vector.load %arg4[%c4, %c0_40] : memref<9x128xf32, #tpu.memory_space<vmem>>, vector<1x128xf32>
    %105 = vector.broadcast %104 : vector<1x128xf32> to vector<256x128xf32>
    %106 = arith.addf %103, %105 : vector<256x128xf32>
    %107 = arith.negf %106 : vector<256x128xf32>
    %108 = math.exp %107 : vector<256x128xf32>
    %cst_41 = arith.constant 1.000000e+00 : f32
    %109 = vector.broadcast %cst_41 : f32 to vector<256x128xf32>
    %110 = arith.addf %109, %108 : vector<256x128xf32>
    %111 = arith.divf %109, %110 : vector<256x128xf32>
    %c0_42 = arith.constant 0 : index
    %c0_43 = arith.constant 0 : index
    %112 = vector.load %arg2[%c0_42, %c0_43] : memref<256x128xf32, #tpu.memory_space<vmem>>, vector<256x128xf32>
    %113 = arith.mulf %111, %112 : vector<256x128xf32>
    %114 = arith.addf %100, %113 : vector<256x128xf32>
    %c640 = arith.constant 640 : index
    %c0_44 = arith.constant 0 : index
    %115 = vector.load %arg3[%c640, %c0_44] : memref<1152x128xbf16, #tpu.memory_space<vmem>>, vector<128x128xbf16>
    %116 = arith.truncf %114 : vector<256x128xf32> to vector<256x128xbf16>
    %cst_45 = arith.constant dense<0.000000e+00> : vector<256x128xf32>
    %117 = tpu.matmul %116, %115, %cst_45 {dimension_numbers = #tpu.dot_dimension_numbers<[1], [0], [0], [1], [0, 0, 1, 1], [], []>} : vector<256x128xbf16>, vector<128x128xbf16>, vector<256x128xf32> -> vector<256x128xf32>
    %cst_46 = arith.constant dense<0.000000e+00> : vector<128xf32>
    %118 = vector.multi_reduction <add>, %117, %cst_46 [0] : vector<256x128xf32> to vector<128xf32>
    %119 = vector.shape_cast %118 : vector<128xf32> to vector<1x128xf32>
    %cst_47 = arith.constant 2.560000e+02 : f32
    %120 = vector.broadcast %cst_47 : f32 to vector<1x128xf32>
    %121 = arith.divf %119, %120 : vector<1x128xf32>
    %122 = arith.mulf %117, %117 : vector<256x128xf32>
    %cst_48 = arith.constant dense<0.000000e+00> : vector<128xf32>
    %123 = vector.multi_reduction <add>, %122, %cst_48 [0] : vector<256x128xf32> to vector<128xf32>
    %124 = vector.shape_cast %123 : vector<128xf32> to vector<1x128xf32>
    %cst_49 = arith.constant 2.560000e+02 : f32
    %125 = vector.broadcast %cst_49 : f32 to vector<1x128xf32>
    %126 = arith.divf %124, %125 : vector<1x128xf32>
    %127 = arith.mulf %121, %121 : vector<1x128xf32>
    %128 = arith.subf %126, %127 : vector<1x128xf32>
    %cst_50 = arith.constant 0.000000e+00 : f32
    %129 = vector.broadcast %cst_50 : f32 to vector<1x128xf32>
    %130 = arith.maximumf %128, %129 : vector<1x128xf32>
    %131 = vector.broadcast %121 : vector<1x128xf32> to vector<256x128xf32>
    %132 = arith.subf %117, %131 : vector<256x128xf32>
    %cst_51 = arith.constant 1.000000e-10 : f32
    %133 = vector.broadcast %cst_51 : f32 to vector<1x128xf32>
    %134 = arith.addf %130, %133 : vector<1x128xf32>
    %135 = math.rsqrt %134 : vector<1x128xf32>
    %136 = vector.broadcast %135 : vector<1x128xf32> to vector<256x128xf32>
    %137 = arith.mulf %132, %136 : vector<256x128xf32>
    %cst_52 = arith.constant 0.000000e+00 : f32
    %138 = vector.broadcast %cst_52 : f32 to vector<256x128xf32>
    %139 = arith.maximumf %137, %138 : vector<256x128xf32>
    %c768 = arith.constant 768 : index
    %c0_53 = arith.constant 0 : index
    %140 = vector.load %arg3[%c768, %c0_53] : memref<1152x128xbf16, #tpu.memory_space<vmem>>, vector<128x128xbf16>
    %141 = arith.truncf %139 : vector<256x128xf32> to vector<256x128xbf16>
    %cst_54 = arith.constant dense<0.000000e+00> : vector<256x128xf32>
    %142 = tpu.matmul %141, %140, %cst_54 {dimension_numbers = #tpu.dot_dimension_numbers<[1], [0], [0], [1], [0, 0, 1, 1], [], []>} : vector<256x128xbf16>, vector<128x128xbf16>, vector<256x128xf32> -> vector<256x128xf32>
    %cst_55 = arith.constant dense<0.000000e+00> : vector<128xf32>
    %143 = vector.multi_reduction <add>, %142, %cst_55 [0] : vector<256x128xf32> to vector<128xf32>
    %144 = vector.shape_cast %143 : vector<128xf32> to vector<1x128xf32>
    %cst_56 = arith.constant 2.560000e+02 : f32
    %145 = vector.broadcast %cst_56 : f32 to vector<1x128xf32>
    %146 = arith.divf %144, %145 : vector<1x128xf32>
    %147 = arith.mulf %142, %142 : vector<256x128xf32>
    %cst_57 = arith.constant dense<0.000000e+00> : vector<128xf32>
    %148 = vector.multi_reduction <add>, %147, %cst_57 [0] : vector<256x128xf32> to vector<128xf32>
    %149 = vector.shape_cast %148 : vector<128xf32> to vector<1x128xf32>
    %cst_58 = arith.constant 2.560000e+02 : f32
    %150 = vector.broadcast %cst_58 : f32 to vector<1x128xf32>
    %151 = arith.divf %149, %150 : vector<1x128xf32>
    %152 = arith.mulf %146, %146 : vector<1x128xf32>
    %153 = arith.subf %151, %152 : vector<1x128xf32>
    %cst_59 = arith.constant 0.000000e+00 : f32
    %154 = vector.broadcast %cst_59 : f32 to vector<1x128xf32>
    %155 = arith.maximumf %153, %154 : vector<1x128xf32>
    %156 = vector.broadcast %146 : vector<1x128xf32> to vector<256x128xf32>
    %157 = arith.subf %142, %156 : vector<256x128xf32>
    %cst_60 = arith.constant 1.000000e-10 : f32
    %158 = vector.broadcast %cst_60 : f32 to vector<1x128xf32>
    %159 = arith.addf %155, %158 : vector<1x128xf32>
    %160 = math.rsqrt %159 : vector<1x128xf32>
    %161 = vector.broadcast %160 : vector<1x128xf32> to vector<256x128xf32>
    %162 = arith.mulf %157, %161 : vector<256x128xf32>
    %cst_61 = arith.constant 0.000000e+00 : f32
    %163 = vector.broadcast %cst_61 : f32 to vector<256x128xf32>
    %164 = arith.maximumf %162, %163 : vector<256x128xf32>
    %c896 = arith.constant 896 : index
    %c0_62 = arith.constant 0 : index
    %165 = vector.load %arg3[%c896, %c0_62] : memref<1152x128xbf16, #tpu.memory_space<vmem>>, vector<128x128xbf16>
    %166 = arith.truncf %164 : vector<256x128xf32> to vector<256x128xbf16>
    %cst_63 = arith.constant dense<0.000000e+00> : vector<256x128xf32>
    %167 = tpu.matmul %166, %165, %cst_63 {dimension_numbers = #tpu.dot_dimension_numbers<[1], [0], [0], [1], [0, 0, 1, 1], [], []>} : vector<256x128xbf16>, vector<128x128xbf16>, vector<256x128xf32> -> vector<256x128xf32>
    %cst_64 = arith.constant dense<0.000000e+00> : vector<128xf32>
    %168 = vector.multi_reduction <add>, %167, %cst_64 [0] : vector<256x128xf32> to vector<128xf32>
    %169 = vector.shape_cast %168 : vector<128xf32> to vector<1x128xf32>
    %cst_65 = arith.constant 2.560000e+02 : f32
    %170 = vector.broadcast %cst_65 : f32 to vector<1x128xf32>
    %171 = arith.divf %169, %170 : vector<1x128xf32>
    %172 = arith.mulf %167, %167 : vector<256x128xf32>
    %cst_66 = arith.constant dense<0.000000e+00> : vector<128xf32>
    %173 = vector.multi_reduction <add>, %172, %cst_66 [0] : vector<256x128xf32> to vector<128xf32>
    %174 = vector.shape_cast %173 : vector<128xf32> to vector<1x128xf32>
    %cst_67 = arith.constant 2.560000e+02 : f32
    %175 = vector.broadcast %cst_67 : f32 to vector<1x128xf32>
    %176 = arith.divf %174, %175 : vector<1x128xf32>
    %177 = arith.mulf %171, %171 : vector<1x128xf32>
    %178 = arith.subf %176, %177 : vector<1x128xf32>
    %cst_68 = arith.constant 0.000000e+00 : f32
    %179 = vector.broadcast %cst_68 : f32 to vector<1x128xf32>
    %180 = arith.maximumf %178, %179 : vector<1x128xf32>
    %181 = vector.broadcast %171 : vector<1x128xf32> to vector<256x128xf32>
    %182 = arith.subf %167, %181 : vector<256x128xf32>
    %cst_69 = arith.constant 1.000000e-10 : f32
    %183 = vector.broadcast %cst_69 : f32 to vector<1x128xf32>
    %184 = arith.addf %180, %183 : vector<1x128xf32>
    %185 = math.rsqrt %184 : vector<1x128xf32>
    %186 = vector.broadcast %185 : vector<1x128xf32> to vector<256x128xf32>
    %187 = arith.mulf %182, %186 : vector<256x128xf32>
    %cst_70 = arith.constant 0.000000e+00 : f32
    %188 = vector.broadcast %cst_70 : f32 to vector<256x128xf32>
    %189 = arith.maximumf %187, %188 : vector<256x128xf32>
    %c1024 = arith.constant 1024 : index
    %c0_71 = arith.constant 0 : index
    %190 = vector.load %arg3[%c1024, %c0_71] : memref<1152x128xbf16, #tpu.memory_space<vmem>>, vector<128x128xbf16>
    %191 = arith.truncf %189 : vector<256x128xf32> to vector<256x128xbf16>
    %cst_72 = arith.constant dense<0.000000e+00> : vector<256x128xf32>
    %192 = tpu.matmul %191, %190, %cst_72 {dimension_numbers = #tpu.dot_dimension_numbers<[1], [0], [0], [1], [0, 0, 1, 1], [], []>} : vector<256x128xbf16>, vector<128x128xbf16>, vector<256x128xf32> -> vector<256x128xf32>
    %c8 = arith.constant 8 : index
    %c0_73 = arith.constant 0 : index
    %193 = vector.load %arg4[%c8, %c0_73] : memref<9x128xf32, #tpu.memory_space<vmem>>, vector<1x128xf32>
    %194 = vector.broadcast %193 : vector<1x128xf32> to vector<256x128xf32>
    %195 = arith.addf %192, %194 : vector<256x128xf32>
    %cst_74 = arith.constant 0.000000e+00 : f32
    %196 = vector.broadcast %cst_74 : f32 to vector<256x128xf32>
    %197 = arith.maximumf %195, %196 : vector<256x128xf32>
    %c0_75 = arith.constant 0 : index
    %c0_76 = arith.constant 0 : index
    %198 = vector.load %arg5[%c0_75, %c0_76] : memref<256x256xf32, #tpu.memory_space<vmem>>, vector<256x128xf32>
    tpu.vector_store %arg5[%c0_75, %c0_76], %114 {strides = array<i32>} : memref<256x256xf32, #tpu.memory_space<vmem>>, vector<256x128xf32>,
    %c0_77 = arith.constant 0 : index
    %c128_78 = arith.constant 128 : index
    %199 = vector.load %arg5[%c0_77, %c128_78] : memref<256x256xf32, #tpu.memory_space<vmem>>, vector<256x128xf32>
    tpu.vector_store %arg5[%c0_77, %c128_78], %197 {strides = array<i32>} : memref<256x256xf32, #tpu.memory_space<vmem>>, vector<256x128xf32>,
    return
  }
}

</mosaic_0001>

<bundles_post_ra>
// kernel: tpu_custom_call.1
= control target key start
LH: loop header
LB: loop body
LE: loop exit
PB: predicated region body
PF: predicated region fallthrough
CT: control target
= control target key end

     0   :  { %10 = vsyncpa [#allocation3], 0  ;;  %s7476_s0 = inlined_call_operand.hbm [shape: f32[256,128], index: 0, kind: input, shape index: {}]   ;;  %s7477_s1 = inlined_call_operand.hbm [shape: f32[256,128], index: 1, kind: input, shape index: {}]   ;;  %s7478_s2 = inlined_call_operand.hbm [shape: f32[256,128], index: 2, kind: input, shape index: {}]   ;;  %s7479_s3 = inlined_call_operand.hbm [shape: bf16[1152,128], index: 3, kind: input, shape index: {}]   ;;  %s7480_s4 = inlined_call_operand.hbm [shape: f32[9,128], index: 4, kind: input, shape index: {}]   ;;  %s7481_s5 = inlined_call_operand.hbm [shape: f32[256,256], index: 5, kind: output, shape index: {}]  }
   0x1   :  { %11 = vsyncpa [#allocation6], 0 }
   0x2   :  { %12 = vsyncpa [#allocation9], 0 }
   0x3   :  { %13 = vsyncpa [#allocation4], 0  ;;  %s5320_s18 = smov [#allocation5]   ;;  %s5321_s20 = smov [#allocation8]  }
   0x4   :  { %s31_s19 = sshll.u32 %s5320_s18, 4  ;;  %s55_s21 = sshll.u32 %s5321_s20, 4  ;;  %s32_s19 = int_to_ptr.vmem [resolvable:$true] %s31_s19  ;;  %s5362_s21 = int_to_ptr.vmem [resolvable:$true] %s55_s21 }
   0x5   :  { %s5180_s24 = scalar_lea.hbm %s7477_s1, 4096 }
   0x6   :  { %p5181_p0 = scmp.ne.s32.totalorder %s7477_s1, %s5180_s24  ;;  %p5184_p1 = scmp.lt.u32.totalorder %s5180_s24, %s7477_s1 }
   0x8   :  { %p5186_p2 = pnand %p5184_p1, %p5181_p0 }
   0xa   :  { %5189 = shalt.err (!%p5186_p2)
}
   0xb   :  { %s5190_s29 = scalar_lea.vmem %s32_s19, 4096  ;;  %p5195_p4 = scmp.lt.s32.totalorder %s32_s19, %s32_s19 }
   0xc   :  { %p5191_p3 = scmp.ne.s32.totalorder %s32_s19, %s5190_s29  ;;  %p5196_p5 = scmp.lt.s32.totalorder %s5190_s29, %s5190_s29 }
   0xe   :  { %p5197_p6 = por %p5196_p5, %p5195_p4 }
  0x10   :  { %p5198_p7 = pnand %p5197_p6, %p5191_p3 }
  0x12   :  { %5201 = shalt.err (!%p5198_p7)
}
  0x13   :  { %s5322_s30 = smov 128   ;;  %s5323_s6 = smov 8  }
  0x14   :  { %37 = dma.hbm_to_vmem [thread:$0]  %s7477_s1, 4096, %s32_s19, [#allocation6], %s5322_s30, %s5322_s30, %s5323_s6  }
  0x15   :  { %s5202_s11 = scalar_lea.hbm %s7479_s3, 9216 }
  0x16   :  { %p5203_p8 = scmp.ne.s32.totalorder %s7479_s3, %s5202_s11  ;;  %p5206_p9 = scmp.lt.u32.totalorder %s5202_s11, %s7479_s3 }
  0x18   :  { %p5208_p10 = pnand %p5206_p9, %p5203_p8 }
  0x1a   :  { %5211 = shalt.err (!%p5208_p10)
}
  0x1b   :  { %s5212_s16 = scalar_lea.vmem %s5362_s21, 9216  ;;  %p5217_p12 = scmp.lt.s32.totalorder %s5362_s21, %s5362_s21 }
  0x1c   :  { %p5213_p11 = scmp.ne.s32.totalorder %s5362_s21, %s5212_s16  ;;  %p5218_p13 = scmp.lt.s32.totalorder %s5212_s16, %s5212_s16 }
  0x1e   :  { %p5219_p0 = por %p5218_p13, %p5217_p12 }
  0x20   :  { %p5220_p1 = pnand %p5219_p0, %p5213_p11 }
  0x22   :  { %5223 = shalt.err (!%p5220_p1)
}
  0x23   :  { %s5324_s1 = smov 64   ;;  %s5325_s17 = smov 4  }
  0x24   :  { %61 = dma.hbm_to_vmem [thread:$0]  %s7479_s3, 9216, %s5362_s21, [#allocation9], %s5324_s1, %s5324_s1, %s5325_s17  }
  0x25   :  { %s5326_s20 = smov [#allocation2]   ;;  %s5327_s23 = smov [#allocation7]  }
  0x26   :  { %s19_s22 = sshll.u32 %s5326_s20, 4  ;;  %s43_s24 = sshll.u32 %s5327_s23, 4  ;;  %s20_s22 = int_to_ptr.vmem [resolvable:$true] %s19_s22  ;;  %s5396_s24 = int_to_ptr.vmem [resolvable:$true] %s43_s24 }
  0x27   :  { %s5224_s27 = scalar_lea.hbm %s7476_s0, 4096 }
  0x28   :  { %p5225_p2 = scmp.ne.s32.totalorder %s7476_s0, %s5224_s27  ;;  %p5228_p3 = scmp.lt.u32.totalorder %s5224_s27, %s7476_s0 }
  0x2a   :  { %p5230_p4 = pnand %p5228_p3, %p5225_p2 }
  0x2c   :  { %5233 = shalt.err (!%p5230_p4)
}
  0x2d   :  { %s5234_s3 = scalar_lea.vmem %s20_s22, 4096  ;;  %p5239_p6 = scmp.lt.s32.totalorder %s20_s22, %s20_s22 }
  0x2e   :  { %p5235_p5 = scmp.ne.s32.totalorder %s20_s22, %s5234_s3  ;;  %p5240_p7 = scmp.lt.s32.totalorder %s5234_s3, %s5234_s3 }
  0x30   :  { %p5241_p8 = por %p5240_p7, %p5239_p6 }
  0x32   :  { %p5242_p9 = pnand %p5241_p8, %p5235_p5 }
  0x34   :  { %5245 = shalt.err (!%p5242_p9)
}
  0x35   :  { %25 = dma.hbm_to_vmem [thread:$0]  %s7476_s0, 4096, %s20_s22, [#allocation3], %s5322_s30, %s5322_s30, %s5323_s6  }
  0x36   :  { %s5246_s12 = scalar_lea.hbm %s7478_s2, 4096 }
  0x37   :  { %p5247_p10 = scmp.ne.s32.totalorder %s7478_s2, %s5246_s12  ;;  %p5250_p11 = scmp.lt.u32.totalorder %s5246_s12, %s7478_s2 }
  0x39   :  { %p5252_p12 = pnand %p5250_p11, %p5247_p10 }
  0x3b   :  { %5255 = shalt.err (!%p5252_p12)
}
  0x3c   :  { %s5256_s1 = scalar_lea.vmem %s5396_s24, 4096  ;;  %p5261_p0 = scmp.lt.s32.totalorder %s5396_s24, %s5396_s24 }
  0x3d   :  { %p5257_p13 = scmp.ne.s32.totalorder %s5396_s24, %s5256_s1  ;;  %p5262_p1 = scmp.lt.s32.totalorder %s5256_s1, %s5256_s1 }
  0x3f   :  { %p5263_p2 = por %p5262_p1, %p5261_p0 }
  0x41   :  { %p5264_p3 = pnand %p5263_p2, %p5257_p13 }
  0x43   :  { %5267 = shalt.err (!%p5264_p3)
}
  0x44   :  { %49 = dma.hbm_to_vmem [thread:$0]  %s7478_s2, 4096, %s5396_s24, [#allocation6], %s5322_s30, %s5322_s30, %s5323_s6  }
  0x45   :  { %s5328_s18 = smov [#allocation10]   ;;  %s5268_s23 = scalar_lea.hbm %s7480_s4, 256 }
  0x46   :  { %s67_s19 = sshll.u32 %s5328_s18, 4  ;;  %p5269_p4 = scmp.ne.s32.totalorder %s7480_s4, %s5268_s23  ;;  %s68_s19 = int_to_ptr.vmem [resolvable:$true] %s67_s19 }
  0x47   :  { %p5272_p5 = scmp.lt.u32.totalorder %s5268_s23, %s7480_s4 }
  0x49   :  { %p5274_p6 = pnand %p5272_p5, %p5269_p4 }
  0x4b   :  { %5277 = shalt.err (!%p5274_p6)
}
  0x4c   :  { %s5278_s29 = scalar_lea.vmem %s68_s19, 256  ;;  %p5283_p8 = scmp.lt.s32.totalorder %s68_s19, %s68_s19 }
  0x4d   :  { %p5279_p7 = scmp.ne.s32.totalorder %s68_s19, %s5278_s29  ;;  %p5284_p9 = scmp.lt.s32.totalorder %s5278_s29, %s5278_s29 }
  0x4f   :  { %p5285_p10 = por %p5284_p9, %p5283_p8 }
  0x51   :  { %p5286_p11 = pnand %p5285_p10, %p5279_p7 }
  0x53   :  { %5289 = shalt.err (!%p5286_p11)
}
  0x54   :  { %73 = dma.hbm_to_vmem [thread:$0]  %s7480_s4, 256, %s68_s19, [#allocation9], %s5322_s30, %s5322_s30, %s5323_s6  }
  0x55   :  { %5312 = dma.done.wait [#allocation3], 4096  }
  0x56   :  { %5313 = vsyncadd [#allocation3], 4294963200 }
  0x57   :  { %5314 = dma.done.wait [#allocation6], 8192  }
  0x58   :  { %5315 = vsyncadd [#allocation6], 4294959104 }
  0x59   :  { %5316 = dma.done.wait [#allocation9], 9472  }
  0x5a   :  { %5317 = vsyncadd [#allocation9], 4294957824  ;;  %v4966_v0 = vld [vmem:[#allocation8] sm:$0xff]   ;;  %v4967_v1 = vld [vmem:[#allocation8 + $0x8] sm:$0xff]   ;;  %s5329_s4 = smov [#allocation11]  }
  0x5b   :  { %4506 = vmatprep.subr.bf16.mxu0 %v4966_v0  ;;  %4938 = vmatprep.subr.bf16.mxu1 %v4966_v0  ;;  %v4968_v2 = vld [vmem:[#allocation8 + $0x10] sm:$0xff]   ;;  %v4969_v3 = vld [vmem:[#allocation8 + $0x18] sm:$0xff]   ;;  %v90_v4 = vld [vmem:[#allocation2] sm:$0xff]  ;;  %s4170_s30 = sshll.u32 %s5329_s4, 4  ;;  %s4171_s30 = int_to_ptr.vmem [resolvable:$true] %s4170_s30 }
  0x5c   :  { %4507 = vmatpush3.bf16.msra.mxu0 %v4966_v0  ;;  %4946 = vmatpush3.bf16.msra.mxu1 %v4966_v0  ;;  %v91_v5 = vld [vmem:[#allocation2 + $0x8] sm:$0xff]  ;;  %v122_v6 = vld [vmem:[#allocation5] sm:$0xff]  ;;  %v4972_v17 = vld [vmem:[#allocation8 + $0x30] sm:$0xff]   ;;  %s5290_s6 = scalar_lea.vmem %s4171_s30, 8192  ;;  %p5295_p13 = scmp.lt.s32.totalorder %s4171_s30, %s4171_s30 }
  0x5d   :  { %4508 = vmatprep.subr.bf16.mxu0 %v4967_v1  ;;  %4939 = vmatprep.subr.bf16.mxu1 %v4967_v1  ;;  %v123_v7 = vld [vmem:[#allocation5 + $0x8] sm:$0xff]  ;;  %v154_v8 = vmul.f32 %v122_v6, %v90_v4  ;;  %v4970_v10 = vld [vmem:[#allocation8 + $0x20] sm:$0xff]   ;;  %v92_v18 = vld [vmem:[#allocation2 + $0x10] sm:$0xff]  ;;  %p5291_p12 = scmp.ne.s32.totalorder %s4171_s30, %s5290_s6  ;;  %p5296_p0 = scmp.lt.s32.totalorder %s5290_s6, %s5290_s6 }
  0x5e   :  { %v155_v9 = vmul.f32 %v123_v7, %v91_v5  ;;  %v4971_v12 = vld [vmem:[#allocation8 + $0x28] sm:$0xff]   ;;  %v106_v13 = vld [vmem:[#allocation2 + $0x80] sm:$0xff]  ;;  %v124_v19 = vld [vmem:[#allocation5 + $0x10] sm:$0xff] }
  0x5f   :  { %v107_v14 = vld [vmem:[#allocation2 + $0x88] sm:$0xff]  ;;  %v138_v15 = vld [vmem:[#allocation5 + $0x80] sm:$0xff]  ;;  %v93_v22 = vld [vmem:[#allocation2 + $0x18] sm:$0xff]  ;;  %v156_v38 = vmul.f32 %v124_v19, %v92_v18  ;;  %p5297_p1 = por %p5296_p0, %p5295_p13 }
  0x60   :  { %4509 = vmatpush3.bf16.msra.mxu0 %v4967_v1  ;;  %4947 = vmatpush3.bf16.msra.mxu1 %v4967_v1  ;;  %v202_v11 = vpack.c.bf16 %v155_v9, %v154_v8  ;;  %v139_v16 = vld [vmem:[#allocation5 + $0x88] sm:$0xff]  ;;  %v170_v20 = vmul.f32 %v138_v15, %v106_v13  ;;  %v125_v23 = vld [vmem:[#allocation5 + $0x18] sm:$0xff]  ;;  %v94_v24 = vld [vmem:[#allocation2 + $0x20] sm:$0xff] }
  0x61   :  { %4510 = vmatprep.subr.bf16.mxu0 %v4968_v2  ;;  %4940 = vmatprep.subr.bf16.mxu1 %v4968_v2  ;;  %v171_v21 = vmul.f32 %v139_v16, %v107_v14  ;;  %v126_v25 = vld [vmem:[#allocation5 + $0x20] sm:$0xff]  ;;  %v4973_v26 = vld [vmem:[#allocation8 + $0x38] sm:$0xff]   ;;  %v95_v27 = vld [vmem:[#allocation2 + $0x28] sm:$0xff]  ;;  %v157_v39 = vmul.f32 %v125_v23, %v93_v22  ;;  %p5298_p2 = pnand %p5297_p1, %p5291_p12 }
  0x62   :  { %4522 = vmatprep.mubr.bf16.mxu0 %v202_v11  ;;  %v127_v28 = vld [vmem:[#allocation5 + $0x28] sm:$0xff]  ;;  %v108_v30 = vld [vmem:[#allocation2 + $0x90] sm:$0xff]  ;;  %v109_v31 = vld [vmem:[#allocation2 + $0x98] sm:$0xff]  ;;  %v158_v40 = vmul.f32 %v126_v25, %v94_v24 }
  0x63   :  { %v210_v29 = vpack.c.bf16 %v171_v21, %v170_v20  ;;  %v140_v32 = vld [vmem:[#allocation5 + $0x90] sm:$0xff]  ;;  %v141_v33 = vld [vmem:[#allocation5 + $0x98] sm:$0xff]  ;;  %v110_v34 = vld [vmem:[#allocation2 + $0xa0] sm:$0xff]  ;;  %v159_v43 = vmul.f32 %v127_v28, %v95_v27  ;;  %v203_v56 = vpack.c.bf16 %v157_v39, %v156_v38 }
  0x64   :  { %4511 = vmatpush3.bf16.msra.mxu0 %v4968_v2  ;;  %4948 = vmatpush3.bf16.msra.mxu1 %v4968_v2  ;;  %v111_v35 = vld [vmem:[#allocation2 + $0xa8] sm:$0xff]  ;;  %v142_v36 = vld [vmem:[#allocation5 + $0xa0] sm:$0xff]  ;;  %v172_v41 = vmul.f32 %v140_v32, %v108_v30  ;;  %v173_v42 = vmul.f32 %v141_v33, %v109_v31  ;;  %v96_v46 = vld [vmem:[#allocation2 + $0x30] sm:$0xff] }
  0x65   :  { %4512 = vmatprep.subr.bf16.mxu0 %v4969_v3  ;;  %4941 = vmatprep.subr.bf16.mxu1 %v4969_v3  ;;  %v143_v37 = vld [vmem:[#allocation5 + $0xa8] sm:$0xff]  ;;  %v174_v44 = vmul.f32 %v142_v36, %v110_v34  ;;  %v97_v47 = vld [vmem:[#allocation2 + $0x38] sm:$0xff]  ;;  %v128_v48 = vld [vmem:[#allocation5 + $0x30] sm:$0xff]  ;;  %v204_v0 = vpack.c.bf16 %v159_v43, %v158_v40 }
  0x66   :  { %4538 = vmatprep.mubr.bf16.mxu1 %v210_v29  ;;  %v175_v45 = vmul.f32 %v143_v37, %v111_v35  ;;  %v129_v49 = vld [vmem:[#allocation5 + $0x38] sm:$0xff]  ;;  %v98_v50 = vld [vmem:[#allocation2 + $0x40] sm:$0xff]  ;;  %v112_v52 = vld [vmem:[#allocation2 + $0xb0] sm:$0xff]  ;;  %v211_v59 = vpack.c.bf16 %v173_v42, %v172_v41  ;;  %v160_v2 = vmul.f32 %v128_v48, %v96_v46 }
  0x67   :  { %v130_v51 = vld [vmem:[#allocation5 + $0x40] sm:$0xff]  ;;  %v113_v53 = vld [vmem:[#allocation2 + $0xb8] sm:$0xff]  ;;  %v144_v54 = vld [vmem:[#allocation5 + $0xb0] sm:$0xff] }
  0x68   :  { %4513 = vmatpush3.bf16.msra.mxu0 %v4969_v3  ;;  %4949 = vmatpush3.bf16.msra.mxu1 %v4969_v3  ;;  %v145_v55 = vld [vmem:[#allocation5 + $0xb8] sm:$0xff]  ;;  %v99_v57 = vld [vmem:[#allocation2 + $0x48] sm:$0xff]  ;;  %v114_v60 = vld [vmem:[#allocation2 + $0xc0] sm:$0xff]  ;;  %v212_v1 = vpack.c.bf16 %v175_v45, %v174_v44  ;;  %v161_v3 = vmul.f32 %v129_v49, %v97_v47  ;;  %v162_v4 = vmul.f32 %v130_v51, %v98_v50 }
  0x69   :  { %4514 = vmatprep.subr.bf16.mxu0 %v4970_v10  ;;  %4942 = vmatprep.subr.bf16.mxu1 %v4970_v10  ;;  %v131_v58 = vld [vmem:[#allocation5 + $0x48] sm:$0xff]  ;;  %v146_v62 = vld [vmem:[#allocation5 + $0xc0] sm:$0xff]  ;;  %v176_v5 = vmul.f32 %v144_v54, %v112_v52  ;;  %v177_v6 = vmul.f32 %v145_v55, %v113_v53  ;;  %v101_v11 = vld [vmem:[#allocation2 + $0x58] sm:$0xff] }
  0x6a   :  { %v115_v61 = vld [vmem:[#allocation2 + $0xc8] sm:$0xff]  ;;  %v163_v7 = vmul.f32 %v131_v58, %v99_v57  ;;  %v178_v8 = vmul.f32 %v146_v62, %v114_v60  ;;  %v133_v13 = vld [vmem:[#allocation5 + $0x58] sm:$0xff]  ;;  %v102_v14 = vld [vmem:[#allocation2 + $0x60] sm:$0xff]  ;;  %v205_v20 = vpack.c.bf16 %v161_v3, %v160_v2 }
  0x6b   :  { %v147_v63 = vld [vmem:[#allocation5 + $0xc8] sm:$0xff]  ;;  %v134_v15 = vld [vmem:[#allocation5 + $0x60] sm:$0xff]  ;;  %v116_v16 = vld [vmem:[#allocation2 + $0xd0] sm:$0xff]  ;;  %v213_v23 = vpack.c.bf16 %v177_v6, %v176_v5  ;;  %v165_v31 = vmul.f32 %v133_v13, %v101_v11 }
  0x6c   :  { %4515 = vmatpush3.bf16.msra.mxu0 %v4970_v10  ;;  %4950 = vmatpush3.bf16.msra.mxu1 %v4970_v10  ;;  %v179_v9 = vmul.f32 %v147_v63, %v115_v61  ;;  %v100_v10 = vld [vmem:[#allocation2 + $0x50] sm:$0xff]  ;;  %v149_v19 = vld [vmem:[#allocation5 + $0xd8] sm:$0xff]  ;;  %v103_v21 = vld [vmem:[#allocation2 + $0x68] sm:$0xff]  ;;  %v206_v28 = vpack.c.bf16 %v163_v7, %v162_v4  ;;  %v166_v32 = vmul.f32 %v134_v15, %v102_v14 }
  0x6d   :  { %4516 = vmatprep.subr.bf16.mxu0 %v4971_v12  ;;  %4943 = vmatprep.subr.bf16.mxu1 %v4971_v12  ;;  %v148_v18 = vld [vmem:[#allocation5 + $0xd0] sm:$0xff]  ;;  %v135_v22 = vld [vmem:[#allocation5 + $0x68] sm:$0xff]  ;;  %v118_v24 = vld [vmem:[#allocation2 + $0xe0] sm:$0xff] }
  0x6e   :  { %v119_v25 = vld [vmem:[#allocation2 + $0xe8] sm:$0xff]  ;;  %v214_v29 = vpack.c.bf16 %v179_v9, %v178_v8  ;;  %v180_v33 = vmul.f32 %v148_v18, %v116_v16  ;;  %v167_v35 = vmul.f32 %v135_v22, %v103_v21  ;;  %v104_v38 = vld [vmem:[#allocation2 + $0x70] sm:$0xff]  ;;  %v105_v40 = vld [vmem:[#allocation2 + $0x78] sm:$0xff] }
  0x6f   :  { %v151_v27 = vld [vmem:[#allocation5 + $0xe8] sm:$0xff]  ;;  %v136_v39 = vld [vmem:[#allocation5 + $0x70] sm:$0xff]  ;;  %v137_v41 = vld [vmem:[#allocation5 + $0x78] sm:$0xff] }
  0x70   :  { %4517 = vmatpush3.bf16.msra.mxu0 %v4971_v12  ;;  %4951 = vmatpush3.bf16.msra.mxu1 %v4971_v12  ;;  %v132_v12 = vld [vmem:[#allocation5 + $0x50] sm:$0xff]  ;;  %v183_v37 = vmul.f32 %v151_v27, %v119_v25  ;;  %v121_v43 = vld [vmem:[#allocation2 + $0xf8] sm:$0xff]  ;;  %v208_v48 = vpack.c.bf16 %v167_v35, %v166_v32  ;;  %v168_v50 = vmul.f32 %v136_v39, %v104_v38  ;;  %v4975_v57 = vld [vmem:[#allocation8 + $0x48] sm:$0xff]  }
  0x71   :  { %4518 = vmatprep.subr.bf16.mxu0 %v4972_v17  ;;  %4944 = vmatprep.subr.bf16.mxu1 %v4972_v17  ;;  %v164_v30 = vmul.f32 %v132_v12, %v100_v10  ;;  %v120_v42 = vld [vmem:[#allocation2 + $0xf0] sm:$0xff]  ;;  %v153_v45 = vld [vmem:[#allocation5 + $0xf8] sm:$0xff]  ;;  %v169_v51 = vmul.f32 %v137_v41, %v105_v40  ;;  %v4978_v60 = vld [vmem:[#allocation8 + $0x60] sm:$0xff]  }
  0x72   :  { %v152_v44 = vld [vmem:[#allocation5 + $0xf0] sm:$0xff]  ;;  %v185_v53 = vmul.f32 %v153_v45, %v121_v43  ;;  %v4979_v61 = vld [vmem:[#allocation8 + $0x68] sm:$0xff]   ;;  %v4981_v63 = vld [vmem:[#allocation8 + $0x78] sm:$0xff]  }
  0x73   :  { %v207_v46 = vpack.c.bf16 %v165_v31, %v164_v30  ;;  %v184_v52 = vmul.f32 %v152_v44, %v120_v42  ;;  %v209_v54 = vpack.c.bf16 %v169_v51, %v168_v50  ;;  %v4976_v58 = vld [vmem:[#allocation8 + $0x50] sm:$0xff]  }
  0x74   :  { %4519 = vmatpush3.bf16.msra.mxu0 %v4972_v17  ;;  %4952 = vmatpush3.bf16.msra.mxu1 %v4972_v17  ;;  %v117_v17 = vld [vmem:[#allocation2 + $0xd8] sm:$0xff]  ;;  %v4980_v62 = vld [vmem:[#allocation8 + $0x70] sm:$0xff]  }
  0x75   :  { %4520 = vmatprep.subr.bf16.mxu0 %v4973_v26  ;;  %4945 = vmatprep.subr.bf16.mxu1 %v4973_v26  ;;  %v181_v34 = vmul.f32 %v149_v19, %v117_v17  ;;  %v217_v55 = vpack.c.bf16 %v185_v53, %v184_v52 }
  0x77   :  { %v215_v47 = vpack.c.bf16 %v181_v34, %v180_v33 }
  0x78   :  { %4521 = vmatpush3.bf16.msra.mxu0 %v4973_v26  ;;  %4953 = vmatpush3.bf16.msra.mxu1 %v4973_v26  ;;  %v150_v26 = vld [vmem:[#allocation5 + $0xe0] sm:$0xff] }
  0x79   :  { %v182_v36 = vmul.f32 %v150_v26, %v118_v24 }
  0x7b   :  { %4523 = vmatmul.mubr.bf16.vlgmr.msra.gmra.mrb[0].mxu0 %v203_v56  ;;  %4539 = vmatmul.mubr.bf16.vlgmr.msra.gmra.mrb[0].mxu1 %v211_v59  ;;  %v216_v49 = vpack.c.bf16 %v183_v37, %v182_v36  ;;  %v4974_v56 = vld [vmem:[#allocation8 + $0x40] sm:$0xff]   ;;  %v4977_v59 = vld [vmem:[#allocation8 + $0x58] sm:$0xff]  }
  0x7c   :  { %4526 = vmatprep.mubr.bf16.mxu0 %v204_v0  ;;  %4542 = vmatprep.mubr.bf16.mxu1 %v212_v1 }
  0x7d   :  { %4554 = vmatprep.subr.bf16.mxu1 %v4974_v56 }
  0x7e   :  { %4555 = vmatpush3.bf16.msra.mxu1 %v4974_v56 }
  0x7f   :  { %4556 = vmatprep.subr.bf16.mxu1 %v4975_v57 }
  0x82   :  { %4557 = vmatpush3.bf16.msra.mxu1 %v4975_v57 }
  0x83   :  { %4527 = vmatmul.mubr.bf16.gmra.mrb[4].mxu0 %v205_v20  ;;  %4543 = vmatmul.mubr.bf16.gmra.mrb[4].mxu1 %v213_v23 }
  0x84   :  { %4530 = vmatprep.mubr.bf16.mxu0 %v206_v28  ;;  %4546 = vmatprep.mubr.bf16.mxu1 %v214_v29 }
  0x85   :  { %4558 = vmatprep.subr.bf16.mxu1 %v4976_v58 }
  0x86   :  { %4559 = vmatpush3.bf16.msra.mxu1 %v4976_v58 }
  0x87   :  { %4560 = vmatprep.subr.bf16.mxu1 %v4977_v59 }
  0x8a   :  { %4561 = vmatpush3.bf16.msra.mxu1 %v4977_v59 }
  0x8b   :  { %4531 = vmatmul.mubr.bf16.gmra.mrb[8].mxu0 %v207_v46  ;;  %4547 = vmatmul.mubr.bf16.gmra.mrb[8].mxu1 %v215_v47 }
  0x8c   :  { %4534 = vmatprep.mubr.bf16.mxu0 %v208_v48  ;;  %4550 = vmatprep.mubr.bf16.mxu1 %v216_v49 }
  0x8d   :  { %4562 = vmatprep.subr.bf16.mxu1 %v4978_v60 }
  0x8e   :  { %4563 = vmatpush3.bf16.msra.mxu1 %v4978_v60 }
  0x8f   :  { %4564 = vmatprep.subr.bf16.mxu1 %v4979_v61 }
  0x92   :  { %4565 = vmatpush3.bf16.msra.mxu1 %v4979_v61 }
  0x93   :  { %4535 = vmatmul.mubr.bf16.gmra.mrb[12].mxu0 %v209_v54  ;;  %4551 = vmatmul.mubr.bf16.gmra.mrb[12].mxu1 %v217_v55 }
  0x94   :  { %4566 = vmatprep.subr.bf16.mxu1 %v4980_v62 }
  0x96   :  { %4567 = vmatpush3.bf16.msra.mxu1 %v4980_v62 }
  0x97   :  { %4568 = vmatprep.subr.bf16.mxu1 %v4981_v63 }
  0x9a   :  { %4569 = vmatpush3.bf16.msra.mxu1 %v4981_v63 }
 0x14e   :  { %v5448_v0 = vpop.f32.mrb[0].mxu0  ;;  %v5450_v1 = vpop.f32.mrb[0].mxu1 }
 0x14f   :  { %v5452_v2 = vpop.f32.mrb[1].mxu0  ;;  %v5454_v3 = vpop.f32.mrb[1].mxu1  ;;  %v468_v11 = vmul.f32 %v5448_v0, %v5448_v0 }
 0x150   :  { %v5456_v4 = vpop.f32.mrb[2].mxu0  ;;  %v5458_v5 = vpop.f32.mrb[2].mxu1  ;;  %v466_v8 = vmul.f32 %v5452_v2, %v5452_v2 }
 0x151   :  { %v5460_v6 = vpop.f32.mrb[3].mxu0  ;;  %v5462_v7 = vpop.f32.mrb[3].mxu1  ;;  %v469_v14 = vmul.f32 %v5456_v4, %v5456_v4 }
 0x152   :  { %v427_v9 = vadd.f32 %v5460_v6, %v5452_v2  ;;  %v467_v10 = vmul.f32 %v5460_v6, %v5460_v6 }
 0x154   :  { %v428_v12 = vadd.f32 %v5448_v0, %v427_v9  ;;  %v498_v13 = vadd.f32 %v467_v10, %v466_v8 }
 0x156   :  { %v499_v15 = vadd.f32 %v498_v13, %v468_v11  ;;  %v5475_v16 = vpop.f32.mrb[4].mxu0  ;;  %v429_v17 = vadd.f32 %v5456_v4, %v428_v12  ;;  %v5478_v18 = vpop.f32.mrb[4].mxu1 }
 0x157   :  { %v5480_v19 = vpop.f32.mrb[5].mxu0  ;;  %v5482_v20 = vpop.f32.mrb[5].mxu1  ;;  %v472_v31 = vmul.f32 %v5475_v16, %v5475_v16 }
 0x158   :  { %v430_v21 = vadd.f32 %v429_v17, %v5480_v19  ;;  %v470_v22 = vmul.f32 %v5480_v19, %v5480_v19  ;;  %v500_v23 = vadd.f32 %v499_v15, %v469_v14  ;;  %v5487_v24 = vpop.f32.mrb[6].mxu0  ;;  %v5489_v25 = vpop.f32.mrb[6].mxu1 }
 0x159   :  { %v5491_v26 = vpop.f32.mrb[7].mxu0  ;;  %v5493_v27 = vpop.f32.mrb[7].mxu1  ;;  %v473_v34 = vmul.f32 %v5487_v24, %v5487_v24 }
 0x15a   :  { %v501_v28 = vadd.f32 %v500_v23, %v470_v22  ;;  %v431_v29 = vadd.f32 %v430_v21, %v5491_v26  ;;  %v471_v30 = vmul.f32 %v5491_v26, %v5491_v26 }
 0x15c   :  { %v432_v32 = vadd.f32 %v5475_v16, %v431_v29  ;;  %v502_v33 = vadd.f32 %v501_v28, %v471_v30  ;;  %v482_v29 = vmul.f32 %v5454_v3, %v5454_v3 }
 0x15e   :  { %v503_v35 = vadd.f32 %v502_v33, %v472_v31  ;;  %v5503_v36 = vpop.f32.mrb[8].mxu0  ;;  %v433_v37 = vadd.f32 %v5487_v24, %v432_v32  ;;  %v5506_v38 = vpop.f32.mrb[8].mxu1 }
 0x15f   :  { %v5508_v39 = vpop.f32.mrb[9].mxu0  ;;  %v5510_v40 = vpop.f32.mrb[9].mxu1  ;;  %v476_v51 = vmul.f32 %v5503_v36, %v5503_v36 }
 0x160   :  { %v434_v41 = vadd.f32 %v433_v37, %v5508_v39  ;;  %v474_v42 = vmul.f32 %v5508_v39, %v5508_v39  ;;  %v504_v43 = vadd.f32 %v503_v35, %v473_v34  ;;  %v5515_v44 = vpop.f32.mrb[10].mxu0  ;;  %v5517_v45 = vpop.f32.mrb[10].mxu1  ;;  %v483_v34 = vmul.f32 %v5462_v7, %v5462_v7 }
 0x161   :  { %v5519_v46 = vpop.f32.mrb[11].mxu0  ;;  %v5521_v47 = vpop.f32.mrb[11].mxu1  ;;  %v477_v54 = vmul.f32 %v5515_v44, %v5515_v44  ;;  %v484_v35 = vmul.f32 %v5450_v1, %v5450_v1 }
 0x162   :  { %v505_v48 = vadd.f32 %v504_v43, %v474_v42  ;;  %v435_v49 = vadd.f32 %v434_v41, %v5519_v46  ;;  %v475_v50 = vmul.f32 %v5519_v46, %v5519_v46  ;;  %v485_v42 = vmul.f32 %v5458_v5, %v5458_v5 }
 0x164   :  { %v436_v52 = vadd.f32 %v5503_v36, %v435_v49  ;;  %v506_v53 = vadd.f32 %v505_v48, %v475_v50  ;;  %v486_v49 = vmul.f32 %v5482_v20, %v5482_v20 }
 0x166   :  { %v507_v55 = vadd.f32 %v506_v53, %v476_v51  ;;  %v5531_v56 = vpop.f32.mrb[12].mxu0  ;;  %v437_v57 = vadd.f32 %v5515_v44, %v436_v52  ;;  %v5534_v58 = vpop.f32.mrb[12].mxu1 }
 0x167   :  { %v5536_v59 = vpop.f32.mrb[13].mxu0  ;;  %v5538_v60 = vpop.f32.mrb[13].mxu1  ;;  %v480_v15 = vmul.f32 %v5531_v56, %v5531_v56 }
 0x168   :  { %v438_v61 = vadd.f32 %v437_v57, %v5536_v59  ;;  %v478_v62 = vmul.f32 %v5536_v59, %v5536_v59  ;;  %v508_v63 = vadd.f32 %v507_v55, %v477_v54  ;;  %v5543_v8 = vpop.f32.mrb[14].mxu0  ;;  %v5545_v9 = vpop.f32.mrb[14].mxu1  ;;  %v487_v54 = vmul.f32 %v5493_v27, %v5493_v27 }
 0x169   :  { %v5547_v10 = vpop.f32.mrb[15].mxu0  ;;  %v5549_v11 = vpop.f32.mrb[15].mxu1  ;;  %v481_v22 = vmul.f32 %v5543_v8, %v5543_v8  ;;  %v488_v55 = vmul.f32 %v5478_v18, %v5478_v18 }
 0x16a   :  { %v509_v12 = vadd.f32 %v508_v63, %v478_v62  ;;  %v439_v13 = vadd.f32 %v438_v61, %v5547_v10  ;;  %v479_v14 = vmul.f32 %v5547_v10, %v5547_v10  ;;  %v489_v62 = vmul.f32 %v5489_v25, %v5489_v25 }
 0x16c   :  { %v440_v17 = vadd.f32 %v5531_v56, %v439_v13  ;;  %v510_v21 = vadd.f32 %v509_v12, %v479_v14  ;;  %v490_v13 = vmul.f32 %v5510_v40, %v5510_v40 }
 0x16e   :  { %v511_v23 = vadd.f32 %v510_v21, %v480_v15  ;;  %v441_v28 = vadd.f32 %v5543_v8, %v440_v17 }
 0x170   :  { %v442_v30 = vadd.f32 %v441_v28, %v5454_v3  ;;  %v512_v31 = vadd.f32 %v511_v23, %v481_v22  ;;  %v491_v22 = vmul.f32 %v5521_v47, %v5521_v47  ;;  %v492_v23 = vmul.f32 %v5506_v38, %v5506_v38 }
 0x172   :  { %v513_v32 = vadd.f32 %v512_v31, %v482_v29  ;;  %v443_v33 = vadd.f32 %v442_v30, %v5462_v7  ;;  %v493_v30 = vmul.f32 %v5517_v45, %v5517_v45 }
 0x174   :  { %v444_v37 = vadd.f32 %v5450_v1, %v443_v33  ;;  %v514_v41 = vadd.f32 %v513_v32, %v483_v34  ;;  %v494_v33 = vmul.f32 %v5538_v60, %v5538_v60 }
 0x176   :  { %v515_v43 = vadd.f32 %v514_v41, %v484_v35  ;;  %v445_v48 = vadd.f32 %v5458_v5, %v444_v37 }
 0x178   :  { %v446_v50 = vadd.f32 %v445_v48, %v5482_v20  ;;  %v516_v51 = vadd.f32 %v515_v43, %v485_v42  ;;  %v495_v42 = vmul.f32 %v5549_v11, %v5549_v11  ;;  %v496_v43 = vmul.f32 %v5534_v58, %v5534_v58 }
 0x17a   :  { %v517_v52 = vadd.f32 %v516_v51, %v486_v49  ;;  %v447_v53 = vadd.f32 %v446_v50, %v5493_v27  ;;  %v497_v50 = vmul.f32 %v5545_v9, %v5545_v9 }
 0x17c   :  { %v448_v57 = vadd.f32 %v5478_v18, %v447_v53  ;;  %v518_v61 = vadd.f32 %v517_v52, %v487_v54 }
 0x17e   :  { %v519_v63 = vadd.f32 %v518_v61, %v488_v55  ;;  %v449_v12 = vadd.f32 %v5489_v25, %v448_v57 }
 0x180   :  { %v450_v14 = vadd.f32 %v449_v12, %v5510_v40  ;;  %v520_v15 = vadd.f32 %v519_v63, %v489_v62 }
 0x182   :  { %v521_v17 = vadd.f32 %v520_v15, %v490_v13  ;;  %v451_v21 = vadd.f32 %v450_v14, %v5521_v47 }
 0x184   :  { %v452_v28 = vadd.f32 %v5506_v38, %v451_v21  ;;  %v522_v29 = vadd.f32 %v521_v17, %v491_v22 }
 0x186   :  { %v523_v31 = vadd.f32 %v522_v29, %v492_v23  ;;  %v453_v32 = vadd.f32 %v5517_v45, %v452_v28 }
 0x188   :  { %v454_v34 = vadd.f32 %v453_v32, %v5538_v60  ;;  %v524_v35 = vadd.f32 %v523_v31, %v493_v30 }
 0x18a   :  { %v525_v37 = vadd.f32 %v524_v35, %v494_v33  ;;  %v455_v41 = vadd.f32 %v454_v34, %v5549_v11 }
 0x18c   :  { %v456_v48 = vadd.f32 %v5534_v58, %v455_v41  ;;  %v526_v49 = vadd.f32 %v525_v37, %v495_v42 }
 0x18e   :  { %v457_v51 = vadd.f32 %v5545_v9, %v456_v48  ;;  %v527_v52 = vadd.f32 %v526_v49, %v496_v43 }
 0x190   :  { %v458_v53 = vrot.slane %v457_v51, 4  ;;  %v528_v54 = vadd.f32 %v527_v52, %v497_v50 }
 0x192   :  { %v459_v55 = vadd.f32 %v458_v53, %v457_v51  ;;  %v529_v57 = vrot.slane %v528_v54, 4 }
 0x194   :  { %v460_v61 = vrot.slane %v459_v55, 2  ;;  %v530_v62 = vadd.f32 %v529_v57, %v528_v54 }
 0x196   :  { %v461_v63 = vadd.f32 %v460_v61, %v459_v55  ;;  %v531_v12 = vrot.slane %v530_v62, 2 }
 0x198   :  { %v462_v13 = vrot.slane %v461_v63, 1  ;;  %v532_v14 = vadd.f32 %v531_v12, %v530_v62 }
 0x19a   :  { %v463_v15 = vadd.f32 %v462_v13, %v461_v63  ;;  %v533_v17 = vrot.slane %v532_v14, 1 }
 0x19c   :  { %v5608_v21 = vmul.f32 0.00390625, %v463_v15  ;;  %v534_v22 = vadd.f32 %v533_v17, %v532_v14 }
 0x19e   :  { %v535_v23 = vmul.f32 0.00390625, %v534_v22  ;;  %v536_v28 = vmul.f32 %v5608_v21, %v5608_v21  ;;  %v568_v29 = vsub.f32 %v5549_v11, %v5608_v21  ;;  %v539_v30 = vsub.f32 %v5452_v2, %v5608_v21 }
 0x19f   :  { %v540_v31 = vsub.f32 %v5460_v6, %v5608_v21  ;;  %v541_v32 = vsub.f32 %v5448_v0, %v5608_v21  ;;  %v542_v33 = vsub.f32 %v5456_v4, %v5608_v21  ;;  %v543_v34 = vsub.f32 %v5480_v19, %v5608_v21 }
 0x1a0   :  { %v537_v35 = vsub.f32 %v535_v23, %v536_v28  ;;  %v544_v37 = vsub.f32 %v5491_v26, %v5608_v21  ;;  %v545_v11 = vsub.f32 %v5475_v16, %v5608_v21  ;;  %v546_v2 = vsub.f32 %v5487_v24, %v5608_v21 }
 0x1a1   :  { %v547_v6 = vsub.f32 %v5508_v39, %v5608_v21  ;;  %v548_v0 = vsub.f32 %v5519_v46, %v5608_v21  ;;  %v549_v4 = vsub.f32 %v5503_v36, %v5608_v21  ;;  %v550_v19 = vsub.f32 %v5515_v44, %v5608_v21 }
 0x1a2   :  { %v538_v41 = vmax.f32 %v537_v35, 0.0  ;;  %v551_v26 = vsub.f32 %v5536_v59, %v5608_v21  ;;  %v552_v16 = vsub.f32 %v5547_v10, %v5608_v21  ;;  %v553_v24 = vsub.f32 %v5531_v56, %v5608_v21 }
 0x1a3   :  { %v554_v39 = vsub.f32 %v5543_v8, %v5608_v21  ;;  %v555_v46 = vsub.f32 %v5454_v3, %v5608_v21  ;;  %v556_v36 = vsub.f32 %v5462_v7, %v5608_v21  ;;  %v557_v44 = vsub.f32 %v5450_v1, %v5608_v21 }
 0x1a4   :  { %v571_v42 = vadd.f32 1e-10, %v538_v41  ;;  %v558_v59 = vsub.f32 %v5458_v5, %v5608_v21  ;;  %v559_v10 = vsub.f32 %v5482_v20, %v5608_v21  ;;  %v560_v56 = vsub.f32 %v5493_v27, %v5608_v21 }
 0x1a5   :  { %v561_v8 = vsub.f32 %v5478_v18, %v5608_v21  ;;  %v562_v3 = vsub.f32 %v5489_v25, %v5608_v21  ;;  %v563_v7 = vsub.f32 %v5510_v40, %v5608_v21  ;;  %v564_v1 = vsub.f32 %v5521_v47, %v5608_v21 }
 0x1a6   :  { %5038 = vrsqrt.f32 %v571_v42  ;;  %v565_v5 = vsub.f32 %v5506_v38, %v5608_v21  ;;  %v566_v20 = vsub.f32 %v5517_v45, %v5608_v21  ;;  %v567_v27 = vsub.f32 %v5538_v60, %v5608_v21 }
 0x1a7   :  { %v569_v18 = vsub.f32 %v5534_v58, %v5608_v21  ;;  %v570_v25 = vsub.f32 %v5545_v9, %v5608_v21 }
 0x1b0   :  { %v5039_v40 = vpop.eup %5038 }
 0x1b1   :  { %v5676_v43 = vmul.f32 %v5039_v40, %v568_v29  ;;  %v573_v47 = vmul.f32 %v5039_v40, %v539_v30  ;;  %v574_v48 = vmul.f32 %v5039_v40, %v540_v31  ;;  %v575_v49 = vmul.f32 %v5039_v40, %v541_v32 }
 0x1b2   :  { %v576_v50 = vmul.f32 %v5039_v40, %v542_v33  ;;  %v577_v38 = vmul.f32 %v5039_v40, %v543_v34  ;;  %v578_v51 = vmul.f32 %v5039_v40, %v544_v37  ;;  %v579_v52 = vmul.f32 %v5039_v40, %v545_v11 }
 0x1b3   :  { %v580_v45 = vmul.f32 %v5039_v40, %v546_v2  ;;  %v581_v53 = vmul.f32 %v5039_v40, %v547_v6  ;;  %v582_v54 = vmul.f32 %v5039_v40, %v548_v0  ;;  %v583_v60 = vmul.f32 %v5039_v40, %v549_v4 }
 0x1b4   :  { %v584_v55 = vmul.f32 %v5039_v40, %v550_v19  ;;  %v585_v57 = vmul.f32 %v5039_v40, %v551_v26  ;;  %v586_v58 = vmul.f32 %v5039_v40, %v552_v16  ;;  %v587_v61 = vmul.f32 %v5039_v40, %v553_v24 }
 0x1b5   :  { %v588_v62 = vmul.f32 %v5039_v40, %v554_v39  ;;  %v589_v9 = vmul.f32 %v5039_v40, %v555_v46  ;;  %v590_v63 = vmul.f32 %v5039_v40, %v556_v36  ;;  %v591_v12 = vmul.f32 %v5039_v40, %v557_v44 }
 0x1b6   :  { %v592_v13 = vmul.f32 %v5039_v40, %v558_v59  ;;  %v593_v14 = vmul.f32 %v5039_v40, %v559_v10  ;;  %v594_v15 = vmul.f32 %v5039_v40, %v560_v56  ;;  %v595_v17 = vmul.f32 %v5039_v40, %v561_v8 }
 0x1b7   :  { %v596_v21 = vmul.f32 %v5039_v40, %v562_v3  ;;  %v597_v22 = vmul.f32 %v5039_v40, %v563_v7  ;;  %v598_v23 = vmul.f32 %v5039_v40, %v564_v1  ;;  %v599_v28 = vmul.f32 %v5039_v40, %v565_v5 }
 0x1b8   :  { %v600_v29 = vmul.f32 %v5039_v40, %v566_v20  ;;  %v601_v30 = vmul.f32 %v5039_v40, %v567_v27  ;;  %v603_v31 = vmul.f32 %v5039_v40, %v569_v18  ;;  %v604_v32 = vmul.f32 %v5039_v40, %v570_v25 }
 0x1b9   :  { %v607_v33 = vmax.f32 %v575_v49, 0.0  ;;  %v608_v34 = vmax.f32 %v576_v50, 0.0  ;;  %v605_v35 = vmax.f32 %v573_v47, 0.0  ;;  %v606_v37 = vmax.f32 %v574_v48, 0.0 }
 0x1ba   :  { %v609_v11 = vmax.f32 %v577_v38, 0.0  ;;  %v610_v2 = vmax.f32 %v578_v51, 0.0  ;;  %v611_v6 = vmax.f32 %v579_v52, 0.0  ;;  %v612_v0 = vmax.f32 %v580_v45, 0.0 }
 0x1bb   :  { %v654_v4 = vpack.c.bf16 %v608_v34, %v607_v33  ;;  %v653_v19 = vpack.c.bf16 %v606_v37, %v605_v35  ;;  %v613_v41 = vmax.f32 %v581_v53, 0.0  ;;  %v614_v26 = vmax.f32 %v582_v54, 0.0 }
 0x1bc   :  { %v655_v16 = vpack.c.bf16 %v610_v2, %v609_v11  ;;  %v656_v24 = vpack.c.bf16 %v612_v0, %v611_v6  ;;  %v615_v39 = vmax.f32 %v583_v60, 0.0  ;;  %v616_v46 = vmax.f32 %v584_v55, 0.0 }
 0x1bd   :  { %4570 = vmatprep.mubr.bf16.mxu1 %v653_v19  ;;  %v657_v36 = vpack.c.bf16 %v614_v26, %v613_v41  ;;  %v617_v44 = vmax.f32 %v585_v57, 0.0  ;;  %v618_v42 = vmax.f32 %v586_v58, 0.0  ;;  %v619_v59 = vmax.f32 %v587_v61, 0.0 }
 0x1be   :  { %4571 = vmatmul.mubr.bf16.vlgmr.msra.gmra.mrb[16].mxu1 %v654_v4  ;;  %v658_v10 = vpack.c.bf16 %v616_v46, %v615_v39  ;;  %v620_v56 = vmax.f32 %v588_v62, 0.0  ;;  %v621_v8 = vmax.f32 %v589_v9, 0.0  ;;  %v622_v3 = vmax.f32 %v590_v63, 0.0  ;;  %v4982_v9 = vld [vmem:[#allocation8 + $0x80] sm:$0xff]   ;;  %v4984_v63 = vld [vmem:[#allocation8 + $0x90] sm:$0xff]  }
 0x1bf   :  { %4574 = vmatprep.mubr.bf16.mxu1 %v655_v16  ;;  %v659_v7 = vpack.c.bf16 %v618_v42, %v617_v44  ;;  %v623_v1 = vmax.f32 %v591_v12, 0.0  ;;  %v624_v5 = vmax.f32 %v592_v13, 0.0  ;;  %v625_v20 = vmax.f32 %v593_v14, 0.0  ;;  %4602 = vmatprep.subr.bf16.mxu0 %v4982_v9  ;;  %v4985_v12 = vld [vmem:[#allocation8 + $0x98] sm:$0xff]   ;;  %v4986_v13 = vld [vmem:[#allocation8 + $0xa0] sm:$0xff]   ;;  %v4987_v14 = vld [vmem:[#allocation8 + $0xa8] sm:$0xff]  }
 0x1c0   :  { %v660_v27 = vpack.c.bf16 %v620_v56, %v619_v59  ;;  %v661_v18 = vpack.c.bf16 %v622_v3, %v621_v8  ;;  %v626_v25 = vmax.f32 %v594_v15, 0.0  ;;  %v627_v40 = vmax.f32 %v595_v17, 0.0  ;;  %4603 = vmatpush3.bf16.msra.mxu0 %v4982_v9  ;;  %v4988_v15 = vld [vmem:[#allocation8 + $0xb0] sm:$0xff]   ;;  %v4989_v17 = vld [vmem:[#allocation8 + $0xb8] sm:$0xff]  }
 0x1c1   :  { %v662_v47 = vpack.c.bf16 %v624_v5, %v623_v1  ;;  %v628_v48 = vmax.f32 %v596_v21, 0.0  ;;  %v629_v49 = vmax.f32 %v597_v22, 0.0  ;;  %v630_v50 = vmax.f32 %v598_v23, 0.0 }
 0x1c2   :  { %v663_v38 = vpack.c.bf16 %v626_v25, %v625_v20  ;;  %v631_v51 = vmax.f32 %v599_v28, 0.0  ;;  %v632_v52 = vmax.f32 %v600_v29, 0.0  ;;  %v633_v45 = vmax.f32 %v601_v30, 0.0 }
 0x1c3   :  { %v664_v53 = vpack.c.bf16 %v628_v48, %v627_v40  ;;  %v665_v54 = vpack.c.bf16 %v630_v50, %v629_v49  ;;  %v634_v60 = vmax.f32 %v5676_v43, 0.0  ;;  %v635_v55 = vmax.f32 %v603_v31, 0.0  ;;  %v4983_v43 = vld [vmem:[#allocation8 + $0x88] sm:$0xff]  }
 0x1c4   :  { %v666_v57 = vpack.c.bf16 %v632_v52, %v631_v51  ;;  %v636_v58 = vmax.f32 %v604_v32, 0.0  ;;  %4604 = vmatprep.subr.bf16.mxu0 %v4983_v43 }
 0x1c5   :  { %v667_v61 = vpack.c.bf16 %v634_v60, %v633_v45  ;;  %4605 = vmatpush3.bf16.msra.mxu0 %v4983_v43 }
 0x1c6   :  { %4575 = vmatmul.mubr.bf16.gmra.mrb[20].mxu1 %v656_v24  ;;  %v668_v62 = vpack.c.bf16 %v636_v58, %v635_v55  ;;  %4606 = vmatprep.subr.bf16.mxu0 %v4984_v63 }
 0x1c7   :  { %4578 = vmatprep.mubr.bf16.mxu1 %v657_v36 }
 0x1c9   :  { %4607 = vmatpush3.bf16.msra.mxu0 %v4984_v63 }
 0x1ca   :  { %4608 = vmatprep.subr.bf16.mxu0 %v4985_v12 }
 0x1cd   :  { %4609 = vmatpush3.bf16.msra.mxu0 %v4985_v12 }
 0x1ce   :  { %4579 = vmatmul.mubr.bf16.gmra.mrb[24].mxu1 %v658_v10  ;;  %4610 = vmatprep.subr.bf16.mxu0 %v4986_v13 }
 0x1cf   :  { %4582 = vmatprep.mubr.bf16.mxu1 %v659_v7 }
 0x1d1   :  { %4611 = vmatpush3.bf16.msra.mxu0 %v4986_v13 }
 0x1d2   :  { %4612 = vmatprep.subr.bf16.mxu0 %v4987_v14 }
 0x1d5   :  { %4613 = vmatpush3.bf16.msra.mxu0 %v4987_v14 }
 0x1d6   :  { %4583 = vmatmul.mubr.bf16.gmra.mrb[28].mxu1 %v660_v27  ;;  %4614 = vmatprep.subr.bf16.mxu0 %v4988_v15 }
 0x1d7   :  { %4586 = vmatprep.mubr.bf16.mxu1 %v661_v18 }
 0x1d9   :  { %4615 = vmatpush3.bf16.msra.mxu0 %v4988_v15 }
 0x1da   :  { %4616 = vmatprep.subr.bf16.mxu0 %v4989_v17 }
 0x1dd   :  { %4617 = vmatpush3.bf16.msra.mxu0 %v4989_v17 }
 0x1de   :  { %4587 = vmatmul.mubr.bf16.gmra.mrb[32].mxu1 %v662_v47 }
 0x1df   :  { %4590 = vmatprep.mubr.bf16.mxu1 %v663_v38 }
 0x1e6   :  { %4591 = vmatmul.mubr.bf16.gmra.mrb[36].mxu1 %v664_v53 }
 0x1e7   :  { %4594 = vmatprep.mubr.bf16.mxu1 %v665_v54 }
 0x1ee   :  { %4595 = vmatmul.mubr.bf16.gmra.mrb[40].mxu1 %v666_v57 }
 0x1ef   :  { %4598 = vmatprep.mubr.bf16.mxu1 %v667_v61 }
 0x1f6   :  { %4599 = vmatmul.mubr.bf16.gmra.mrb[44].mxu1 %v668_v62 }
 0x291   :  { %v5679_v21 = vpop.f32.mrb[16].mxu1 }
 0x292   :  { %v5681_v22 = vpop.f32.mrb[17].mxu1  ;;  %v918_v32 = vmul.f32 %v5679_v21, %v5679_v21 }
 0x293   :  { %v5683_v23 = vpop.f32.mrb[18].mxu1  ;;  %v916_v29 = vmul.f32 %v5681_v22, %v5681_v22 }
 0x294   :  { %v5685_v28 = vpop.f32.mrb[19].mxu1  ;;  %v919_v35 = vmul.f32 %v5683_v23, %v5683_v23 }
 0x295   :  { %v878_v30 = vadd.f32 %v5685_v28, %v5681_v22  ;;  %v917_v31 = vmul.f32 %v5685_v28, %v5685_v28 }
 0x297   :  { %v879_v33 = vadd.f32 %v5679_v21, %v878_v30  ;;  %v948_v34 = vadd.f32 %v917_v31, %v916_v29 }
 0x299   :  { %v949_v37 = vadd.f32 %v948_v34, %v918_v32  ;;  %v5698_v11 = vpop.f32.mrb[20].mxu1  ;;  %v880_v2 = vadd.f32 %v5683_v23, %v879_v33 }
 0x29a   :  { %v5701_v6 = vpop.f32.mrb[21].mxu1  ;;  %v922_v46 = vmul.f32 %v5698_v11, %v5698_v11 }
 0x29b   :  { %v881_v0 = vadd.f32 %v880_v2, %v5701_v6  ;;  %v920_v4 = vmul.f32 %v5701_v6, %v5701_v6  ;;  %v950_v19 = vadd.f32 %v949_v37, %v919_v35  ;;  %v5706_v41 = vpop.f32.mrb[22].mxu1 }
 0x29c   :  { %v5708_v26 = vpop.f32.mrb[23].mxu1  ;;  %v923_v42 = vmul.f32 %v5706_v41, %v5706_v41 }
 0x29d   :  { %v951_v16 = vadd.f32 %v950_v19, %v920_v4  ;;  %v882_v24 = vadd.f32 %v881_v0, %v5708_v26  ;;  %v921_v39 = vmul.f32 %v5708_v26, %v5708_v26 }
 0x29f   :  { %v883_v36 = vadd.f32 %v5698_v11, %v882_v24  ;;  %v952_v44 = vadd.f32 %v951_v16, %v921_v39 }
 0x2a1   :  { %v953_v59 = vadd.f32 %v952_v44, %v922_v46  ;;  %v5718_v10 = vpop.f32.mrb[24].mxu1  ;;  %v884_v56 = vadd.f32 %v5706_v41, %v883_v36 }
 0x2a2   :  { %v5721_v8 = vpop.f32.mrb[25].mxu1  ;;  %v926_v40 = vmul.f32 %v5718_v10, %v5718_v10 }
 0x2a3   :  { %v885_v3 = vadd.f32 %v884_v56, %v5721_v8  ;;  %v924_v7 = vmul.f32 %v5721_v8, %v5721_v8  ;;  %v954_v1 = vadd.f32 %v953_v59, %v923_v42  ;;  %v5726_v5 = vpop.f32.mrb[26].mxu1 }
 0x2a4   :  { %v5728_v20 = vpop.f32.mrb[27].mxu1  ;;  %v927_v49 = vmul.f32 %v5726_v5, %v5726_v5 }
 0x2a5   :  { %v955_v27 = vadd.f32 %v954_v1, %v924_v7  ;;  %v886_v18 = vadd.f32 %v885_v3, %v5728_v20  ;;  %v925_v25 = vmul.f32 %v5728_v20, %v5728_v20 }
 0x2a7   :  { %v887_v47 = vadd.f32 %v5718_v10, %v886_v18  ;;  %v956_v48 = vadd.f32 %v955_v27, %v925_v25 }
 0x2a9   :  { %v957_v50 = vadd.f32 %v956_v48, %v926_v40  ;;  %v5738_v38 = vpop.f32.mrb[28].mxu1  ;;  %v888_v51 = vadd.f32 %v5726_v5, %v887_v47 }
 0x2aa   :  { %v5741_v52 = vpop.f32.mrb[29].mxu1  ;;  %v930_v62 = vmul.f32 %v5738_v38, %v5738_v38 }
 0x2ab   :  { %v889_v45 = vadd.f32 %v888_v51, %v5741_v52  ;;  %v928_v53 = vmul.f32 %v5741_v52, %v5741_v52  ;;  %v958_v54 = vadd.f32 %v957_v50, %v927_v49  ;;  %v5746_v60 = vpop.f32.mrb[30].mxu1 }
 0x2ac   :  { %v5748_v55 = vpop.f32.mrb[31].mxu1  ;;  %v931_v63 = vmul.f32 %v5746_v60, %v5746_v60 }
 0x2ad   :  { %v959_v57 = vadd.f32 %v958_v54, %v928_v53  ;;  %v890_v58 = vadd.f32 %v889_v45, %v5748_v55  ;;  %v929_v61 = vmul.f32 %v5748_v55, %v5748_v55 }
 0x2af   :  { %v891_v9 = vadd.f32 %v5738_v38, %v890_v58  ;;  %v960_v43 = vadd.f32 %v959_v57, %v929_v61 }
 0x2b1   :  { %v961_v12 = vadd.f32 %v960_v43, %v930_v62  ;;  %v5758_v13 = vpop.f32.mrb[32].mxu1  ;;  %v892_v14 = vadd.f32 %v5746_v60, %v891_v9 }
 0x2b2   :  { %v5761_v15 = vpop.f32.mrb[33].mxu1  ;;  %v934_v37 = vmul.f32 %v5758_v13, %v5758_v13 }
 0x2b3   :  { %v893_v17 = vadd.f32 %v892_v14, %v5761_v15  ;;  %v932_v29 = vmul.f32 %v5761_v15, %v5761_v15  ;;  %v962_v30 = vadd.f32 %v961_v12, %v931_v63  ;;  %v5766_v31 = vpop.f32.mrb[34].mxu1 }
 0x2b4   :  { %v5768_v32 = vpop.f32.mrb[35].mxu1  ;;  %v935_v4 = vmul.f32 %v5766_v31, %v5766_v31 }
 0x2b5   :  { %v963_v33 = vadd.f32 %v962_v30, %v932_v29  ;;  %v894_v34 = vadd.f32 %v893_v17, %v5768_v32  ;;  %v933_v35 = vmul.f32 %v5768_v32, %v5768_v32 }
 0x2b7   :  { %v895_v2 = vadd.f32 %v5758_v13, %v894_v34  ;;  %v964_v0 = vadd.f32 %v963_v33, %v933_v35 }
 0x2b9   :  { %v965_v19 = vadd.f32 %v964_v0, %v934_v37  ;;  %v5778_v16 = vpop.f32.mrb[36].mxu1  ;;  %v896_v24 = vadd.f32 %v5766_v31, %v895_v2 }
 0x2ba   :  { %v5781_v39 = vpop.f32.mrb[37].mxu1  ;;  %v938_v1 = vmul.f32 %v5778_v16, %v5778_v16 }
 0x2bb   :  { %v897_v46 = vadd.f32 %v896_v24, %v5781_v39  ;;  %v936_v36 = vmul.f32 %v5781_v39, %v5781_v39  ;;  %v966_v44 = vadd.f32 %v965_v19, %v935_v4  ;;  %v5786_v42 = vpop.f32.mrb[38].mxu1 }
 0x2bc   :  { %v5788_v59 = vpop.f32.mrb[39].mxu1  ;;  %v939_v25 = vmul.f32 %v5786_v42, %v5786_v42 }
 0x2bd   :  { %v967_v56 = vadd.f32 %v966_v44, %v936_v36  ;;  %v898_v3 = vadd.f32 %v897_v46, %v5788_v59  ;;  %v937_v7 = vmul.f32 %v5788_v59, %v5788_v59 }
 0x2bf   :  { %v899_v27 = vadd.f32 %v5778_v16, %v898_v3  ;;  %v968_v18 = vadd.f32 %v967_v56, %v937_v7 }
 0x2c1   :  { %v969_v40 = vadd.f32 %v968_v18, %v938_v1  ;;  %v5798_v47 = vpop.f32.mrb[40].mxu1  ;;  %v900_v48 = vadd.f32 %v5786_v42, %v899_v27 }
 0x2c2   :  { %v5801_v49 = vpop.f32.mrb[41].mxu1  ;;  %v942_v62 = vmul.f32 %v5798_v47, %v5798_v47 }
 0x2c3   :  { %v901_v50 = vadd.f32 %v900_v48, %v5801_v49  ;;  %v940_v51 = vmul.f32 %v5801_v49, %v5801_v49  ;;  %v970_v45 = vadd.f32 %v969_v40, %v939_v25  ;;  %v5806_v53 = vpop.f32.mrb[42].mxu1 }
 0x2c4   :  { %v5808_v54 = vpop.f32.mrb[43].mxu1  ;;  %v943_v63 = vmul.f32 %v5806_v53, %v5806_v53 }
 0x2c5   :  { %v971_v57 = vadd.f32 %v970_v45, %v940_v51  ;;  %v902_v58 = vadd.f32 %v901_v50, %v5808_v54  ;;  %v941_v61 = vmul.f32 %v5808_v54, %v5808_v54 }
 0x2c7   :  { %v903_v9 = vadd.f32 %v5798_v47, %v902_v58  ;;  %v972_v43 = vadd.f32 %v971_v57, %v941_v61 }
 0x2c9   :  { %v973_v12 = vadd.f32 %v972_v43, %v942_v62  ;;  %v5818_v14 = vpop.f32.mrb[44].mxu1  ;;  %v904_v17 = vadd.f32 %v5806_v53, %v903_v9 }
 0x2ca   :  { %v5821_v29 = vpop.f32.mrb[45].mxu1  ;;  %v946_v19 = vmul.f32 %v5818_v14, %v5818_v14 }
 0x2cb   :  { %v905_v30 = vadd.f32 %v904_v17, %v5821_v29  ;;  %v944_v33 = vmul.f32 %v5821_v29, %v5821_v29  ;;  %v974_v34 = vadd.f32 %v973_v12, %v943_v63  ;;  %v5826_v35 = vpop.f32.mrb[46].mxu1 }
 0x2cc   :  { %v5828_v37 = vpop.f32.mrb[47].mxu1  ;;  %v947_v36 = vmul.f32 %v5826_v35, %v5826_v35 }
 0x2cd   :  { %v975_v2 = vadd.f32 %v974_v34, %v944_v33  ;;  %v906_v0 = vadd.f32 %v905_v30, %v5828_v37  ;;  %v945_v4 = vmul.f32 %v5828_v37, %v5828_v37 }
 0x2cf   :  { %v907_v24 = vadd.f32 %v5818_v14, %v906_v0  ;;  %v976_v46 = vadd.f32 %v975_v2, %v945_v4 }
 0x2d1   :  { %v908_v44 = vadd.f32 %v5826_v35, %v907_v24  ;;  %v977_v56 = vadd.f32 %v976_v46, %v946_v19 }
 0x2d3   :  { %v909_v3 = vrot.slane %v908_v44, 4  ;;  %v978_v7 = vadd.f32 %v977_v56, %v947_v36 }
 0x2d5   :  { %v910_v1 = vadd.f32 %v909_v3, %v908_v44  ;;  %v979_v27 = vrot.slane %v978_v7, 4 }
 0x2d7   :  { %v911_v18 = vrot.slane %v910_v1, 2  ;;  %v980_v25 = vadd.f32 %v979_v27, %v978_v7 }
 0x2d9   :  { %v912_v40 = vadd.f32 %v911_v18, %v910_v1  ;;  %v981_v48 = vrot.slane %v980_v25, 2 }
 0x2db   :  { %v913_v50 = vrot.slane %v912_v40, 1  ;;  %v982_v51 = vadd.f32 %v981_v48, %v980_v25 }
 0x2dd   :  { %v914_v45 = vadd.f32 %v913_v50, %v912_v40  ;;  %v983_v57 = vrot.slane %v982_v51, 1 }
 0x2df   :  { %v5839_v58 = vmul.f32 0.00390625, %v914_v45  ;;  %v984_v61 = vadd.f32 %v983_v57, %v982_v51 }
 0x2e1   :  { %v985_v62 = vmul.f32 0.00390625, %v984_v61  ;;  %v986_v9 = vmul.f32 %v5839_v58, %v5839_v58  ;;  %v1018_v43 = vsub.f32 %v5828_v37, %v5839_v58  ;;  %v989_v63 = vsub.f32 %v5681_v22, %v5839_v58 }
 0x2e2   :  { %v990_v12 = vsub.f32 %v5685_v28, %v5839_v58  ;;  %v991_v17 = vsub.f32 %v5679_v21, %v5839_v58  ;;  %v992_v30 = vsub.f32 %v5683_v23, %v5839_v58  ;;  %v993_v33 = vsub.f32 %v5701_v6, %v5839_v58 }
 0x2e3   :  { %v987_v34 = vsub.f32 %v985_v62, %v986_v9  ;;  %v994_v2 = vsub.f32 %v5708_v26, %v5839_v58  ;;  %v995_v37 = vsub.f32 %v5698_v11, %v5839_v58  ;;  %v996_v22 = vsub.f32 %v5706_v41, %v5839_v58 }
 0x2e4   :  { %v997_v28 = vsub.f32 %v5721_v8, %v5839_v58  ;;  %v998_v21 = vsub.f32 %v5728_v20, %v5839_v58  ;;  %v999_v23 = vsub.f32 %v5718_v10, %v5839_v58  ;;  %v1000_v6 = vsub.f32 %v5726_v5, %v5839_v58 }
 0x2e5   :  { %v988_v0 = vmax.f32 %v987_v34, 0.0  ;;  %v1001_v26 = vsub.f32 %v5741_v52, %v5839_v58  ;;  %v1002_v11 = vsub.f32 %v5748_v55, %v5839_v58  ;;  %v1003_v41 = vsub.f32 %v5738_v38, %v5839_v58 }
 0x2e6   :  { %v1004_v8 = vsub.f32 %v5746_v60, %v5839_v58  ;;  %v1005_v20 = vsub.f32 %v5761_v15, %v5839_v58  ;;  %v1006_v10 = vsub.f32 %v5768_v32, %v5839_v58  ;;  %v1007_v5 = vsub.f32 %v5758_v13, %v5839_v58 }
 0x2e7   :  { %v1021_v4 = vadd.f32 1e-10, %v988_v0  ;;  %v1008_v52 = vsub.f32 %v5766_v31, %v5839_v58  ;;  %v1009_v55 = vsub.f32 %v5781_v39, %v5839_v58  ;;  %v1010_v38 = vsub.f32 %v5788_v59, %v5839_v58 }
 0x2e8   :  { %v1011_v60 = vsub.f32 %v5778_v16, %v5839_v58  ;;  %v1012_v15 = vsub.f32 %v5786_v42, %v5839_v58  ;;  %v1013_v32 = vsub.f32 %v5801_v49, %v5839_v58  ;;  %v1014_v13 = vsub.f32 %v5808_v54, %v5839_v58 }
 0x2e9   :  { %5040 = vrsqrt.f32 %v1021_v4  ;;  %v1015_v31 = vsub.f32 %v5798_v47, %v5839_v58  ;;  %v1016_v39 = vsub.f32 %v5806_v53, %v5839_v58  ;;  %v1017_v59 = vsub.f32 %v5821_v29, %v5839_v58 }
 0x2ea   :  { %v1019_v16 = vsub.f32 %v5818_v14, %v5839_v58  ;;  %v1020_v42 = vsub.f32 %v5826_v35, %v5839_v58 }
 0x2f3   :  { %v5041_v49 = vpop.eup %5040 }
 0x2f4   :  { %v5907_v19 = vmul.f32 %v5041_v49, %v1018_v43  ;;  %v1023_v54 = vmul.f32 %v5041_v49, %v989_v63  ;;  %v1024_v24 = vmul.f32 %v5041_v49, %v990_v12  ;;  %v1025_v46 = vmul.f32 %v5041_v49, %v991_v17 }
 0x2f5   :  { %v1026_v36 = vmul.f32 %v5041_v49, %v992_v30  ;;  %v1027_v47 = vmul.f32 %v5041_v49, %v993_v33  ;;  %v1028_v44 = vmul.f32 %v5041_v49, %v994_v2  ;;  %v1029_v56 = vmul.f32 %v5041_v49, %v995_v37 }
 0x2f6   :  { %v1030_v53 = vmul.f32 %v5041_v49, %v996_v22  ;;  %v1031_v3 = vmul.f32 %v5041_v49, %v997_v28  ;;  %v1032_v7 = vmul.f32 %v5041_v49, %v998_v21  ;;  %v1033_v29 = vmul.f32 %v5041_v49, %v999_v23 }
 0x2f7   :  { %v1034_v1 = vmul.f32 %v5041_v49, %v1000_v6  ;;  %v1035_v27 = vmul.f32 %v5041_v49, %v1001_v26  ;;  %v1036_v14 = vmul.f32 %v5041_v49, %v1002_v11  ;;  %v1037_v18 = vmul.f32 %v5041_v49, %v1003_v41 }
 0x2f8   :  { %v1038_v25 = vmul.f32 %v5041_v49, %v1004_v8  ;;  %v1039_v35 = vmul.f32 %v5041_v49, %v1005_v20  ;;  %v1040_v40 = vmul.f32 %v5041_v49, %v1006_v10  ;;  %v1041_v48 = vmul.f32 %v5041_v49, %v1007_v5 }
 0x2f9   :  { %v1042_v50 = vmul.f32 %v5041_v49, %v1008_v52  ;;  %v1043_v51 = vmul.f32 %v5041_v49, %v1009_v55  ;;  %v1044_v45 = vmul.f32 %v5041_v49, %v1010_v38  ;;  %v1045_v57 = vmul.f32 %v5041_v49, %v1011_v60 }
 0x2fa   :  { %v1046_v58 = vmul.f32 %v5041_v49, %v1012_v15  ;;  %v1047_v61 = vmul.f32 %v5041_v49, %v1013_v32  ;;  %v1048_v62 = vmul.f32 %v5041_v49, %v1014_v13  ;;  %v1049_v9 = vmul.f32 %v5041_v49, %v1015_v31 }
 0x2fb   :  { %v1050_v43 = vmul.f32 %v5041_v49, %v1016_v39  ;;  %v1051_v63 = vmul.f32 %v5041_v49, %v1017_v59  ;;  %v1053_v12 = vmul.f32 %v5041_v49, %v1019_v16  ;;  %v1054_v17 = vmul.f32 %v5041_v49, %v1020_v42 }
 0x2fc   :  { %v1057_v30 = vmax.f32 %v1025_v46, 0.0  ;;  %v1058_v33 = vmax.f32 %v1026_v36, 0.0  ;;  %v1055_v34 = vmax.f32 %v1023_v54, 0.0  ;;  %v1056_v2 = vmax.f32 %v1024_v24, 0.0 }
 0x2fd   :  { %v1059_v37 = vmax.f32 %v1027_v47, 0.0  ;;  %v1060_v22 = vmax.f32 %v1028_v44, 0.0  ;;  %v1061_v28 = vmax.f32 %v1029_v56, 0.0  ;;  %v1062_v21 = vmax.f32 %v1030_v53, 0.0 }
 0x2fe   :  { %v1104_v23 = vpack.c.bf16 %v1058_v33, %v1057_v30  ;;  %v1103_v6 = vpack.c.bf16 %v1056_v2, %v1055_v34  ;;  %v1063_v0 = vmax.f32 %v1031_v3, 0.0  ;;  %v1064_v26 = vmax.f32 %v1032_v7, 0.0 }
 0x2ff   :  { %v1105_v11 = vpack.c.bf16 %v1060_v22, %v1059_v37  ;;  %v1106_v41 = vpack.c.bf16 %v1062_v21, %v1061_v28  ;;  %v1065_v8 = vmax.f32 %v1033_v29, 0.0  ;;  %v1066_v20 = vmax.f32 %v1034_v1, 0.0 }
 0x300   :  { %4618 = vmatprep.mubr.bf16.mxu0 %v1103_v6  ;;  %v1107_v10 = vpack.c.bf16 %v1064_v26, %v1063_v0  ;;  %v1067_v5 = vmax.f32 %v1035_v27, 0.0  ;;  %v1068_v4 = vmax.f32 %v1036_v14, 0.0  ;;  %v1069_v52 = vmax.f32 %v1037_v18, 0.0 }
 0x301   :  { %4619 = vmatmul.mubr.bf16.vlgmr.msra.gmra.mrb[16].mxu0 %v1104_v23  ;;  %v1108_v55 = vpack.c.bf16 %v1066_v20, %v1065_v8  ;;  %v1070_v38 = vmax.f32 %v1038_v25, 0.0  ;;  %v1071_v60 = vmax.f32 %v1039_v35, 0.0  ;;  %v1072_v15 = vmax.f32 %v1040_v40, 0.0  ;;  %v4990_v35 = vld [vmem:[#allocation8 + $0xc0] sm:$0xff]   ;;  %v4992_v40 = vld [vmem:[#allocation8 + $0xd0] sm:$0xff]  }
 0x302   :  { %4622 = vmatprep.mubr.bf16.mxu0 %v1105_v11  ;;  %v1109_v32 = vpack.c.bf16 %v1068_v4, %v1067_v5  ;;  %v1073_v13 = vmax.f32 %v1041_v48, 0.0  ;;  %v1074_v31 = vmax.f32 %v1042_v50, 0.0  ;;  %v1075_v39 = vmax.f32 %v1043_v51, 0.0  ;;  %4650 = vmatprep.subr.bf16.mxu1 %v4990_v35  ;;  %v4995_v48 = vld [vmem:[#allocation8 + $0x100] sm:$0xff]   ;;  %v4996_v50 = vld [vmem:[#allocation8 + $0x108] sm:$0xff]   ;;  %v4998_v51 = vld [vmem:[#allocation8 + $0x110] sm:$0xff]  }
 0x303   :  { %v1110_v59 = vpack.c.bf16 %v1070_v38, %v1069_v52  ;;  %v1111_v16 = vpack.c.bf16 %v1072_v15, %v1071_v60  ;;  %v1076_v42 = vmax.f32 %v1044_v45, 0.0  ;;  %v1077_v49 = vmax.f32 %v1045_v57, 0.0  ;;  %4651 = vmatpush3.bf16.msra.mxu1 %v4990_v35  ;;  %4698 = vmatprep.subr.bf16.mxu0 %v4995_v48  ;;  %v4993_v45 = vld [vmem:[#allocation8 + $0xd8] sm:$0xff]  }
 0x304   :  { %v1112_v54 = vpack.c.bf16 %v1074_v31, %v1073_v13  ;;  %v1078_v24 = vmax.f32 %v1046_v58, 0.0  ;;  %v1079_v46 = vmax.f32 %v1047_v61, 0.0  ;;  %v1080_v36 = vmax.f32 %v1048_v62, 0.0  ;;  %4699 = vmatpush3.bf16.msra.mxu0 %v4995_v48  ;;  %v4999_v57 = vld [vmem:[#allocation8 + $0x118] sm:$0xff]   ;;  %v4994_v58 = vld [vmem:[#allocation8 + $0xe0] sm:$0xff]   ;;  %v4997_v62 = vld [vmem:[#allocation8 + $0xe8] sm:$0xff]  }
 0x305   :  { %v1113_v47 = vpack.c.bf16 %v1076_v42, %v1075_v39  ;;  %v1081_v44 = vmax.f32 %v1049_v9, 0.0  ;;  %v1082_v56 = vmax.f32 %v1050_v43, 0.0  ;;  %v1083_v53 = vmax.f32 %v1051_v63, 0.0  ;;  %4700 = vmatprep.subr.bf16.mxu0 %v4996_v50  ;;  %v5001_v61 = vld [vmem:[#allocation8 + $0x120] sm:$0xff]   ;;  %v5002_v9 = vld [vmem:[#allocation8 + $0x128] sm:$0xff]   ;;  %v5000_v43 = vld [vmem:[#allocation8 + $0xf0] sm:$0xff]  }
 0x306   :  { %v1114_v3 = vpack.c.bf16 %v1078_v24, %v1077_v49  ;;  %v1115_v7 = vpack.c.bf16 %v1080_v36, %v1079_v46  ;;  %v1084_v29 = vmax.f32 %v5907_v19, 0.0  ;;  %v1085_v1 = vmax.f32 %v1053_v12, 0.0  ;;  %v4991_v19 = vld [vmem:[#allocation8 + $0xc8] sm:$0xff]   ;;  %v5004_v63 = vld [vmem:[#allocation8 + $0x130] sm:$0xff]   ;;  %v5003_v12 = vld [vmem:[#allocation8 + $0xf8] sm:$0xff]  }
 0x307   :  { %v1116_v27 = vpack.c.bf16 %v1082_v56, %v1081_v44  ;;  %v1086_v14 = vmax.f32 %v1054_v17, 0.0  ;;  %4652 = vmatprep.subr.bf16.mxu1 %v4991_v19  ;;  %v5005_v17 = vld [vmem:[#allocation8 + $0x138] sm:$0xff]  }
 0x308   :  { %v1117_v18 = vpack.c.bf16 %v1084_v29, %v1083_v53  ;;  %4653 = vmatpush3.bf16.msra.mxu1 %v4991_v19  ;;  %4701 = vmatpush3.bf16.msra.mxu0 %v4996_v50 }
 0x309   :  { %4623 = vmatmul.mubr.bf16.gmra.mrb[20].mxu0 %v1106_v41  ;;  %v1118_v25 = vpack.c.bf16 %v1086_v14, %v1085_v1  ;;  %4654 = vmatprep.subr.bf16.mxu1 %v4992_v40 }
 0x30a   :  { %4626 = vmatprep.mubr.bf16.mxu0 %v1107_v10  ;;  %4702 = vmatprep.subr.bf16.mxu0 %v4998_v51 }
 0x30c   :  { %4655 = vmatpush3.bf16.msra.mxu1 %v4992_v40  ;;  %4703 = vmatpush3.bf16.msra.mxu0 %v4998_v51 }
 0x30d   :  { %4656 = vmatprep.subr.bf16.mxu1 %v4993_v45  ;;  %4704 = vmatprep.subr.bf16.mxu0 %v4999_v57 }
 0x310   :  { %4657 = vmatpush3.bf16.msra.mxu1 %v4993_v45  ;;  %4705 = vmatpush3.bf16.msra.mxu0 %v4999_v57 }
 0x311   :  { %4627 = vmatmul.mubr.bf16.gmra.mrb[24].mxu0 %v1108_v55  ;;  %4658 = vmatprep.subr.bf16.mxu1 %v4994_v58 }
 0x312   :  { %4630 = vmatprep.mubr.bf16.mxu0 %v1109_v32  ;;  %4706 = vmatprep.subr.bf16.mxu0 %v5001_v61 }
 0x314   :  { %4659 = vmatpush3.bf16.msra.mxu1 %v4994_v58  ;;  %4707 = vmatpush3.bf16.msra.mxu0 %v5001_v61 }
 0x315   :  { %4660 = vmatprep.subr.bf16.mxu1 %v4997_v62  ;;  %4708 = vmatprep.subr.bf16.mxu0 %v5002_v9 }
 0x318   :  { %4661 = vmatpush3.bf16.msra.mxu1 %v4997_v62  ;;  %4709 = vmatpush3.bf16.msra.mxu0 %v5002_v9 }
 0x319   :  { %4631 = vmatmul.mubr.bf16.gmra.mrb[28].mxu0 %v1110_v59  ;;  %4662 = vmatprep.subr.bf16.mxu1 %v5000_v43 }
 0x31a   :  { %4634 = vmatprep.mubr.bf16.mxu0 %v1111_v16  ;;  %4710 = vmatprep.subr.bf16.mxu0 %v5004_v63 }
 0x31c   :  { %4663 = vmatpush3.bf16.msra.mxu1 %v5000_v43  ;;  %4711 = vmatpush3.bf16.msra.mxu0 %v5004_v63 }
 0x31d   :  { %4664 = vmatprep.subr.bf16.mxu1 %v5003_v12  ;;  %4712 = vmatprep.subr.bf16.mxu0 %v5005_v17 }
 0x320   :  { %4665 = vmatpush3.bf16.msra.mxu1 %v5003_v12  ;;  %4713 = vmatpush3.bf16.msra.mxu0 %v5005_v17 }
 0x321   :  { %4635 = vmatmul.mubr.bf16.gmra.mrb[32].mxu0 %v1112_v54 }
 0x322   :  { %4638 = vmatprep.mubr.bf16.mxu0 %v1113_v47 }
 0x329   :  { %4639 = vmatmul.mubr.bf16.gmra.mrb[36].mxu0 %v1114_v3 }
 0x32a   :  { %4642 = vmatprep.mubr.bf16.mxu0 %v1115_v7 }
 0x331   :  { %4643 = vmatmul.mubr.bf16.gmra.mrb[40].mxu0 %v1116_v27 }
 0x332   :  { %4646 = vmatprep.mubr.bf16.mxu0 %v1117_v18 }
 0x339   :  { %4647 = vmatmul.mubr.bf16.gmra.mrb[44].mxu0 %v1118_v25 }
 0x3d4   :  { %v5910_v30 = vpop.f32.mrb[16].mxu0 }
 0x3d5   :  { %v5912_v33 = vpop.f32.mrb[17].mxu0  ;;  %v1368_v21 = vmul.f32 %v5910_v30, %v5910_v30 }
 0x3d6   :  { %v5914_v34 = vpop.f32.mrb[18].mxu0  ;;  %v1366_v37 = vmul.f32 %v5912_v33, %v5912_v33 }
 0x3d7   :  { %v5916_v2 = vpop.f32.mrb[19].mxu0  ;;  %v1369_v0 = vmul.f32 %v5914_v34, %v5914_v34 }
 0x3d8   :  { %v1328_v22 = vadd.f32 %v5916_v2, %v5912_v33  ;;  %v1367_v28 = vmul.f32 %v5916_v2, %v5916_v2 }
 0x3da   :  { %v1329_v23 = vadd.f32 %v5910_v30, %v1328_v22  ;;  %v1398_v6 = vadd.f32 %v1367_v28, %v1366_v37 }
 0x3dc   :  { %v1399_v26 = vadd.f32 %v1398_v6, %v1368_v21  ;;  %v5929_v11 = vpop.f32.mrb[20].mxu0  ;;  %v1330_v41 = vadd.f32 %v5914_v34, %v1329_v23 }
 0x3dd   :  { %v5932_v8 = vpop.f32.mrb[21].mxu0  ;;  %v1372_v15 = vmul.f32 %v5929_v11, %v5929_v11 }
 0x3de   :  { %v1331_v20 = vadd.f32 %v1330_v41, %v5932_v8  ;;  %v1370_v10 = vmul.f32 %v5932_v8, %v5932_v8  ;;  %v1400_v5 = vadd.f32 %v1399_v26, %v1369_v0  ;;  %v5937_v4 = vpop.f32.mrb[22].mxu0 }
 0x3df   :  { %v5939_v52 = vpop.f32.mrb[23].mxu0  ;;  %v1373_v31 = vmul.f32 %v5937_v4, %v5937_v4 }
 0x3e0   :  { %v1401_v55 = vadd.f32 %v1400_v5, %v1370_v10  ;;  %v1332_v38 = vadd.f32 %v1331_v20, %v5939_v52  ;;  %v1371_v60 = vmul.f32 %v5939_v52, %v5939_v52 }
 0x3e2   :  { %v1333_v32 = vadd.f32 %v5929_v11, %v1332_v38  ;;  %v1402_v13 = vadd.f32 %v1401_v55, %v1371_v60 }
 0x3e4   :  { %v1403_v39 = vadd.f32 %v1402_v13, %v1372_v15  ;;  %v5949_v59 = vpop.f32.mrb[24].mxu0  ;;  %v1334_v16 = vadd.f32 %v5937_v4, %v1333_v32 }
 0x3e5   :  { %v5952_v42 = vpop.f32.mrb[25].mxu0  ;;  %v1376_v53 = vmul.f32 %v5949_v59, %v5949_v59 }
 0x3e6   :  { %v1335_v49 = vadd.f32 %v1334_v16, %v5952_v42  ;;  %v1374_v54 = vmul.f32 %v5952_v42, %v5952_v42  ;;  %v1404_v24 = vadd.f32 %v1403_v39, %v1373_v31  ;;  %v5957_v46 = vpop.f32.mrb[26].mxu0 }
 0x3e7   :  { %v5959_v36 = vpop.f32.mrb[27].mxu0  ;;  %v1377_v29 = vmul.f32 %v5957_v46, %v5957_v46 }
 0x3e8   :  { %v1405_v47 = vadd.f32 %v1404_v24, %v1374_v54  ;;  %v1336_v44 = vadd.f32 %v1335_v49, %v5959_v36  ;;  %v1375_v56 = vmul.f32 %v5959_v36, %v5959_v36 }
 0x3ea   :  { %v1337_v3 = vadd.f32 %v5949_v59, %v1336_v44  ;;  %v1406_v7 = vadd.f32 %v1405_v47, %v1375_v56 }
 0x3ec   :  { %v1407_v1 = vadd.f32 %v1406_v7, %v1376_v53  ;;  %v5969_v27 = vpop.f32.mrb[28].mxu0  ;;  %v1338_v14 = vadd.f32 %v5957_v46, %v1337_v3 }
 0x3ed   :  { %v5972_v18 = vpop.f32.mrb[29].mxu0  ;;  %v1380_v57 = vmul.f32 %v5969_v27, %v5969_v27 }
 0x3ee   :  { %v1339_v25 = vadd.f32 %v1338_v14, %v5972_v18  ;;  %v1378_v35 = vmul.f32 %v5972_v18, %v5972_v18  ;;  %v1408_v19 = vadd.f32 %v1407_v1, %v1377_v29  ;;  %v5977_v40 = vpop.f32.mrb[30].mxu0 }
 0x3ef   :  { %v5979_v48 = vpop.f32.mrb[31].mxu0  ;;  %v1381_v62 = vmul.f32 %v5977_v40, %v5977_v40 }
 0x3f0   :  { %v1409_v50 = vadd.f32 %v1408_v19, %v1378_v35  ;;  %v1340_v51 = vadd.f32 %v1339_v25, %v5979_v48  ;;  %v1379_v45 = vmul.f32 %v5979_v48, %v5979_v48 }
 0x3f2   :  { %v1341_v58 = vadd.f32 %v5969_v27, %v1340_v51  ;;  %v1410_v61 = vadd.f32 %v1409_v50, %v1379_v45 }
 0x3f4   :  { %v1411_v9 = vadd.f32 %v1410_v61, %v1380_v57  ;;  %v5989_v43 = vpop.f32.mrb[32].mxu0  ;;  %v1342_v63 = vadd.f32 %v5977_v40, %v1341_v58 }
 0x3f5   :  { %v5992_v12 = vpop.f32.mrb[33].mxu0  ;;  %v1384_v26 = vmul.f32 %v5989_v43, %v5989_v43 }
 0x3f6   :  { %v1343_v17 = vadd.f32 %v1342_v63, %v5992_v12  ;;  %v1382_v37 = vmul.f32 %v5992_v12, %v5992_v12  ;;  %v1412_v22 = vadd.f32 %v1411_v9, %v1381_v62  ;;  %v5997_v28 = vpop.f32.mrb[34].mxu0 }
 0x3f7   :  { %v5999_v21 = vpop.f32.mrb[35].mxu0  ;;  %v1385_v10 = vmul.f32 %v5997_v28, %v5997_v28 }
 0x3f8   :  { %v1413_v23 = vadd.f32 %v1412_v22, %v1382_v37  ;;  %v1344_v6 = vadd.f32 %v1343_v17, %v5999_v21  ;;  %v1383_v0 = vmul.f32 %v5999_v21, %v5999_v21 }
 0x3fa   :  { %v1345_v41 = vadd.f32 %v5989_v43, %v1344_v6  ;;  %v1414_v20 = vadd.f32 %v1413_v23, %v1383_v0 }
 0x3fc   :  { %v1415_v5 = vadd.f32 %v1414_v20, %v1384_v26  ;;  %v6009_v55 = vpop.f32.mrb[36].mxu0  ;;  %v1346_v38 = vadd.f32 %v5997_v28, %v1345_v41 }
 0x3fd   :  { %v6012_v60 = vpop.f32.mrb[37].mxu0  ;;  %v1388_v24 = vmul.f32 %v6009_v55, %v6009_v55 }
 0x3fe   :  { %v1347_v15 = vadd.f32 %v1346_v38, %v6012_v60  ;;  %v1386_v32 = vmul.f32 %v6012_v60, %v6012_v60  ;;  %v1416_v13 = vadd.f32 %v1415_v5, %v1385_v10  ;;  %v6017_v31 = vpop.f32.mrb[38].mxu0 }
 0x3ff   :  { %v6019_v39 = vpop.f32.mrb[39].mxu0  ;;  %v1389_v56 = vmul.f32 %v6017_v31, %v6017_v31 }
 0x400   :  { %v1417_v16 = vadd.f32 %v1416_v13, %v1386_v32  ;;  %v1348_v49 = vadd.f32 %v1347_v15, %v6019_v39  ;;  %v1387_v54 = vmul.f32 %v6019_v39, %v6019_v39 }
 0x402   :  { %v1349_v47 = vadd.f32 %v6009_v55, %v1348_v49  ;;  %v1418_v44 = vadd.f32 %v1417_v16, %v1387_v54 }
 0x404   :  { %v1419_v53 = vadd.f32 %v1418_v44, %v1388_v24  ;;  %v6029_v3 = vpop.f32.mrb[40].mxu0  ;;  %v1350_v7 = vadd.f32 %v6017_v31, %v1349_v47 }
 0x405   :  { %v6032_v29 = vpop.f32.mrb[41].mxu0  ;;  %v1392_v57 = vmul.f32 %v6029_v3, %v6029_v3 }
 0x406   :  { %v1351_v1 = vadd.f32 %v1350_v7, %v6032_v29  ;;  %v1390_v14 = vmul.f32 %v6032_v29, %v6032_v29  ;;  %v1420_v25 = vadd.f32 %v1419_v53, %v1389_v56  ;;  %v6037_v35 = vpop.f32.mrb[42].mxu0 }
 0x407   :  { %v6039_v19 = vpop.f32.mrb[43].mxu0  ;;  %v1393_v62 = vmul.f32 %v6037_v35, %v6037_v35 }
 0x408   :  { %v1421_v50 = vadd.f32 %v1420_v25, %v1390_v14  ;;  %v1352_v51 = vadd.f32 %v1351_v1, %v6039_v19  ;;  %v1391_v45 = vmul.f32 %v6039_v19, %v6039_v19 }
 0x40a   :  { %v1353_v58 = vadd.f32 %v6029_v3, %v1352_v51  ;;  %v1422_v61 = vadd.f32 %v1421_v50, %v1391_v45 }
 0x40c   :  { %v1423_v9 = vadd.f32 %v1422_v61, %v1392_v57  ;;  %v6049_v63 = vpop.f32.mrb[44].mxu0  ;;  %v1354_v17 = vadd.f32 %v6037_v35, %v1353_v58 }
 0x40d   :  { %v6052_v37 = vpop.f32.mrb[45].mxu0  ;;  %v1396_v5 = vmul.f32 %v6049_v63, %v6049_v63 }
 0x40e   :  { %v1355_v22 = vadd.f32 %v1354_v17, %v6052_v37  ;;  %v1394_v23 = vmul.f32 %v6052_v37, %v6052_v37  ;;  %v1424_v6 = vadd.f32 %v1423_v9, %v1393_v62  ;;  %v6057_v0 = vpop.f32.mrb[46].mxu0 }
 0x40f   :  { %v6059_v26 = vpop.f32.mrb[47].mxu0  ;;  %v1397_v32 = vmul.f32 %v6057_v0, %v6057_v0 }
 0x410   :  { %v1425_v41 = vadd.f32 %v1424_v6, %v1394_v23  ;;  %v1356_v20 = vadd.f32 %v1355_v22, %v6059_v26  ;;  %v1395_v10 = vmul.f32 %v6059_v26, %v6059_v26 }
 0x412   :  { %v1357_v38 = vadd.f32 %v6049_v63, %v1356_v20  ;;  %v1426_v15 = vadd.f32 %v1425_v41, %v1395_v10 }
 0x414   :  { %v1358_v13 = vadd.f32 %v6057_v0, %v1357_v38  ;;  %v1427_v16 = vadd.f32 %v1426_v15, %v1396_v5 }
 0x416   :  { %v1359_v49 = vrot.slane %v1358_v13, 4  ;;  %v1428_v54 = vadd.f32 %v1427_v16, %v1397_v32 }
 0x418   :  { %v1360_v24 = vadd.f32 %v1359_v49, %v1358_v13  ;;  %v1429_v47 = vrot.slane %v1428_v54, 4 }
 0x41a   :  { %v1361_v44 = vrot.slane %v1360_v24, 2  ;;  %v1430_v56 = vadd.f32 %v1429_v47, %v1428_v54 }
 0x41c   :  { %v1362_v53 = vadd.f32 %v1361_v44, %v1360_v24  ;;  %v1431_v7 = vrot.slane %v1430_v56, 2 }
 0x41e   :  { %v1363_v1 = vrot.slane %v1362_v53, 1  ;;  %v1432_v14 = vadd.f32 %v1431_v7, %v1430_v56 }
 0x420   :  { %v1364_v25 = vadd.f32 %v1363_v1, %v1362_v53  ;;  %v1433_v50 = vrot.slane %v1432_v14, 1 }
 0x422   :  { %v6070_v51 = vmul.f32 0.00390625, %v1364_v25  ;;  %v1434_v45 = vadd.f32 %v1433_v50, %v1432_v14 }
 0x424   :  { %v1435_v57 = vmul.f32 0.00390625, %v1434_v45  ;;  %v1436_v58 = vmul.f32 %v6070_v51, %v6070_v51  ;;  %v1468_v61 = vsub.f32 %v6059_v26, %v6070_v51  ;;  %v1439_v62 = vsub.f32 %v5912_v33, %v6070_v51 }
 0x425   :  { %v1440_v9 = vsub.f32 %v5916_v2, %v6070_v51  ;;  %v1441_v17 = vsub.f32 %v5910_v30, %v6070_v51  ;;  %v1442_v22 = vsub.f32 %v5914_v34, %v6070_v51  ;;  %v1443_v23 = vsub.f32 %v5932_v8, %v6070_v51 }
 0x426   :  { %v1437_v6 = vsub.f32 %v1435_v57, %v1436_v58  ;;  %v1444_v41 = vsub.f32 %v5939_v52, %v6070_v51  ;;  %v1445_v26 = vsub.f32 %v5929_v11, %v6070_v51  ;;  %v1446_v33 = vsub.f32 %v5937_v4, %v6070_v51 }
 0x427   :  { %v1447_v2 = vsub.f32 %v5952_v42, %v6070_v51  ;;  %v1448_v30 = vsub.f32 %v5959_v36, %v6070_v51  ;;  %v1449_v34 = vsub.f32 %v5949_v59, %v6070_v51  ;;  %v1450_v8 = vsub.f32 %v5957_v46, %v6070_v51 }
 0x428   :  { %v1438_v20 = vmax.f32 %v1437_v6, 0.0  ;;  %v1451_v52 = vsub.f32 %v5972_v18, %v6070_v51  ;;  %v1452_v11 = vsub.f32 %v5979_v48, %v6070_v51  ;;  %v1453_v4 = vsub.f32 %v5969_v27, %v6070_v51 }
 0x429   :  { %v1454_v42 = vsub.f32 %v5977_v40, %v6070_v51  ;;  %v1455_v36 = vsub.f32 %v5992_v12, %v6070_v51  ;;  %v1456_v59 = vsub.f32 %v5999_v21, %v6070_v51  ;;  %v1457_v46 = vsub.f32 %v5989_v43, %v6070_v51 }
 0x42a   :  { %v1471_v10 = vadd.f32 1e-10, %v1438_v20  ;;  %v1458_v18 = vsub.f32 %v5997_v28, %v6070_v51  ;;  %v1459_v48 = vsub.f32 %v6012_v60, %v6070_v51  ;;  %v1460_v27 = vsub.f32 %v6019_v39, %v6070_v51 }
 0x42b   :  { %v1461_v40 = vsub.f32 %v6009_v55, %v6070_v51  ;;  %v1462_v12 = vsub.f32 %v6017_v31, %v6070_v51  ;;  %v1463_v21 = vsub.f32 %v6032_v29, %v6070_v51  ;;  %v1464_v43 = vsub.f32 %v6039_v19, %v6070_v51 }
 0x42c   :  { %5042 = vrsqrt.f32 %v1471_v10  ;;  %v1465_v28 = vsub.f32 %v6029_v3, %v6070_v51  ;;  %v1466_v60 = vsub.f32 %v6037_v35, %v6070_v51  ;;  %v1467_v39 = vsub.f32 %v6052_v37, %v6070_v51 }
 0x42d   :  { %v1469_v55 = vsub.f32 %v6049_v63, %v6070_v51  ;;  %v1470_v31 = vsub.f32 %v6057_v0, %v6070_v51 }
 0x436   :  { %v5043_v29 = vpop.eup %5042 }
 0x437   :  { %v6138_v5 = vmul.f32 %v5043_v29, %v1468_v61  ;;  %v1473_v19 = vmul.f32 %v5043_v29, %v1439_v62  ;;  %v1474_v38 = vmul.f32 %v5043_v29, %v1440_v9  ;;  %v1475_v15 = vmul.f32 %v5043_v29, %v1441_v17 }
 0x438   :  { %v1476_v32 = vmul.f32 %v5043_v29, %v1442_v22  ;;  %v1477_v3 = vmul.f32 %v5043_v29, %v1443_v23  ;;  %v1478_v13 = vmul.f32 %v5043_v29, %v1444_v41  ;;  %v1479_v16 = vmul.f32 %v5043_v29, %v1445_v26 }
 0x439   :  { %v1480_v35 = vmul.f32 %v5043_v29, %v1446_v33  ;;  %v1481_v49 = vmul.f32 %v5043_v29, %v1447_v2  ;;  %v1482_v54 = vmul.f32 %v5043_v29, %v1448_v30  ;;  %v1483_v37 = vmul.f32 %v5043_v29, %v1449_v34 }
 0x43a   :  { %v1484_v24 = vmul.f32 %v5043_v29, %v1450_v8  ;;  %v1485_v47 = vmul.f32 %v5043_v29, %v1451_v52  ;;  %v1486_v63 = vmul.f32 %v5043_v29, %v1452_v11  ;;  %v1487_v44 = vmul.f32 %v5043_v29, %v1453_v4 }
 0x43b   :  { %v1488_v56 = vmul.f32 %v5043_v29, %v1454_v42  ;;  %v1489_v0 = vmul.f32 %v5043_v29, %v1455_v36  ;;  %v1490_v53 = vmul.f32 %v5043_v29, %v1456_v59  ;;  %v1491_v7 = vmul.f32 %v5043_v29, %v1457_v46 }
 0x43c   :  { %v1492_v1 = vmul.f32 %v5043_v29, %v1458_v18  ;;  %v1493_v14 = vmul.f32 %v5043_v29, %v1459_v48  ;;  %v1494_v25 = vmul.f32 %v5043_v29, %v1460_v27  ;;  %v1495_v50 = vmul.f32 %v5043_v29, %v1461_v40 }
 0x43d   :  { %v1496_v51 = vmul.f32 %v5043_v29, %v1462_v12  ;;  %v1497_v45 = vmul.f32 %v5043_v29, %v1463_v21  ;;  %v1498_v57 = vmul.f32 %v5043_v29, %v1464_v43  ;;  %v1499_v58 = vmul.f32 %v5043_v29, %v1465_v28 }
 0x43e   :  { %v1500_v61 = vmul.f32 %v5043_v29, %v1466_v60  ;;  %v1501_v62 = vmul.f32 %v5043_v29, %v1467_v39  ;;  %v1503_v9 = vmul.f32 %v5043_v29, %v1469_v55  ;;  %v1504_v17 = vmul.f32 %v5043_v29, %v1470_v31 }
 0x43f   :  { %v1507_v22 = vmax.f32 %v1475_v15, 0.0  ;;  %v1508_v23 = vmax.f32 %v1476_v32, 0.0  ;;  %v1505_v6 = vmax.f32 %v1473_v19, 0.0  ;;  %v1506_v41 = vmax.f32 %v1474_v38, 0.0 }
 0x440   :  { %v1509_v26 = vmax.f32 %v1477_v3, 0.0  ;;  %v1510_v33 = vmax.f32 %v1478_v13, 0.0  ;;  %v1511_v2 = vmax.f32 %v1479_v16, 0.0  ;;  %v1512_v30 = vmax.f32 %v1480_v35, 0.0 }
 0x441   :  { %v1554_v34 = vpack.c.bf16 %v1508_v23, %v1507_v22  ;;  %v1553_v8 = vpack.c.bf16 %v1506_v41, %v1505_v6  ;;  %v1513_v20 = vmax.f32 %v1481_v49, 0.0  ;;  %v1514_v52 = vmax.f32 %v1482_v54, 0.0 }
 0x442   :  { %v1555_v11 = vpack.c.bf16 %v1510_v33, %v1509_v26  ;;  %v1556_v4 = vpack.c.bf16 %v1512_v30, %v1511_v2  ;;  %v1515_v42 = vmax.f32 %v1483_v37, 0.0  ;;  %v1516_v36 = vmax.f32 %v1484_v24, 0.0 }
 0x443   :  { %4666 = vmatprep.mubr.bf16.mxu1 %v1553_v8  ;;  %4714 = vmatprep.mubr.bf16.mxu0 %v1553_v8  ;;  %v1557_v59 = vpack.c.bf16 %v1514_v52, %v1513_v20  ;;  %v1517_v46 = vmax.f32 %v1485_v47, 0.0  ;;  %v1518_v10 = vmax.f32 %v1486_v63, 0.0  ;;  %v1519_v18 = vmax.f32 %v1487_v44, 0.0 }
 0x444   :  { %4667 = vmatmul.mubr.bf16.vlgmr.msra.gmra.mrb[48].mxu1 %v1554_v34  ;;  %4715 = vmatmul.mubr.bf16.vlgmr.msra.gmra.mrb[48].mxu0 %v1554_v34  ;;  %v1558_v48 = vpack.c.bf16 %v1516_v36, %v1515_v42  ;;  %v1520_v27 = vmax.f32 %v1488_v56, 0.0  ;;  %v1521_v40 = vmax.f32 %v1489_v0, 0.0  ;;  %v1522_v12 = vmax.f32 %v1490_v53, 0.0  ;;  %v5007_v0 = vld [vmem:[#allocation8 + $0x148] sm:$0xff]   ;;  %v5008_v53 = vld [vmem:[#allocation8 + $0x150] sm:$0xff]  }
 0x445   :  { %4670 = vmatprep.mubr.bf16.mxu1 %v1555_v11  ;;  %4718 = vmatprep.mubr.bf16.mxu0 %v1555_v11  ;;  %v1559_v21 = vpack.c.bf16 %v1518_v10, %v1517_v46  ;;  %v1523_v43 = vmax.f32 %v1491_v7, 0.0  ;;  %v1524_v28 = vmax.f32 %v1492_v1, 0.0  ;;  %v1525_v60 = vmax.f32 %v1493_v14, 0.0  ;;  %v5009_v7 = vld [vmem:[#allocation8 + $0x158] sm:$0xff]   ;;  %v5010_v1 = vld [vmem:[#allocation8 + $0x160] sm:$0xff]   ;;  %v5011_v14 = vld [vmem:[#allocation8 + $0x168] sm:$0xff]  }
 0x446   :  { %v1560_v39 = vpack.c.bf16 %v1520_v27, %v1519_v18  ;;  %v1561_v55 = vpack.c.bf16 %v1522_v12, %v1521_v40  ;;  %v1526_v31 = vmax.f32 %v1494_v25, 0.0  ;;  %v1527_v29 = vmax.f32 %v1495_v50, 0.0  ;;  %v5012_v25 = vld [vmem:[#allocation8 + $0x170] sm:$0xff]   ;;  %v5013_v50 = vld [vmem:[#allocation8 + $0x178] sm:$0xff]  }
 0x447   :  { %v1562_v19 = vpack.c.bf16 %v1524_v28, %v1523_v43  ;;  %v1528_v38 = vmax.f32 %v1496_v51, 0.0  ;;  %v1529_v15 = vmax.f32 %v1497_v45, 0.0  ;;  %v1530_v32 = vmax.f32 %v1498_v57, 0.0  ;;  %v6141_v51 = vld [vmem:[#allocation10 + $0x4] ss:$0 sm:$0xff] }
 0x448   :  { %v1563_v3 = vpack.c.bf16 %v1526_v31, %v1525_v60  ;;  %v1531_v13 = vmax.f32 %v1499_v58, 0.0  ;;  %v1532_v16 = vmax.f32 %v1500_v61, 0.0  ;;  %v1533_v35 = vmax.f32 %v1501_v62, 0.0 }
 0x449   :  { %v1564_v49 = vpack.c.bf16 %v1528_v38, %v1527_v29  ;;  %v1565_v54 = vpack.c.bf16 %v1530_v32, %v1529_v15  ;;  %v1534_v37 = vmax.f32 %v6138_v5, 0.0  ;;  %v1535_v24 = vmax.f32 %v1503_v9, 0.0  ;;  %v5006_v5 = vld [vmem:[#allocation8 + $0x140] sm:$0xff]  }
 0x44a   :  { %v1566_v47 = vpack.c.bf16 %v1532_v16, %v1531_v13  ;;  %v1536_v63 = vmax.f32 %v1504_v17, 0.0  ;;  %4746 = vmatprep.subr.bf16.mxu1 %v5006_v5 }
 0x44b   :  { %v1567_v44 = vpack.c.bf16 %v1534_v37, %v1533_v35  ;;  %4747 = vmatpush3.bf16.msra.mxu1 %v5006_v5 }
 0x44c   :  { %4671 = vmatmul.mubr.bf16.gmra.mrb[52].mxu1 %v1556_v4  ;;  %4719 = vmatmul.mubr.bf16.gmra.mrb[52].mxu0 %v1556_v4  ;;  %v1568_v56 = vpack.c.bf16 %v1536_v63, %v1535_v24 }
 0x44d   :  { %4674 = vmatprep.mubr.bf16.mxu1 %v1557_v59  ;;  %4722 = vmatprep.mubr.bf16.mxu0 %v1557_v59 }
 0x44e   :  { %4748 = vmatprep.subr.bf16.mxu1 %v5007_v0 }
 0x44f   :  { %4749 = vmatpush3.bf16.msra.mxu1 %v5007_v0 }
 0x450   :  { %4750 = vmatprep.subr.bf16.mxu1 %v5008_v53 }
 0x453   :  { %4751 = vmatpush3.bf16.msra.mxu1 %v5008_v53 }
 0x454   :  { %4675 = vmatmul.mubr.bf16.gmra.mrb[56].mxu1 %v1558_v48  ;;  %4723 = vmatmul.mubr.bf16.gmra.mrb[56].mxu0 %v1558_v48 }
 0x455   :  { %4678 = vmatprep.mubr.bf16.mxu1 %v1559_v21  ;;  %4726 = vmatprep.mubr.bf16.mxu0 %v1559_v21 }
 0x456   :  { %4752 = vmatprep.subr.bf16.mxu1 %v5009_v7 }
 0x457   :  { %4753 = vmatpush3.bf16.msra.mxu1 %v5009_v7 }
 0x458   :  { %4754 = vmatprep.subr.bf16.mxu1 %v5010_v1 }
 0x45b   :  { %4755 = vmatpush3.bf16.msra.mxu1 %v5010_v1 }
 0x45c   :  { %4679 = vmatmul.mubr.bf16.gmra.mrb[60].mxu1 %v1560_v39  ;;  %4727 = vmatmul.mubr.bf16.gmra.mrb[60].mxu0 %v1560_v39 }
 0x45d   :  { %4682 = vmatprep.mubr.bf16.mxu1 %v1561_v55  ;;  %4730 = vmatprep.mubr.bf16.mxu0 %v1561_v55 }
 0x45e   :  { %4756 = vmatprep.subr.bf16.mxu1 %v5011_v14 }
 0x45f   :  { %4757 = vmatpush3.bf16.msra.mxu1 %v5011_v14 }
 0x460   :  { %4758 = vmatprep.subr.bf16.mxu1 %v5012_v25 }
 0x463   :  { %4759 = vmatpush3.bf16.msra.mxu1 %v5012_v25 }
 0x464   :  { %4683 = vmatmul.mubr.bf16.gmra.mrb[64].mxu1 %v1562_v19  ;;  %4731 = vmatmul.mubr.bf16.gmra.mrb[64].mxu0 %v1562_v19 }
 0x465   :  { %4686 = vmatprep.mubr.bf16.mxu1 %v1563_v3  ;;  %4734 = vmatprep.mubr.bf16.mxu0 %v1563_v3 }
 0x466   :  { %4760 = vmatprep.subr.bf16.mxu1 %v5013_v50 }
 0x467   :  { %4761 = vmatpush3.bf16.msra.mxu1 %v5013_v50 }
 0x46c   :  { %4687 = vmatmul.mubr.bf16.gmra.mrb[68].mxu1 %v1564_v49  ;;  %4735 = vmatmul.mubr.bf16.gmra.mrb[68].mxu0 %v1564_v49 }
 0x46d   :  { %4690 = vmatprep.mubr.bf16.mxu1 %v1565_v54  ;;  %4738 = vmatprep.mubr.bf16.mxu0 %v1565_v54 }
 0x474   :  { %4691 = vmatmul.mubr.bf16.gmra.mrb[72].mxu1 %v1566_v47  ;;  %4739 = vmatmul.mubr.bf16.gmra.mrb[72].mxu0 %v1566_v47 }
 0x475   :  { %4694 = vmatprep.mubr.bf16.mxu1 %v1567_v44  ;;  %4742 = vmatprep.mubr.bf16.mxu0 %v1567_v44 }
 0x47c   :  { %4695 = vmatmul.mubr.bf16.gmra.mrb[76].mxu1 %v1568_v56  ;;  %4743 = vmatmul.mubr.bf16.gmra.mrb[76].mxu0 %v1568_v56 }
 0x517   :  { %v6143_v45 = vpop.f32.mrb[48].mxu1  ;;  %v4716_v57 = vpop.f32.mrb[48].mxu0 }
 0x518   :  { %v2067_v58 = vadd.f32 %v4716_v57, %v6141_v51  ;;  %v6146_v61 = vpop.f32.mrb[49].mxu1  ;;  %v2058_v62 = vpop.f32.mrb[49].mxu0  ;;  %v1818_v20 = vmul.f32 %v6143_v45, %v6143_v45 }
 0x519   :  { %v2059_v9 = vadd.f32 %v6141_v51, %v2058_v62  ;;  %v6149_v17 = vpop.f32.mrb[50].mxu1  ;;  %v4717_v22 = vpop.f32.mrb[50].mxu0  ;;  %v1816_v33 = vmul.f32 %v6146_v61, %v6146_v61 }
 0x51a   :  { %v4227_v23 = vmul.f32 -1.442695, %v2067_v58  ;;  %v2070_v6 = vadd.f32 %v4717_v22, %v6141_v51  ;;  %v6152_v41 = vpop.f32.mrb[51].mxu1  ;;  %v2061_v26 = vpop.f32.mrb[51].mxu0  ;;  %v1819_v42 = vmul.f32 %v6149_v17, %v6149_v17 }
 0x51b   :  { %v1778_v2 = vadd.f32 %v6152_v41, %v6146_v61  ;;  %v1817_v30 = vmul.f32 %v6152_v41, %v6152_v41  ;;  %v4225_v34 = vmul.f32 -1.442695, %v2059_v9  ;;  %v2062_v8 = vadd.f32 %v6141_v51, %v2061_v26 }
 0x51c   :  { %v4228_v52 = vmul.f32 -1.442695, %v2070_v6  ;;  %5044 = vpow2.f32 %v4227_v23 }
 0x51d   :  { %v1779_v11 = vadd.f32 %v6143_v45, %v1778_v2  ;;  %v1848_v4 = vadd.f32 %v1817_v30, %v1816_v33  ;;  %5046 = vpow2.f32 %v4225_v34  ;;  %v4226_v18 = vmul.f32 -1.442695, %v2062_v8 }
 0x51e   :  { %5048 = vpow2.f32 %v4228_v52 }
 0x51f   :  { %v1849_v36 = vadd.f32 %v1848_v4, %v1818_v20  ;;  %v6166_v59 = vpop.f32.mrb[52].mxu1  ;;  %v4720_v46 = vpop.f32.mrb[52].mxu0  ;;  %v1780_v10 = vadd.f32 %v6149_v17, %v1779_v11  ;;  %5050 = vpow2.f32 %v4226_v18 }
 0x520   :  { %v2083_v48 = vadd.f32 %v4720_v46, %v6141_v51  ;;  %v6170_v27 = vpop.f32.mrb[53].mxu1  ;;  %v2074_v40 = vpop.f32.mrb[53].mxu0  ;;  %v1822_v13 = vmul.f32 %v6166_v59, %v6166_v59 }
 0x521   :  { %v1781_v12 = vadd.f32 %v1780_v10, %v6170_v27  ;;  %v1820_v21 = vmul.f32 %v6170_v27, %v6170_v27  ;;  %v1850_v43 = vadd.f32 %v1849_v36, %v1819_v42  ;;  %v6175_v28 = vpop.f32.mrb[54].mxu1  ;;  %v4721_v60 = vpop.f32.mrb[54].mxu0  ;;  %v2075_v55 = vadd.f32 %v6141_v51, %v2074_v40 }
 0x522   :  { %v4231_v39 = vmul.f32 -1.442695, %v2083_v48  ;;  %v6178_v31 = vpop.f32.mrb[55].mxu1  ;;  %v2077_v29 = vpop.f32.mrb[55].mxu0  ;;  %v2086_v38 = vadd.f32 %v4721_v60, %v6141_v51  ;;  %v1823_v56 = vmul.f32 %v6175_v28, %v6175_v28 }
 0x523   :  { %v1851_v19 = vadd.f32 %v1850_v43, %v1820_v21  ;;  %v1782_v15 = vadd.f32 %v1781_v12, %v6178_v31  ;;  %v1821_v32 = vmul.f32 %v6178_v31, %v6178_v31  ;;  %v2078_v3 = vadd.f32 %v6141_v51, %v2077_v29 }
 0x524   :  { %v4229_v49 = vmul.f32 -1.442695, %v2075_v55  ;;  %5052 = vpow2.f32 %v4231_v39  ;;  %v4232_v54 = vmul.f32 -1.442695, %v2086_v38 }
 0x525   :  { %v1783_v16 = vadd.f32 %v6166_v59, %v1782_v15  ;;  %v1852_v35 = vadd.f32 %v1851_v19, %v1821_v32  ;;  %v4230_v5 = vmul.f32 -1.442695, %v2078_v3 }
 0x526   :  { %v5045_v44 = vpop.eup %5044  ;;  %5054 = vpow2.f32 %v4229_v49 }
 0x527   :  { %v1853_v37 = vadd.f32 %v1852_v35, %v1822_v13  ;;  %v6188_v24 = vpop.f32.mrb[56].mxu1  ;;  %v4724_v47 = vpop.f32.mrb[56].mxu0  ;;  %v1784_v63 = vadd.f32 %v6175_v28, %v1783_v16  ;;  %v2283_v6 = vadd.f32 1.0, %v5045_v44  ;;  %5056 = vpow2.f32 %v4232_v54 }
 0x528   :  { %v2099_v0 = vadd.f32 %v4724_v47, %v6141_v51  ;;  %v6194_v53 = vpop.f32.mrb[57].mxu1  ;;  %v2090_v7 = vpop.f32.mrb[57].mxu0  ;;  %5058 = vpow2.f32 %v4230_v5  ;;  %v1826_v20 = vmul.f32 %v6188_v24, %v6188_v24 }
 0x529   :  { %v1785_v1 = vadd.f32 %v1784_v63, %v6194_v53  ;;  %v1824_v14 = vmul.f32 %v6194_v53, %v6194_v53  ;;  %v6199_v25 = vpop.f32.mrb[58].mxu1  ;;  %v4725_v50 = vpop.f32.mrb[58].mxu0  ;;  %v1854_v62 = vadd.f32 %v1853_v37, %v1823_v56  ;;  %v2091_v26 = vadd.f32 %v6141_v51, %v2090_v7 }
 0x52a   :  { %v5047_v57 = vpop.eup %5046  ;;  %v4235_v58 = vmul.f32 -1.442695, %v2099_v0  ;;  %v6201_v9 = vpop.f32.mrb[59].mxu1  ;;  %v2102_v33 = vadd.f32 %v4725_v50, %v6141_v51  ;;  %v1827_v40 = vmul.f32 %v6199_v25, %v6199_v25 }
 0x52b   :  { %v2093_v22 = vpop.f32.mrb[59].mxu0  ;;  %v5049_v23 = vpop.eup %5048  ;;  %v1855_v2 = vadd.f32 %v1854_v62, %v1824_v14  ;;  %v1786_v30 = vadd.f32 %v1785_v1, %v6201_v9  ;;  %v1825_v34 = vmul.f32 %v6201_v9, %v6201_v9  ;;  %v2281_v8 = vadd.f32 1.0, %v5047_v57 }
 0x52c   :  { %v4233_v52 = vmul.f32 -1.442695, %v2091_v26  ;;  %v2094_v11 = vadd.f32 %v6141_v51, %v2093_v22  ;;  %v5051_v4 = vpop.eup %5050  ;;  %v2284_v42 = vadd.f32 1.0, %v5049_v23  ;;  %5060 = vpow2.f32 %v4235_v58 }
 0x52d   :  { %v1787_v36 = vadd.f32 %v6188_v24, %v1786_v30  ;;  %v1856_v46 = vadd.f32 %v1855_v2, %v1825_v34  ;;  %v4236_v10 = vmul.f32 -1.442695, %v2102_v33  ;;  %v2282_v55 = vadd.f32 1.0, %v5051_v4 }
 0x52e   :  { %5062 = vpow2.f32 %v4233_v52  ;;  %v4234_v21 = vmul.f32 -1.442695, %v2094_v11  ;;  %v5053_v39 = vpop.eup %5052 }
 0x52f   :  { %v6212_v18 = vpop.f32.mrb[60].mxu1  ;;  %v4728_v48 = vpop.f32.mrb[60].mxu0  ;;  %5064 = vrcp.f32 %v2283_v6  ;;  %v1857_v12 = vadd.f32 %v1856_v46, %v1826_v20  ;;  %v1788_v19 = vadd.f32 %v6199_v25, %v1787_v36  ;;  %v2287_v47 = vadd.f32 1.0, %v5053_v39 }
 0x530   :  { %7499 = vst [vmem:[#allocation16_spill] sm:$0xff] %v6212_v18  ;;  %v6216_v43 = vpop.f32.mrb[61].mxu1  ;;  %v2106_v60 = vpop.f32.mrb[61].mxu0  ;;  %5066 = vrcp.f32 %v2281_v8  ;;  %v2115_v29 = vadd.f32 %v4728_v48, %v6141_v51  ;;  %v1830_v6 = vmul.f32 %v6212_v18, %v6212_v18 }
 0x531   :  { %v6220_v38 = vpop.f32.mrb[62].mxu1  ;;  %v4729_v15 = vpop.f32.mrb[62].mxu0  ;;  %5068 = vrcp.f32 %v2284_v42  ;;  %v1828_v32 = vmul.f32 %v6216_v43, %v6216_v43  ;;  %v1858_v3 = vadd.f32 %v1857_v12, %v1827_v40  ;;  %v2107_v13 = vadd.f32 %v6141_v51, %v2106_v60 }
 0x532   :  { %7500 = vst [vmem:[#allocation17_spill] sm:$0xff] %v6220_v38  ;;  %v6225_v16 = vpop.f32.mrb[63].mxu1  ;;  %v2109_v35 = vpop.f32.mrb[63].mxu0  ;;  %5070 = vpow2.f32 %v4236_v10  ;;  %v4239_v49 = vmul.f32 -1.442695, %v2115_v29  ;;  %v1789_v54 = vadd.f32 %v1788_v19, %v6216_v43  ;;  %v2118_v5 = vadd.f32 %v4729_v15, %v6141_v51 }
 0x533   :  { %v5055_v37 = vpop.eup %5054  ;;  %5072 = vpow2.f32 %v4234_v21  ;;  %v1859_v63 = vadd.f32 %v1858_v3, %v1828_v32  ;;  %v4237_v44 = vmul.f32 -1.442695, %v2107_v13  ;;  %v1829_v1 = vmul.f32 %v6225_v16, %v6225_v16 }
 0x534   :  { %v5057_v56 = vpop.eup %5056  ;;  %5074 = vrcp.f32 %v2282_v55  ;;  %v1790_v0 = vadd.f32 %v1789_v54, %v6225_v16  ;;  %v2110_v14 = vadd.f32 %v6141_v51, %v2109_v35  ;;  %v2285_v50 = vadd.f32 1.0, %v5055_v37 }
 0x535   :  { %v5059_v7 = vpop.eup %5058  ;;  %5076 = vpow2.f32 %v4239_v49  ;;  %v4240_v57 = vmul.f32 -1.442695, %v2118_v5  ;;  %v1860_v26 = vadd.f32 %v1859_v63, %v1829_v1  ;;  %v2288_v8 = vadd.f32 1.0, %v5057_v56 }
 0x536   :  { %5078 = vpow2.f32 %v4237_v44  ;;  %v1791_v58 = vadd.f32 %v6212_v18, %v1790_v0  ;;  %v5061_v23 = vpop.eup %5060  ;;  %v4238_v33 = vmul.f32 -1.442695, %v2110_v14  ;;  %v2286_v20 = vadd.f32 1.0, %v5059_v7 }
 0x537   :  { %v6234_v62 = vpop.f32.mrb[64].mxu1  ;;  %v4732_v22 = vpop.f32.mrb[64].mxu0  ;;  %5080 = vrcp.f32 %v2287_v47  ;;  %v1831_v36 = vmul.f32 %v6220_v38, %v6220_v38  ;;  %v1861_v46 = vadd.f32 %v1860_v26, %v1830_v6  ;;  %v2291_v60 = vadd.f32 1.0, %v5061_v23 }
 0x538   :  { %7501 = vst [vmem:[#allocation18_spill] sm:$0xff] %v6234_v62  ;;  %v6238_v2 = vpop.f32.mrb[65].mxu1  ;;  %v2122_v30 = vpop.f32.mrb[65].mxu0  ;;  %5082 = vpow2.f32 %v4240_v57  ;;  %v1792_v52 = vadd.f32 %v6220_v38, %v1791_v58  ;;  %v2131_v10 = vadd.f32 %v4732_v22, %v6141_v51  ;;  %v1834_v1 = vmul.f32 %v6234_v62, %v6234_v62  ;;  %v2395_v38 = vld [vmem:[#allocation7 + $0x90] sm:$0xff] }
 0x539   :  { %7502 = vst [vmem:[#allocation19_spill] sm:$0xff] %v6238_v2  ;;  %v5063_v34 = vpop.eup %5062  ;;  %v6241_v11 = vpop.f32.mrb[66].mxu1  ;;  %v1832_v48 = vmul.f32 %v6238_v2, %v6238_v2  ;;  %5084 = vrcp.f32 %v2285_v50  ;;  %v2123_v55 = vadd.f32 %v6141_v51, %v2122_v30  ;;  %v1862_v15 = vadd.f32 %v1861_v46, %v1831_v36 }
 0x53a   :  { %7503 = vst [vmem:[#allocation20_spill] sm:$0xff] %v6241_v11  ;;  %v4733_v4 = vpop.f32.mrb[66].mxu0  ;;  %v6243_v42 = vpop.eup %5064  ;;  %v1793_v39 = vadd.f32 %v1792_v52, %v6238_v2  ;;  %v2289_v19 = vadd.f32 1.0, %v5063_v34  ;;  %5086 = vpow2.f32 %v4238_v33  ;;  %v4243_v49 = vmul.f32 -1.442695, %v2131_v10  ;;  %v2391_v2 = vld [vmem:[#allocation7 + $0x70] sm:$0xff] }
 0x53b   :  { %v6250_v40 = vpop.f32.mrb[67].mxu1  ;;  %v2125_v12 = vpop.f32.mrb[67].mxu0  ;;  %5088 = vrcp.f32 %v2288_v8  ;;  %v1863_v54 = vadd.f32 %v1862_v15, %v1832_v48  ;;  %v2134_v37 = vadd.f32 %v4733_v4, %v6141_v51  ;;  %v4241_v63 = vmul.f32 -1.442695, %v2123_v55 }
 0x53c   :  { %7504 = vst [vmem:[#allocation21_spill] sm:$0xff] %v6250_v40  ;;  %v6252_v21 = vpop.eup %5066  ;;  %v1794_v3 = vadd.f32 %v1793_v39, %v6250_v40  ;;  %v1833_v13 = vmul.f32 %v6250_v40, %v6250_v40  ;;  %5090 = vrcp.f32 %v2286_v20  ;;  %v1835_v23 = vmul.f32 %v6241_v11, %v6241_v11  ;;  %v2389_v40 = vld [vmem:[#allocation7 + $0x60] sm:$0xff] }
 0x53d   :  { %v6256_v29 = vpop.eup %5068  ;;  %5092 = vrcp.f32 %v2291_v60  ;;  %v2126_v6 = vadd.f32 %v6141_v51, %v2125_v12  ;;  %v4244_v8 = vmul.f32 -1.442695, %v2134_v37 }
 0x53e   :  { %v5071_v32 = vpop.eup %5070  ;;  %v1795_v44 = vadd.f32 %v6234_v62, %v1794_v3  ;;  %5094 = vrcp.f32 %v2289_v19  ;;  %v1864_v14 = vadd.f32 %v1863_v54, %v1833_v13  ;;  %v2390_v62 = vld [vmem:[#allocation7 + $0x68] sm:$0xff] }
 0x53f   :  { %v5073_v35 = vpop.eup %5072  ;;  %v6265_v56 = vpop.f32.mrb[68].mxu1  ;;  %v2292_v7 = vadd.f32 1.0, %v5071_v32  ;;  %5096 = vpow2.f32 %v4243_v49  ;;  %v4242_v19 = vmul.f32 -1.442695, %v2126_v6 }
 0x540   :  { %v6262_v47 = vpop.eup %5074  ;;  %7505 = vst [vmem:[#allocation22_spill] sm:$0xff] %v6265_v56  ;;  %v4736_v5 = vpop.f32.mrb[68].mxu0  ;;  %v2290_v22 = vadd.f32 1.0, %v5073_v35  ;;  %v1796_v26 = vadd.f32 %v6241_v11, %v1795_v44  ;;  %v1865_v20 = vadd.f32 %v1864_v14, %v1834_v1  ;;  %5098 = vpow2.f32 %v4241_v63  ;;  %v2383_v11 = vld [vmem:[#allocation7 + $0x30] sm:$0xff] }
 0x541   :  { %v5077_v0 = vpop.eup %5076  ;;  %v6269_v50 = vpop.f32.mrb[69].mxu1  ;;  %5100 = vrcp.f32 %v2292_v7  ;;  %v2147_v60 = vadd.f32 %v4736_v5, %v6141_v51  ;;  %v1838_v37 = vmul.f32 %v6265_v56, %v6265_v56 }
 0x542   :  { %7506 = vst [vmem:[#allocation23_spill] sm:$0xff] %v6269_v50  ;;  %v2138_v57 = vpop.f32.mrb[69].mxu0  ;;  %v5079_v58 = vpop.eup %5078  ;;  %v1836_v52 = vmul.f32 %v6269_v50, %v6269_v50  ;;  %v2295_v10 = vadd.f32 1.0, %v5077_v0  ;;  %v1797_v48 = vadd.f32 %v1796_v26, %v6269_v50  ;;  %v1866_v39 = vadd.f32 %v1865_v20, %v1835_v23  ;;  %v2382_v50 = vld [vmem:[#allocation7 + $0x28] sm:$0xff] }
 0x543   :  { %v6275_v33 = vpop.f32.mrb[70].mxu1  ;;  %v4737_v30 = vpop.f32.mrb[70].mxu0  ;;  %v2293_v12 = vadd.f32 1.0, %v5079_v58  ;;  %5102 = vrcp.f32 %v2290_v22  ;;  %v2139_v49 = vadd.f32 %v6141_v51, %v2138_v57  ;;  %v4247_v1 = vmul.f32 -1.442695, %v2147_v60 }
 0x544   :  { %7507 = vst [vmem:[#allocation24_spill] sm:$0xff] %v6275_v33  ;;  %v6277_v34 = vpop.eup %5080  ;;  %v6281_v4 = vpop.f32.mrb[71].mxu1  ;;  %5104 = vpow2.f32 %v4244_v8  ;;  %v1867_v35 = vadd.f32 %v1866_v39, %v1836_v52  ;;  %v2150_v63 = vadd.f32 %v4737_v30, %v6141_v51 }
 0x545   :  { %7508 = vst [vmem:[#allocation25_spill] sm:$0xff] %v6277_v34  ;;  %7509 = vst [vmem:[#allocation26_spill] sm:$0xff] %v6281_v4  ;;  %v2141_v36 = vpop.f32.mrb[71].mxu0  ;;  %v5083_v46 = vpop.eup %5082  ;;  %v1798_v15 = vadd.f32 %v1797_v48, %v6281_v4  ;;  %v1837_v32 = vmul.f32 %v6281_v4, %v6281_v4  ;;  %5106 = vrcp.f32 %v2295_v10 }
 0x546   :  { %v6285_v55 = vpop.eup %5084  ;;  %v2296_v13 = vadd.f32 1.0, %v5083_v46  ;;  %5108 = vrcp.f32 %v2293_v12  ;;  %v2142_v57 = vadd.f32 %v6141_v51, %v2141_v36  ;;  %v4245_v46 = vmul.f32 -1.442695, %v2139_v49 }
 0x547   :  { %v5087_v3 = vpop.eup %5086  ;;  %v1799_v44 = vadd.f32 %v6265_v56, %v1798_v15  ;;  %v6297_v5 = vpop.f32.mrb[72].mxu1  ;;  %v1868_v14 = vadd.f32 %v1867_v35, %v1837_v32  ;;  %5110 = vpow2.f32 %v4242_v19  ;;  %v1839_v36 = vmul.f32 %v6275_v33, %v6275_v33  ;;  %v2394_v56 = vld [vmem:[#allocation7 + $0x88] sm:$0xff] }
 0x548   :  { %v6291_v54 = vpop.eup %5088  ;;  %7511 = vst [vmem:[#allocation28_spill] sm:$0xff] %v6297_v5  ;;  %v4740_v0 = vpop.f32.mrb[72].mxu0  ;;  %v2294_v6 = vadd.f32 1.0, %v5087_v3  ;;  %5112 = vrcp.f32 %v2296_v13  ;;  %v4248_v60 = vmul.f32 -1.442695, %v2150_v63 }
 0x549   :  { %7510 = vst [vmem:[#allocation27_spill] sm:$0xff] %v6291_v54  ;;  %v6299_v7 = vpop.eup %5090  ;;  %v6302_v58 = vpop.f32.mrb[73].mxu1  ;;  %v2163_v26 = vadd.f32 %v4740_v0, %v6141_v51  ;;  %v1800_v30 = vadd.f32 %v6275_v33, %v1799_v44  ;;  %v1869_v10 = vadd.f32 %v1868_v14, %v1838_v37  ;;  %5114 = vpow2.f32 %v4247_v1  ;;  %v2388_v33 = vld [vmem:[#allocation7 + $0x58] sm:$0xff] }
 0x54a   :  { %7512 = vst [vmem:[#allocation29_spill] sm:$0xff] %v6302_v58  ;;  %v2154_v22 = vpop.f32.mrb[73].mxu0  ;;  %v6304_v23 = vpop.eup %5092  ;;  %v1840_v19 = vmul.f32 %v6302_v58, %v6302_v58  ;;  %v4246_v3 = vmul.f32 -1.442695, %v2142_v57  ;;  %5116 = vrcp.f32 %v2294_v6  ;;  %v1842_v37 = vmul.f32 %v6297_v5, %v6297_v5 }
 0x54b   :  { %7513 = vst [vmem:[#allocation30_spill] sm:$0xff] %v6304_v23  ;;  %v6308_v8 = vpop.f32.mrb[74].mxu1  ;;  %v4741_v20 = vpop.f32.mrb[74].mxu0  ;;  %v1801_v39 = vadd.f32 %v1800_v30, %v6302_v58  ;;  %v2155_v15 = vadd.f32 %v6141_v51, %v2154_v22  ;;  %v1870_v13 = vadd.f32 %v1869_v10, %v1839_v36  ;;  %v4251_v44 = vmul.f32 -1.442695, %v2163_v26  ;;  %v2387_v58 = vld [vmem:[#allocation7 + $0x50] sm:$0xff] }
 0x54c   :  { %7514 = vst [vmem:[#allocation31_spill] sm:$0xff] %v6308_v8  ;;  %v6310_v52 = vpop.eup %5094  ;;  %v6314_v48 = vpop.f32.mrb[75].mxu1  ;;  %v2166_v35 = vadd.f32 %v4741_v20, %v6141_v51  ;;  %5118 = vpow2.f32 %v4245_v46  ;;  %v6481_v18 = vmul.f32 %v6299_v7, %v2382_v50 }
 0x54d   :  { %7515 = vst [vmem:[#allocation32_spill] sm:$0xff] %v6310_v52  ;;  %7516 = vst [vmem:[#allocation33_spill] sm:$0xff] %v6314_v48  ;;  %v2157_v12 = vpop.f32.mrb[75].mxu0  ;;  %v5097_v32 = vpop.eup %5096  ;;  %v1802_v63 = vadd.f32 %v1801_v39, %v6314_v48  ;;  %v1871_v14 = vadd.f32 %v1870_v13, %v1840_v19  ;;  %v4249_v30 = vmul.f32 -1.442695, %v2155_v15  ;;  %v1841_v1 = vmul.f32 %v6314_v48, %v6314_v48 }
 0x54e   :  { %v5099_v49 = vpop.eup %5098  ;;  %5120 = vpow2.f32 %v4248_v60  ;;  %v4252_v22 = vmul.f32 -1.442695, %v2166_v35  ;;  %v2158_v20 = vadd.f32 %v6141_v51, %v2157_v12  ;;  %v2299_v39 = vadd.f32 1.0, %v5097_v32  ;;  %7529 = vst [vmem:[#allocation46_spill] sm:$0xff] %v6481_v18 }
 0x54f   :  { %v6324_v0 = vpop.eup %5100  ;;  %v1803_v6 = vadd.f32 %v6297_v5, %v1802_v63  ;;  %v6332_v36 = vpop.f32.mrb[76].mxu1  ;;  %5122 = vpow2.f32 %v4246_v3  ;;  %v1872_v46 = vadd.f32 %v1871_v14, %v1841_v1  ;;  %v1843_v32 = vmul.f32 %v6308_v8, %v6308_v8  ;;  %v2392_v5 = vld [vmem:[#allocation7 + $0x78] sm:$0xff] }
 0x550   :  { %7517 = vst [vmem:[#allocation34_spill] sm:$0xff] %v6324_v0  ;;  %v6328_v57 = vpop.eup %5102  ;;  %7519 = vst [vmem:[#allocation36_spill] sm:$0xff] %v6332_v36  ;;  %v4744_v26 = vpop.f32.mrb[76].mxu0  ;;  %v2297_v0 = vadd.f32 1.0, %v5099_v49  ;;  %5124 = vpow2.f32 %v4251_v44  ;;  %v4250_v60 = vmul.f32 -1.442695, %v2158_v20 }
 0x551   :  { %7518 = vst [vmem:[#allocation35_spill] sm:$0xff] %v6328_v57  ;;  %v5105_v10 = vpop.eup %5104  ;;  %v6334_v19 = vpop.f32.mrb[77].mxu1  ;;  %v2179_v35 = vadd.f32 %v4744_v26, %v6141_v51  ;;  %v1804_v63 = vadd.f32 %v6308_v8, %v1803_v6  ;;  %5126 = vpow2.f32 %v4249_v30  ;;  %v1873_v3 = vadd.f32 %v1872_v46, %v1842_v37 }
 0x552   :  { %7520 = vst [vmem:[#allocation37_spill] sm:$0xff] %v6334_v19  ;;  %v2170_v15 = vpop.f32.mrb[77].mxu0  ;;  %v6336_v13 = vpop.eup %5106  ;;  %v1844_v49 = vmul.f32 %v6334_v19, %v6334_v19  ;;  %5128 = vpow2.f32 %v4252_v22 }
 0x553   :  { %7521 = vst [vmem:[#allocation38_spill] sm:$0xff] %v6336_v13  ;;  %v6340_v12 = vpop.f32.mrb[78].mxu1  ;;  %v4745_v23 = vpop.f32.mrb[78].mxu0  ;;  %v4255_v20 = vmul.f32 -1.442695, %v2179_v35  ;;  %v1805_v6 = vadd.f32 %v1804_v63, %v6334_v19  ;;  %v2171_v26 = vadd.f32 %v6141_v51, %v2170_v15  ;;  %5130 = vpow2.f32 %v4250_v60 }
 0x554   :  { %7522 = vst [vmem:[#allocation39_spill] sm:$0xff] %v6340_v12  ;;  %v6342_v57 = vpop.eup %5108  ;;  %v6348_v14 = vpop.f32.mrb[79].mxu1  ;;  %v1874_v30 = vadd.f32 %v1873_v3, %v1843_v32  ;;  %v2182_v37 = vadd.f32 %v4745_v23, %v6141_v51  ;;  %v2300_v15 = vadd.f32 1.0, %v5105_v10  ;;  %v1846_v3 = vmul.f32 %v6332_v36, %v6332_v36 }
 0x555   :  { %7523 = vst [vmem:[#allocation40_spill] sm:$0xff] %v6342_v57  ;;  %v2173_v44 = vpop.f32.mrb[79].mxu0  ;;  %v5111_v1 = vpop.eup %5110  ;;  %5132 = vpow2.f32 %v4255_v20  ;;  %v4253_v57 = vmul.f32 -1.442695, %v2171_v26  ;;  %v1806_v54 = vadd.f32 %v1805_v6, %v6348_v14  ;;  %v1845_v22 = vmul.f32 %v6348_v14, %v6348_v14 }
 0x556   :  { %v6352_v13 = vpop.eup %5112  ;;  %5134 = vrcp.f32 %v2299_v39  ;;  %v1875_v52 = vadd.f32 %v1874_v30, %v1844_v49  ;;  %v4256_v63 = vmul.f32 -1.442695, %v2182_v37  ;;  %v2174_v60 = vadd.f32 %v6141_v51, %v2173_v44 }
 0x557   :  { %7524 = vst [vmem:[#allocation41_spill] sm:$0xff] %v6352_v13  ;;  %v5115_v46 = vpop.eup %5114  ;;  %5136 = vrcp.f32 %v2297_v0  ;;  %v1807_v23 = vadd.f32 %v6332_v36, %v1806_v54  ;;  %v2298_v20 = vadd.f32 1.0, %v5111_v1  ;;  %v1847_v0 = vmul.f32 %v6340_v12, %v6340_v12  ;;  %v2393_v36 = vld [vmem:[#allocation7 + $0x80] sm:$0xff] }
 0x558   :  { %v6358_v35 = vpop.eup %5116  ;;  %5138 = vpow2.f32 %v4253_v57  ;;  %v1876_v39 = vadd.f32 %v1875_v52, %v1845_v22  ;;  %v4254_v6 = vmul.f32 -1.442695, %v2174_v60  ;;  %v2303_v30 = vadd.f32 1.0, %v5115_v46  ;;  %v7538_v50 = vld [vmem:[#allocation34_spill] sm:$0xff] }
 0x559   :  { %7525 = vst [vmem:[#allocation42_spill] sm:$0xff] %v6358_v35  ;;  %v5119_v32 = vpop.eup %5118  ;;  %5140 = vpow2.f32 %v4256_v63  ;;  %v1808_v10 = vadd.f32 %v6340_v12, %v1807_v23  ;;  %v2396_v12 = vld [vmem:[#allocation7 + $0x98] sm:$0xff]  ;;  %v6499_v7 = vmul.f32 %v7538_v50, %v2388_v33 }
 0x55a   :  { %v5121_v49 = vpop.eup %5120  ;;  %v1877_v51 = vadd.f32 %v1876_v39, %v1846_v3  ;;  %5142 = vrcp.f32 %v2300_v15  ;;  %v2301_v37 = vadd.f32 1.0, %v5119_v32 }
 0x55b   :  { %v5123_v26 = vpop.eup %5122  ;;  %v2304_v57 = vadd.f32 1.0, %v5121_v49  ;;  %v1809_v35 = vrot.slane %v1808_v10, 4  ;;  %5144 = vpow2.f32 %v4254_v6 }
 0x55c   :  { %v5125_v44 = vpop.eup %5124  ;;  %v1878_v54 = vadd.f32 %v1877_v51, %v1847_v0  ;;  %5146 = vrcp.f32 %v2298_v20  ;;  %v2302_v1 = vadd.f32 1.0, %v5123_v26 }
 0x55d   :  { %v5127_v13 = vpop.eup %5126  ;;  %5148 = vrcp.f32 %v2303_v30  ;;  %v2307_v46 = vadd.f32 1.0, %v5125_v44  ;;  %v1810_v63 = vadd.f32 %v1809_v35, %v1808_v10 }
 0x55e   :  { %v5129_v52 = vpop.eup %5128  ;;  %v1879_v60 = vrot.slane %v1878_v54, 4  ;;  %5150 = vrcp.f32 %v2301_v37  ;;  %v2305_v23 = vadd.f32 1.0, %v5127_v13 }
 0x55f   :  { %v5131_v22 = vpop.eup %5130  ;;  %5152 = vrcp.f32 %v2304_v57  ;;  %v2308_v15 = vadd.f32 1.0, %v5129_v52  ;;  %v1811_v32 = vrot.slane %v1810_v63, 2 }
 0x560   :  { %v5133_v34 = vpop.eup %5132  ;;  %v1880_v39 = vadd.f32 %v1879_v60, %v1878_v54  ;;  %5154 = vrcp.f32 %v2302_v1  ;;  %v2306_v6 = vadd.f32 1.0, %v5131_v22 }
 0x561   :  { %v6367_v3 = vpop.eup %5134  ;;  %5156 = vrcp.f32 %v2307_v46  ;;  %v2311_v26 = vadd.f32 1.0, %v5133_v34  ;;  %v1812_v30 = vadd.f32 %v1811_v32, %v1810_v63 }
 0x562   :  { %v6369_v49 = vpop.eup %5136  ;;  %v1881_v0 = vrot.slane %v1880_v39, 2  ;;  %5158 = vrcp.f32 %v2305_v23 }
 0x563   :  { %v5139_v20 = vpop.eup %5138  ;;  %5160 = vrcp.f32 %v2308_v15  ;;  %v1813_v51 = vrot.slane %v1812_v30, 1  ;;  %v6514_v33 = vmul.f32 %v6369_v49, %v2393_v36 }
 0x564   :  { %v5141_v35 = vpop.eup %5140  ;;  %v2309_v10 = vadd.f32 1.0, %v5139_v20  ;;  %v1882_v44 = vadd.f32 %v1881_v0, %v1880_v39  ;;  %5162 = vrcp.f32 %v2306_v6  ;;  %v2380_v0 = vld [vmem:[#allocation7 + $0x18] sm:$0xff]  ;;  %v2378_v6 = vld [vmem:[#allocation7 + $0x8] sm:$0xff] }
 0x565   :  { %v2312_v13 = vadd.f32 1.0, %v5141_v35  ;;  %v6371_v37 = vpop.eup %5142  ;;  %5164 = vrcp.f32 %v2311_v26  ;;  %v1814_v54 = vadd.f32 %v1813_v51, %v1812_v30  ;;  %v2379_v51 = vld [vmem:[#allocation7 + $0x10] sm:$0xff]  ;;  %v2377_v26 = vld [vmem:[#allocation7] sm:$0xff]  ;;  %v6469_v39 = vmul.f32 %v6256_v29, %v2380_v0  ;;  %v7532_v29 = vld [vmem:[#allocation27_spill] sm:$0xff] }
 0x566   :  { %v5145_v57 = vpop.eup %5144  ;;  %v1883_v52 = vrot.slane %v1882_v44, 1  ;;  %5166 = vrcp.f32 %v2309_v10  ;;  %v6472_v19 = vmul.f32 %v6252_v21, %v2377_v26  ;;  %v6475_v48 = vmul.f32 %v6262_v47, %v2378_v6  ;;  %v2397_v21 = vld [vmem:[#allocation7 + $0xa0] sm:$0xff]  ;;  %v2399_v26 = vld [vmem:[#allocation7 + $0xb0] sm:$0xff] }
 0x567   :  { %v6373_v1 = vpop.eup %5146  ;;  %v2310_v34 = vadd.f32 1.0, %v5145_v57  ;;  %5168 = vrcp.f32 %v2312_v13  ;;  %v6377_v46 = vmul.f32 0.00390625, %v1814_v54  ;;  %v6466_v57 = vmul.f32 %v6243_v42, %v2379_v51  ;;  %7527 = vst [vmem:[#allocation44_spill] sm:$0xff] %v6469_v39  ;;  %v7530_v42 = vld [vmem:[#allocation25_spill] sm:$0xff]  ;;  %v7534_v47 = vld [vmem:[#allocation32_spill] sm:$0xff] }
 0x568   :  { %v6375_v22 = vpop.eup %5148  ;;  %v1884_v63 = vadd.f32 %v1883_v52, %v1882_v44  ;;  %7528 = vst [vmem:[#allocation45_spill] sm:$0xff] %v6475_v48  ;;  %v6484_v51 = vmul.f32 %v7530_v42, %v2383_v11  ;;  %v2400_v39 = vld [vmem:[#allocation7 + $0xb8] sm:$0xff]  ;;  %v2398_v11 = vld [vmem:[#allocation7 + $0xa8] sm:$0xff]  ;;  %v2401_v42 = vld [vmem:[#allocation7 + $0xc0] sm:$0xff]  ;;  %v6517_v50 = vmul.f32 %v6373_v1, %v2394_v56 }
 0x569   :  { %v6379_v60 = vpop.eup %5150  ;;  %5170 = vrcp.f32 %v2310_v34  ;;  %v1886_v32 = vmul.f32 %v6377_v46, %v6377_v46  ;;  %7526 = vst [vmem:[#allocation43_spill] sm:$0xff] %v6466_v57  ;;  %v7535_v57 = vld [vmem:[#allocation35_spill] sm:$0xff]  ;;  %v6532_v36 = vmul.f32 %v6375_v22, %v2399_v26 }
 0x56a   :  { %v6381_v23 = vpop.eup %5152  ;;  %v1885_v15 = vmul.f32 0.00390625, %v1884_v63  ;;  %v2381_v63 = vld [vmem:[#allocation7 + $0x20] sm:$0xff]  ;;  %7531 = vst [vmem:[#allocation25_spill] sm:$0xff] %v6484_v51  ;;  %v2403_v51 = vld [vmem:[#allocation7 + $0xd0] sm:$0xff] }
 0x56b   :  { %v6389_v20 = vpop.eup %5154  ;;  %v6478_v8 = vmul.f32 %v6285_v55, %v2381_v63  ;;  %v7536_v55 = vld [vmem:[#allocation30_spill] sm:$0xff]  ;;  %v6535_v56 = vmul.f32 %v6381_v23, %v2400_v39  ;;  %v7549_v39 = vsub.f32 %v6348_v14, %v6377_v46  ;;  %v7555_v14 = vsub.f32 %v6170_v27, %v6377_v46 }
 0x56c   :  { %v6399_v10 = vpop.eup %5156  ;;  %v1887_v13 = vsub.f32 %v1885_v15, %v1886_v32  ;;  %v2384_v15 = vld [vmem:[#allocation7 + $0x38] sm:$0xff]  ;;  %v6496_v63 = vmul.f32 %v7536_v55, %v2387_v58  ;;  %v2402_v58 = vld [vmem:[#allocation7 + $0xc8] sm:$0xff]  ;;  %v7560_v27 = vsub.f32 %v6201_v9, %v6377_v46 }
 0x56d   :  { %v6407_v54 = vpop.eup %5158  ;;  %v6487_v0 = vmul.f32 %v7532_v29, %v2384_v15  ;;  %v7539_v15 = vld [vmem:[#allocation40_spill] sm:$0xff]  ;;  %v2404_v55 = vld [vmem:[#allocation7 + $0xd8] sm:$0xff] }
 0x56e   :  { %v6417_v32 = vpop.eup %5160  ;;  %v1888_v44 = vmax.f32 %v1887_v13, 0.0  ;;  %7537 = vst [vmem:[#allocation32_spill] sm:$0xff] %v6496_v63  ;;  %v6502_v29 = vmul.f32 %v7539_v15, %v2389_v40  ;;  %v2407_v63 = vld [vmem:[#allocation7 + $0xf0] sm:$0xff]  ;;  %v6520_v40 = vmul.f32 %v6367_v3, %v2395_v38  ;;  %v2408_v15 = vld [vmem:[#allocation7 + $0xf8] sm:$0xff]  ;;  %v6538_v38 = vmul.f32 %v6407_v54, %v2401_v42 }
 0x56f   :  { %v6425_v35 = vpop.eup %5162  ;;  %7533 = vst [vmem:[#allocation27_spill] sm:$0xff] %v6487_v0  ;;  %v7540_v0 = vld [vmem:[#allocation42_spill] sm:$0xff]  ;;  %v6544_v3 = vmul.f32 %v6399_v10, %v2403_v51  ;;  %v6547_v49 = vmul.f32 %v6417_v32, %v2404_v55  ;;  %v7552_v54 = vsub.f32 %v6152_v41, %v6377_v46  ;;  %v7557_v41 = vsub.f32 %v6166_v59, %v6377_v46 }
 0x570   :  { %v6435_v34 = vpop.eup %5164  ;;  %v1921_v30 = vadd.f32 1e-10, %v1888_v44  ;;  %v2385_v44 = vld [vmem:[#allocation7 + $0x40] sm:$0xff]  ;;  %v6505_v18 = vmul.f32 %v7540_v0, %v2390_v62  ;;  %v6523_v62 = vmul.f32 %v6371_v37, %v2396_v12  ;;  %v2406_v0 = vld [vmem:[#allocation7 + $0xe8] sm:$0xff]  ;;  %v6541_v12 = vmul.f32 %v6425_v35, %v2402_v58 }
 0x571   :  { %v6443_v13 = vpop.eup %5166  ;;  %v6490_v6 = vmul.f32 %v7534_v47, %v2385_v44  ;;  %v7541_v44 = vld [vmem:[#allocation38_spill] sm:$0xff]  ;;  %7543 = vst [vmem:[#allocation35_spill] sm:$0xff] %v6544_v3  ;;  %7544 = vst [vmem:[#allocation30_spill] sm:$0xff] %v6547_v49  ;;  %v7551_v35 = vsub.f32 %v6146_v61, %v6377_v46  ;;  %v7556_v61 = vsub.f32 %v6178_v31, %v6377_v46 }
 0x572   :  { %v6453_v4 = vpop.eup %5168  ;;  %5172 = vrsqrt.f32 %v1921_v30  ;;  %v2386_v30 = vld [vmem:[#allocation7 + $0x48] sm:$0xff]  ;;  %v6508_v47 = vmul.f32 %v7541_v44, %v2391_v2  ;;  %v2405_v2 = vld [vmem:[#allocation7 + $0xe0] sm:$0xff]  ;;  %v6529_v44 = vmul.f32 %v6389_v20, %v2398_v11  ;;  %v7561_v31 = vsub.f32 %v6188_v24, %v6377_v46 }
 0x573   :  { %v5171_v52 = vpop.eup %5170  ;;  %v6493_v48 = vmul.f32 %v7535_v57, %v2386_v30  ;;  %v7542_v57 = vld [vmem:[#allocation41_spill] sm:$0xff]  ;;  %v6550_v1 = vmul.f32 %v6443_v13, %v2405_v2  ;;  %v6558_v23 = vmul.f32 %v6453_v4, %v2408_v15  ;;  %v7554_v4 = vsub.f32 %v6149_v17, %v6377_v46 }
 0x574   :  { %v6511_v30 = vmul.f32 %v7542_v57, %v2392_v5  ;;  %v6526_v5 = vmul.f32 %v6379_v60, %v2397_v21  ;;  %v6552_v22 = vmul.f32 %v5171_v52, %v2406_v0  ;;  %v6555_v60 = vmul.f32 %v6435_v34, %v2407_v63  ;;  %v7565_v0 = vld [vmem:[#allocation16_spill] sm:$0xff] }
 0x575   :  { %7545 = vst [vmem:[#allocation34_spill] sm:$0xff] %v6550_v1  ;;  %7548 = vst [vmem:[#allocation38_spill] sm:$0xff] %v6558_v23  ;;  %v7553_v34 = vsub.f32 %v6143_v45, %v6377_v46  ;;  %v7558_v45 = vsub.f32 %v6175_v28, %v6377_v46  ;;  %v7559_v17 = vsub.f32 %v6194_v53, %v6377_v46  ;;  %v7595_v23 = vld [vmem:[#allocation37_spill] sm:$0xff]  ;;  %v7604_v1 = vld [vmem:[#allocation43_spill] sm:$0xff] }
 0x576   :  { %7546 = vst [vmem:[#allocation40_spill] sm:$0xff] %v6552_v22  ;;  %7547 = vst [vmem:[#allocation42_spill] sm:$0xff] %v6555_v60  ;;  %v7562_v59 = vsub.f32 %v6199_v25, %v6377_v46  ;;  %v7563_v28 = vsub.f32 %v6216_v43, %v6377_v46  ;;  %v7564_v53 = vsub.f32 %v6225_v16, %v6377_v46  ;;  %v7598_v60 = vld [vmem:[#allocation36_spill] sm:$0xff]  ;;  %v7601_v22 = vld [vmem:[#allocation39_spill] sm:$0xff] }
 0x577   :  { %v7566_v9 = vsub.f32 %v7565_v0, %v6377_v46 }
 0x57c   :  { %v5173_v37 = vpop.eup %5172 }
 0x57d   :  { %v6563_v20 = vmul.f32 %v5173_v37, %v7549_v39  ;;  %v1923_v10 = vmul.f32 %v5173_v37, %v7551_v35  ;;  %v1924_v52 = vmul.f32 %v5173_v37, %v7552_v54  ;;  %v1925_v32 = vmul.f32 %v5173_v37, %v7553_v34  ;;  %v7567_v39 = vld [vmem:[#allocation17_spill] sm:$0xff]  ;;  %v7569_v54 = vld [vmem:[#allocation19_spill] sm:$0xff] }
 0x57e   :  { %v1926_v13 = vmul.f32 %v5173_v37, %v7554_v4  ;;  %v1927_v51 = vmul.f32 %v5173_v37, %v7555_v14  ;;  %v1928_v21 = vmul.f32 %v5173_v37, %v7556_v61  ;;  %v1929_v26 = vmul.f32 %v5173_v37, %v7557_v41  ;;  %v7571_v4 = vld [vmem:[#allocation21_spill] sm:$0xff]  ;;  %v7573_v61 = vld [vmem:[#allocation18_spill] sm:$0xff] }
 0x57f   :  { %7550 = vst [vmem:[#allocation41_spill] sm:$0xff] %v6563_v20  ;;  %v1930_v63 = vmul.f32 %v5173_v37, %v7558_v45  ;;  %v1931_v11 = vmul.f32 %v5173_v37, %v7559_v17  ;;  %v1932_v42 = vmul.f32 %v5173_v37, %v7560_v27  ;;  %v1933_v57 = vmul.f32 %v5173_v37, %v7561_v31  ;;  %v7575_v45 = vld [vmem:[#allocation20_spill] sm:$0xff]  ;;  %v7577_v31 = vld [vmem:[#allocation23_spill] sm:$0xff] }
 0x580   :  { %v1934_v58 = vmul.f32 %v5173_v37, %v7562_v59  ;;  %v1935_v55 = vmul.f32 %v5173_v37, %v7563_v28  ;;  %v1936_v2 = vmul.f32 %v5173_v37, %v7564_v53  ;;  %v1937_v15 = vmul.f32 %v5173_v37, %v7566_v9  ;;  %v7579_v53 = vld [vmem:[#allocation26_spill] sm:$0xff] }
 0x581   :  { %v7568_v24 = vsub.f32 %v7567_v39, %v6377_v46  ;;  %v7570_v25 = vsub.f32 %v7569_v54, %v6377_v46  ;;  %v7572_v43 = vsub.f32 %v7571_v4, %v6377_v46  ;;  %v7574_v16 = vsub.f32 %v7573_v61, %v6377_v46  ;;  %v7581_v39 = vld [vmem:[#allocation22_spill] sm:$0xff]  ;;  %v7585_v61 = vld [vmem:[#allocation29_spill] sm:$0xff] }
 0x582   :  { %v7576_v17 = vsub.f32 %v7575_v45, %v6377_v46  ;;  %v7578_v59 = vsub.f32 %v7577_v31, %v6377_v46  ;;  %v7580_v0 = vsub.f32 %v7579_v53, %v6377_v46  ;;  %v7589_v53 = vld [vmem:[#allocation28_spill] sm:$0xff]  ;;  %v2441_v20 = vadd.f32 %v6472_v19, %v1923_v10 }
 0x583   :  { %v1938_v35 = vmul.f32 %v5173_v37, %v7568_v24  ;;  %v1939_v34 = vmul.f32 %v5173_v37, %v7570_v25  ;;  %v1940_v14 = vmul.f32 %v5173_v37, %v7572_v43  ;;  %v1941_v41 = vmul.f32 %v5173_v37, %v7574_v16  ;;  %v7583_v25 = vld [vmem:[#allocation24_spill] sm:$0xff] }
 0x584   :  { %v1942_v27 = vmul.f32 %v5173_v37, %v7576_v17  ;;  %v1943_v28 = vmul.f32 %v5173_v37, %v7578_v59  ;;  %v1944_v9 = vmul.f32 %v5173_v37, %v7580_v0  ;;  %v7582_v24 = vsub.f32 %v7581_v39, %v6377_v46  ;;  %v7587_v17 = vld [vmem:[#allocation33_spill] sm:$0xff]  ;;  %4101 = vst [vmem:[#allocation11] sm:$0xff] %v2441_v20 }
 0x585   :  { %v7584_v4 = vsub.f32 %v7583_v25, %v6377_v46  ;;  %v7586_v16 = vsub.f32 %v7585_v61, %v6377_v46  ;;  %v7588_v31 = vsub.f32 %v7587_v17, %v6377_v46  ;;  %v7590_v0 = vsub.f32 %v7589_v53, %v6377_v46 }
 0x586   :  { %v1945_v54 = vmul.f32 %v5173_v37, %v7582_v24  ;;  %v7592_v24 = vld [vmem:[#allocation31_spill] sm:$0xff]  ;;  %v7596_v61 = vsub.f32 %v7595_v23, %v6377_v46  ;;  %v7599_v17 = vsub.f32 %v7598_v60, %v6377_v46  ;;  %v7602_v53 = vsub.f32 %v7601_v22, %v6377_v46  ;;  %v7607_v60 = vld [vmem:[#allocation25_spill] sm:$0xff] }
 0x587   :  { %v6637_v43 = vmul.f32 %v5173_v37, %v7584_v4  ;;  %v6642_v45 = vmul.f32 %v5173_v37, %v7586_v16  ;;  %v6647_v59 = vmul.f32 %v5173_v37, %v7588_v31  ;;  %v6652_v39 = vmul.f32 %v5173_v37, %v7590_v0 }
 0x588   :  { %v7593_v25 = vsub.f32 %v7592_v24, %v6377_v46  ;;  %v6662_v16 = vmul.f32 %v5173_v37, %v7596_v61  ;;  %v6667_v31 = vmul.f32 %v5173_v37, %v7599_v17  ;;  %v6672_v0 = vmul.f32 %v5173_v37, %v7602_v53  ;;  %v7603_v24 = vld [vmem:[#allocation45_spill] sm:$0xff]  ;;  %v5018_v53 = vld [vmem:[#allocation8 + $0x1a0] sm:$0xff]  }
 0x589   :  { %7591 = vst [vmem:[#allocation16_spill] sm:$0xff] %v6652_v39  ;;  %v2443_v49 = vadd.f32 %v7604_v1, %v1925_v32  ;;  %v2445_v61 = vadd.f32 %v6478_v8, %v1927_v51  ;;  %v6681_v17 = vadd.f32 %v7607_v60, %v1929_v26  ;;  %v6690_v1 = vadd.f32 %v6493_v48, %v1932_v42 }
 0x58a   :  { %v6657_v4 = vmul.f32 %v5173_v37, %v7593_v25  ;;  %7597 = vst [vmem:[#allocation19_spill] sm:$0xff] %v6662_v16  ;;  %7600 = vst [vmem:[#allocation21_spill] sm:$0xff] %v6667_v31  ;;  %v2442_v25 = vadd.f32 %v7603_v24, %v1924_v52  ;;  %v7606_v16 = vld [vmem:[#allocation46_spill] sm:$0xff]  ;;  %v7608_v31 = vld [vmem:[#allocation27_spill] sm:$0xff]  ;;  %v6687_v37 = vadd.f32 %v6490_v6, %v1931_v11 }
 0x58b   :  { %v2446_v3 = vadd.f32 %v7606_v16, %v1928_v21  ;;  %v6684_v39 = vadd.f32 %v7608_v31, %v1930_v63  ;;  %4103 = vst [vmem:[#allocation11 + $0x20] sm:$0xff] %v2443_v49  ;;  %4105 = vst [vmem:[#allocation11 + $0x40] sm:$0xff] %v2445_v61  ;;  %v2453_v6 = vadd.f32 %v6502_v29, %v1935_v55  ;;  %v5016_v16 = vld [vmem:[#allocation8 + $0x190] sm:$0xff]   ;;  %v5017_v31 = vld [vmem:[#allocation8 + $0x198] sm:$0xff]  }
 0x58c   :  { %7594 = vst [vmem:[#allocation17_spill] sm:$0xff] %v6657_v4  ;;  %v7605_v4 = vld [vmem:[#allocation44_spill] sm:$0xff]  ;;  %v2489_v46 = vpack.c.bf16 %v2442_v25, %v2441_v20  ;;  %4102 = vst [vmem:[#allocation11 + $0x10] sm:$0xff] %v2442_v25  ;;  %v2493_v48 = vpack.c.bf16 %v6690_v1, %v6687_v37  ;;  %v2455_v52 = vadd.f32 %v6508_v47, %v1937_v15  ;;  %v7615_v15 = vld [vmem:[#allocation34_spill] sm:$0xff] }
 0x58d   :  { %v2444_v23 = vadd.f32 %v7605_v4, %v1926_v13  ;;  %v2491_v8 = vpack.c.bf16 %v2446_v3, %v2445_v61  ;;  %4106 = vst [vmem:[#allocation11 + $0x50] sm:$0xff] %v2446_v3  ;;  %v2492_v22 = vpack.c.bf16 %v6684_v39, %v6681_v17  ;;  %4107 = vst [vmem:[#allocation11 + $0x60] sm:$0xff] %v6681_v17  ;;  %v7609_v20 = vld [vmem:[#allocation32_spill] sm:$0xff]  ;;  %v5015_v4 = vld [vmem:[#allocation8 + $0x188] sm:$0xff]  }
 0x58e   :  { %4108 = vst [vmem:[#allocation11 + $0x70] sm:$0xff] %v6684_v39  ;;  %v6697_v10 = vadd.f32 %v7609_v20, %v1933_v57  ;;  %4762 = vmatprep.mubr.bf16.mxu1 %v2489_v46  ;;  %4109 = vst [vmem:[#allocation11 + $0x80] sm:$0xff] %v6687_v37  ;;  %v2454_v3 = vadd.f32 %v6505_v18, %v1936_v2  ;;  %v2457_v13 = vadd.f32 %v6514_v33, %v1939_v34  ;;  %v5014_v39 = vld [vmem:[#allocation8 + $0x180] sm:$0xff]   ;;  %v5020_v24 = vld [vmem:[#allocation8 + $0x1b0] sm:$0xff]  }
 0x58f   :  { %v2490_v19 = vpack.c.bf16 %v2444_v23, %v2443_v49  ;;  %4104 = vst [vmem:[#allocation11 + $0x30] sm:$0xff] %v2444_v23  ;;  %v2452_v49 = vadd.f32 %v6499_v7, %v1934_v58  ;;  %4110 = vst [vmem:[#allocation11 + $0x90] sm:$0xff] %v6690_v1  ;;  %v2456_v7 = vadd.f32 %v6511_v30, %v1938_v35  ;;  %v7613_v58 = vld [vmem:[#allocation30_spill] sm:$0xff]  ;;  %4794 = vmatprep.subr.bf16.mxu0 %v5014_v39  ;;  %v5021_v25 = vld [vmem:[#allocation8 + $0x1b8] sm:$0xff]  }
 0x590   :  { %4111 = vst [vmem:[#allocation11 + $0xa0] sm:$0xff] %v6697_v10  ;;  %v2458_v51 = vadd.f32 %v6517_v50, %v1940_v14  ;;  %v2495_v21 = vpack.c.bf16 %v2454_v3, %v2453_v6  ;;  %4113 = vst [vmem:[#allocation11 + $0xc0] sm:$0xff] %v2453_v6  ;;  %v2459_v18 = vadd.f32 %v6520_v40, %v1941_v41  ;;  %v7610_v42 = vld [vmem:[#allocation16_spill] sm:$0xff]  ;;  %4795 = vmatpush3.bf16.msra.mxu0 %v5014_v39 }
 0x591   :  { %4763 = vmatmul.mubr.bf16.vlgmr.msra.gmra.mrb[80].mxu1 %v2490_v19  ;;  %v2494_v32 = vpack.c.bf16 %v2452_v49, %v6697_v10  ;;  %4112 = vst [vmem:[#allocation11 + $0xb0] sm:$0xff] %v2452_v49  ;;  %4114 = vst [vmem:[#allocation11 + $0xd0] sm:$0xff] %v2454_v3  ;;  %v2460_v29 = vadd.f32 %v6523_v62, %v1942_v27  ;;  %v2461_v47 = vadd.f32 %v6526_v5, %v1943_v28  ;;  %v7614_v2 = vld [vmem:[#allocation19_spill] sm:$0xff]  ;;  %v7617_v14 = vld [vmem:[#allocation40_spill] sm:$0xff] }
 0x592   :  { %4766 = vmatprep.mubr.bf16.mxu1 %v2491_v8  ;;  %4115 = vst [vmem:[#allocation11 + $0xe0] sm:$0xff] %v2455_v52  ;;  %v2496_v26 = vpack.c.bf16 %v2456_v7, %v2455_v52  ;;  %4116 = vst [vmem:[#allocation11 + $0xf0] sm:$0xff] %v2456_v7  ;;  %v2497_v63 = vpack.c.bf16 %v2458_v51, %v2457_v13  ;;  %v2462_v30 = vadd.f32 %v6529_v44, %v1944_v9  ;;  %v7611_v44 = vld [vmem:[#allocation35_spill] sm:$0xff]  ;;  %v7618_v41 = vld [vmem:[#allocation21_spill] sm:$0xff] }
 0x593   :  { %4117 = vst [vmem:[#allocation11 + $0x100] sm:$0xff] %v2457_v13  ;;  %4118 = vst [vmem:[#allocation11 + $0x110] sm:$0xff] %v2458_v51  ;;  %v2463_v33 = vadd.f32 %v6532_v36, %v1945_v54  ;;  %v2498_v50 = vpack.c.bf16 %v2460_v29, %v2459_v18  ;;  %v2464_v40 = vadd.f32 %v6535_v56, %v6637_v43  ;;  %v7612_v36 = vld [vmem:[#allocation17_spill] sm:$0xff]  ;;  %v7619_v27 = vld [vmem:[#allocation42_spill] sm:$0xff]  ;;  %4796 = vmatprep.subr.bf16.mxu0 %v5015_v4 }
 0x594   :  { %4119 = vst [vmem:[#allocation11 + $0x120] sm:$0xff] %v2459_v18  ;;  %4120 = vst [vmem:[#allocation11 + $0x130] sm:$0xff] %v2460_v29  ;;  %v2465_v62 = vadd.f32 %v6538_v38, %v6642_v45  ;;  %v2466_v5 = vadd.f32 %v6541_v12, %v6647_v59  ;;  %v2499_v11 = vpack.c.bf16 %v2462_v30, %v2461_v47  ;;  %v7616_v38 = vld [vmem:[#allocation41_spill] sm:$0xff]  ;;  %v7620_v54 = vld [vmem:[#allocation38_spill] sm:$0xff]  ;;  %4797 = vmatpush3.bf16.msra.mxu0 %v5015_v4 }
 0x595   :  { %4121 = vst [vmem:[#allocation11 + $0x140] sm:$0xff] %v2461_v47  ;;  %4122 = vst [vmem:[#allocation11 + $0x150] sm:$0xff] %v2462_v30  ;;  %v2467_v57 = vadd.f32 %v7611_v44, %v7610_v42  ;;  %v2468_v55 = vadd.f32 %v7613_v58, %v7612_v36  ;;  %v2469_v35 = vadd.f32 %v7615_v15, %v7614_v2  ;;  %4798 = vmatprep.subr.bf16.mxu0 %v5016_v16 }
 0x596   :  { %4123 = vst [vmem:[#allocation11 + $0x160] sm:$0xff] %v2463_v33  ;;  %v2500_v34 = vpack.c.bf16 %v2464_v40, %v2463_v33  ;;  %4124 = vst [vmem:[#allocation11 + $0x170] sm:$0xff] %v2464_v40  ;;  %v2501_v56 = vpack.c.bf16 %v2466_v5, %v2465_v62  ;;  %v2470_v12 = vadd.f32 %v7617_v14, %v7616_v38 }
 0x597   :  { %4125 = vst [vmem:[#allocation11 + $0x180] sm:$0xff] %v2465_v62  ;;  %4126 = vst [vmem:[#allocation11 + $0x190] sm:$0xff] %v2466_v5  ;;  %v2471_v28 = vadd.f32 %v7619_v27, %v7618_v41  ;;  %v2502_v9 = vpack.c.bf16 %v2468_v55, %v2467_v57  ;;  %v2472_v43 = vadd.f32 %v7620_v54, %v6672_v0  ;;  %v5019_v0 = vld [vmem:[#allocation8 + $0x1a8] sm:$0xff]  }
 0x598   :  { %4127 = vst [vmem:[#allocation11 + $0x1a0] sm:$0xff] %v2467_v57  ;;  %4128 = vst [vmem:[#allocation11 + $0x1b0] sm:$0xff] %v2468_v55  ;;  %v2503_v45 = vpack.c.bf16 %v2470_v12, %v2469_v35  ;;  %4799 = vmatpush3.bf16.msra.mxu0 %v5016_v16 }
 0x599   :  { %4129 = vst [vmem:[#allocation11 + $0x1c0] sm:$0xff] %v2469_v35  ;;  %4130 = vst [vmem:[#allocation11 + $0x1d0] sm:$0xff] %v2470_v12  ;;  %4767 = vmatmul.mubr.bf16.gmra.mrb[84].mxu1 %v2492_v22  ;;  %v2504_v59 = vpack.c.bf16 %v2472_v43, %v2471_v28  ;;  %4800 = vmatprep.subr.bf16.mxu0 %v5017_v31 }
 0x59a   :  { %4131 = vst [vmem:[#allocation11 + $0x1e0] sm:$0xff] %v2471_v28  ;;  %4132 = vst [vmem:[#allocation11 + $0x1f0] sm:$0xff] %v2472_v43  ;;  %4770 = vmatprep.mubr.bf16.mxu1 %v2493_v48 }
 0x59c   :  { %4801 = vmatpush3.bf16.msra.mxu0 %v5017_v31 }
 0x59d   :  { %4802 = vmatprep.subr.bf16.mxu0 %v5018_v53 }
 0x5a0   :  { %4803 = vmatpush3.bf16.msra.mxu0 %v5018_v53 }
 0x5a1   :  { %4771 = vmatmul.mubr.bf16.gmra.mrb[88].mxu1 %v2494_v32  ;;  %4804 = vmatprep.subr.bf16.mxu0 %v5019_v0 }
 0x5a2   :  { %4774 = vmatprep.mubr.bf16.mxu1 %v2495_v21 }
 0x5a4   :  { %4805 = vmatpush3.bf16.msra.mxu0 %v5019_v0 }
 0x5a5   :  { %4806 = vmatprep.subr.bf16.mxu0 %v5020_v24 }
 0x5a8   :  { %4807 = vmatpush3.bf16.msra.mxu0 %v5020_v24 }
 0x5a9   :  { %4775 = vmatmul.mubr.bf16.gmra.mrb[92].mxu1 %v2496_v26  ;;  %4808 = vmatprep.subr.bf16.mxu0 %v5021_v25 }
 0x5aa   :  { %4778 = vmatprep.mubr.bf16.mxu1 %v2497_v63 }
 0x5ac   :  { %4809 = vmatpush3.bf16.msra.mxu0 %v5021_v25 }
 0x5b1   :  { %4779 = vmatmul.mubr.bf16.gmra.mrb[96].mxu1 %v2498_v50 }
 0x5b2   :  { %4782 = vmatprep.mubr.bf16.mxu1 %v2499_v11 }
 0x5b9   :  { %4783 = vmatmul.mubr.bf16.gmra.mrb[100].mxu1 %v2500_v34 }
 0x5ba   :  { %4786 = vmatprep.mubr.bf16.mxu1 %v2501_v56 }
 0x5c1   :  { %4787 = vmatmul.mubr.bf16.gmra.mrb[104].mxu1 %v2502_v9 }
 0x5c2   :  { %4790 = vmatprep.mubr.bf16.mxu1 %v2503_v45 }
 0x5c9   :  { %4791 = vmatmul.mubr.bf16.gmra.mrb[108].mxu1 %v2504_v59 }
 0x664   :  { %v6735_v23 = vpop.f32.mrb[80].mxu1 }
 0x665   :  { %v6737_v61 = vpop.f32.mrb[81].mxu1  ;;  %v2754_v1 = vmul.f32 %v6735_v23, %v6735_v23 }
 0x666   :  { %v6739_v60 = vpop.f32.mrb[82].mxu1  ;;  %v2752_v46 = vmul.f32 %v6737_v61, %v6737_v61 }
 0x667   :  { %v6741_v17 = vpop.f32.mrb[83].mxu1  ;;  %v2755_v20 = vmul.f32 %v6739_v60, %v6739_v60 }
 0x668   :  { %v2714_v19 = vadd.f32 %v6741_v17, %v6737_v61  ;;  %v2753_v37 = vmul.f32 %v6741_v17, %v6741_v17 }
 0x66a   :  { %v2715_v8 = vadd.f32 %v6735_v23, %v2714_v19  ;;  %v2784_v22 = vadd.f32 %v2753_v37, %v2752_v46 }
 0x66c   :  { %v2785_v10 = vadd.f32 %v2784_v22, %v2754_v1  ;;  %v6754_v49 = vpop.f32.mrb[84].mxu1  ;;  %v2716_v48 = vadd.f32 %v6739_v60, %v2715_v8 }
 0x66d   :  { %v6757_v6 = vpop.f32.mrb[85].mxu1  ;;  %v2758_v29 = vmul.f32 %v6754_v49, %v6754_v49 }
 0x66e   :  { %v2717_v3 = vadd.f32 %v2716_v48, %v6757_v6  ;;  %v2756_v52 = vmul.f32 %v6757_v6, %v6757_v6  ;;  %v2786_v32 = vadd.f32 %v2785_v10, %v2755_v20  ;;  %v6762_v7 = vpop.f32.mrb[86].mxu1 }
 0x66f   :  { %v6764_v13 = vpop.f32.mrb[87].mxu1  ;;  %v2759_v63 = vmul.f32 %v6762_v7, %v6762_v7 }
 0x670   :  { %v2787_v51 = vadd.f32 %v2786_v32, %v2756_v52  ;;  %v2718_v21 = vadd.f32 %v2717_v3, %v6764_v13  ;;  %v2757_v18 = vmul.f32 %v6764_v13, %v6764_v13 }
 0x672   :  { %v2719_v47 = vadd.f32 %v6754_v49, %v2718_v21  ;;  %v2788_v26 = vadd.f32 %v2787_v51, %v2757_v18 }
 0x674   :  { %v2789_v30 = vadd.f32 %v2788_v26, %v2758_v29  ;;  %v6774_v33 = vpop.f32.mrb[88].mxu1  ;;  %v2720_v50 = vadd.f32 %v6762_v7, %v2719_v47 }
 0x675   :  { %v6777_v40 = vpop.f32.mrb[89].mxu1  ;;  %v2762_v55 = vmul.f32 %v6774_v33, %v6774_v33 }
 0x676   :  { %v2721_v62 = vadd.f32 %v2720_v50, %v6777_v40  ;;  %v2760_v5 = vmul.f32 %v6777_v40, %v6777_v40  ;;  %v2790_v11 = vadd.f32 %v2789_v30, %v2759_v63  ;;  %v6782_v42 = vpop.f32.mrb[90].mxu1 }
 0x677   :  { %v6784_v44 = vpop.f32.mrb[91].mxu1  ;;  %v2763_v35 = vmul.f32 %v6782_v42, %v6782_v42 }
 0x678   :  { %v2791_v57 = vadd.f32 %v2790_v11, %v2760_v5  ;;  %v2722_v36 = vadd.f32 %v2721_v62, %v6784_v44  ;;  %v2761_v58 = vmul.f32 %v6784_v44, %v6784_v44 }
 0x67a   :  { %v2723_v2 = vadd.f32 %v6774_v33, %v2722_v36  ;;  %v2792_v15 = vadd.f32 %v2791_v57, %v2761_v58 }
 0x67c   :  { %v2793_v34 = vadd.f32 %v2792_v15, %v2762_v55  ;;  %v6794_v56 = vpop.f32.mrb[92].mxu1  ;;  %v2724_v38 = vadd.f32 %v6782_v42, %v2723_v2 }
 0x67d   :  { %v6797_v14 = vpop.f32.mrb[93].mxu1  ;;  %v2766_v59 = vmul.f32 %v6794_v56, %v6794_v56 }
 0x67e   :  { %v2725_v12 = vadd.f32 %v2724_v38, %v6797_v14  ;;  %v2764_v41 = vmul.f32 %v6797_v14, %v6797_v14  ;;  %v2794_v27 = vadd.f32 %v2793_v34, %v2763_v35  ;;  %v6802_v28 = vpop.f32.mrb[94].mxu1 }
 0x67f   :  { %v6804_v9 = vpop.f32.mrb[95].mxu1  ;;  %v2767_v16 = vmul.f32 %v6802_v28, %v6802_v28 }
 0x680   :  { %v2795_v54 = vadd.f32 %v2794_v27, %v2764_v41  ;;  %v2726_v43 = vadd.f32 %v2725_v12, %v6804_v9  ;;  %v2765_v45 = vmul.f32 %v6804_v9, %v6804_v9 }
 0x682   :  { %v2727_v39 = vadd.f32 %v6794_v56, %v2726_v43  ;;  %v2796_v4 = vadd.f32 %v2795_v54, %v2765_v45 }
 0x684   :  { %v2797_v31 = vadd.f32 %v2796_v4, %v2766_v59  ;;  %v6814_v53 = vpop.f32.mrb[96].mxu1  ;;  %v2728_v0 = vadd.f32 %v6802_v28, %v2727_v39 }
 0x685   :  { %v6817_v24 = vpop.f32.mrb[97].mxu1  ;;  %v2770_v10 = vmul.f32 %v6814_v53, %v6814_v53 }
 0x686   :  { %v2729_v25 = vadd.f32 %v2728_v0, %v6817_v24  ;;  %v2768_v46 = vmul.f32 %v6817_v24, %v6817_v24  ;;  %v2798_v19 = vadd.f32 %v2797_v31, %v2767_v16  ;;  %v6822_v37 = vpop.f32.mrb[98].mxu1 }
 0x687   :  { %v6824_v1 = vpop.f32.mrb[99].mxu1  ;;  %v2771_v52 = vmul.f32 %v6822_v37, %v6822_v37 }
 0x688   :  { %v2799_v8 = vadd.f32 %v2798_v19, %v2768_v46  ;;  %v2730_v22 = vadd.f32 %v2729_v25, %v6824_v1  ;;  %v2769_v20 = vmul.f32 %v6824_v1, %v6824_v1 }
 0x68a   :  { %v2731_v48 = vadd.f32 %v6814_v53, %v2730_v22  ;;  %v2800_v3 = vadd.f32 %v2799_v8, %v2769_v20 }
 0x68c   :  { %v2801_v32 = vadd.f32 %v2800_v3, %v2770_v10  ;;  %v6834_v51 = vpop.f32.mrb[100].mxu1  ;;  %v2732_v21 = vadd.f32 %v6822_v37, %v2731_v48 }
 0x68d   :  { %v6837_v18 = vpop.f32.mrb[101].mxu1  ;;  %v2774_v11 = vmul.f32 %v6834_v51, %v6834_v51 }
 0x68e   :  { %v2733_v29 = vadd.f32 %v2732_v21, %v6837_v18  ;;  %v2772_v47 = vmul.f32 %v6837_v18, %v6837_v18  ;;  %v2802_v26 = vadd.f32 %v2801_v32, %v2771_v52  ;;  %v6842_v63 = vpop.f32.mrb[102].mxu1 }
 0x68f   :  { %v6844_v30 = vpop.f32.mrb[103].mxu1  ;;  %v2775_v58 = vmul.f32 %v6842_v63, %v6842_v63 }
 0x690   :  { %v2803_v50 = vadd.f32 %v2802_v26, %v2772_v47  ;;  %v2734_v62 = vadd.f32 %v2733_v29, %v6844_v30  ;;  %v2773_v5 = vmul.f32 %v6844_v30, %v6844_v30 }
 0x692   :  { %v2735_v57 = vadd.f32 %v6834_v51, %v2734_v62  ;;  %v2804_v36 = vadd.f32 %v2803_v50, %v2773_v5 }
 0x694   :  { %v2805_v55 = vadd.f32 %v2804_v36, %v2774_v11  ;;  %v6854_v2 = vpop.f32.mrb[104].mxu1  ;;  %v2736_v15 = vadd.f32 %v6842_v63, %v2735_v57 }
 0x695   :  { %v6857_v35 = vpop.f32.mrb[105].mxu1  ;;  %v2778_v59 = vmul.f32 %v6854_v2, %v6854_v2 }
 0x696   :  { %v2737_v34 = vadd.f32 %v2736_v15, %v6857_v35  ;;  %v2776_v38 = vmul.f32 %v6857_v35, %v6857_v35  ;;  %v2806_v12 = vadd.f32 %v2805_v55, %v2775_v58  ;;  %v6862_v41 = vpop.f32.mrb[106].mxu1 }
 0x697   :  { %v6864_v27 = vpop.f32.mrb[107].mxu1  ;;  %v2779_v16 = vmul.f32 %v6862_v41, %v6862_v41 }
 0x698   :  { %v2807_v54 = vadd.f32 %v2806_v12, %v2776_v38  ;;  %v2738_v43 = vadd.f32 %v2737_v34, %v6864_v27  ;;  %v2777_v45 = vmul.f32 %v6864_v27, %v6864_v27 }
 0x69a   :  { %v2739_v39 = vadd.f32 %v6854_v2, %v2738_v43  ;;  %v2808_v4 = vadd.f32 %v2807_v54, %v2777_v45 }
 0x69c   :  { %v2809_v31 = vadd.f32 %v2808_v4, %v2778_v59  ;;  %v6874_v0 = vpop.f32.mrb[108].mxu1  ;;  %v2740_v25 = vadd.f32 %v6862_v41, %v2739_v39 }
 0x69d   :  { %v6877_v46 = vpop.f32.mrb[109].mxu1  ;;  %v2782_v32 = vmul.f32 %v6874_v0, %v6874_v0 }
 0x69e   :  { %v2741_v19 = vadd.f32 %v2740_v25, %v6877_v46  ;;  %v2780_v8 = vmul.f32 %v6877_v46, %v6877_v46  ;;  %v2810_v22 = vadd.f32 %v2809_v31, %v2779_v16  ;;  %v6882_v20 = vpop.f32.mrb[110].mxu1 }
 0x69f   :  { %v6884_v10 = vpop.f32.mrb[111].mxu1  ;;  %v2783_v47 = vmul.f32 %v6882_v20, %v6882_v20 }
 0x6a0   :  { %v2811_v48 = vadd.f32 %v2810_v22, %v2780_v8  ;;  %v2742_v3 = vadd.f32 %v2741_v19, %v6884_v10  ;;  %v2781_v52 = vmul.f32 %v6884_v10, %v6884_v10 }
 0x6a2   :  { %v2743_v21 = vadd.f32 %v6874_v0, %v2742_v3  ;;  %v2812_v29 = vadd.f32 %v2811_v48, %v2781_v52 }
 0x6a4   :  { %v2744_v26 = vadd.f32 %v6882_v20, %v2743_v21  ;;  %v2813_v50 = vadd.f32 %v2812_v29, %v2782_v32 }
 0x6a6   :  { %v2745_v62 = vrot.slane %v2744_v26, 4  ;;  %v2814_v5 = vadd.f32 %v2813_v50, %v2783_v47 }
 0x6a8   :  { %v2746_v11 = vadd.f32 %v2745_v62, %v2744_v26  ;;  %v2815_v57 = vrot.slane %v2814_v5, 4 }
 0x6aa   :  { %v2747_v36 = vrot.slane %v2746_v11, 2  ;;  %v2816_v58 = vadd.f32 %v2815_v57, %v2814_v5 }
 0x6ac   :  { %v2748_v55 = vadd.f32 %v2747_v36, %v2746_v11  ;;  %v2817_v15 = vrot.slane %v2816_v58, 2 }
 0x6ae   :  { %v2749_v34 = vrot.slane %v2748_v55, 1  ;;  %v2818_v38 = vadd.f32 %v2817_v15, %v2816_v58 }
 0x6b0   :  { %v2750_v12 = vadd.f32 %v2749_v34, %v2748_v55  ;;  %v2819_v54 = vrot.slane %v2818_v38, 1 }
 0x6b2   :  { %v6895_v43 = vmul.f32 0.00390625, %v2750_v12  ;;  %v2820_v45 = vadd.f32 %v2819_v54, %v2818_v38 }
 0x6b4   :  { %v2821_v59 = vmul.f32 0.00390625, %v2820_v45  ;;  %v2822_v39 = vmul.f32 %v6895_v43, %v6895_v43  ;;  %v2854_v4 = vsub.f32 %v6884_v10, %v6895_v43  ;;  %v2825_v16 = vsub.f32 %v6737_v61, %v6895_v43 }
 0x6b5   :  { %v2826_v31 = vsub.f32 %v6741_v17, %v6895_v43  ;;  %v2827_v25 = vsub.f32 %v6735_v23, %v6895_v43  ;;  %v2828_v19 = vsub.f32 %v6739_v60, %v6895_v43  ;;  %v2829_v8 = vsub.f32 %v6757_v6, %v6895_v43 }
 0x6b6   :  { %v2823_v22 = vsub.f32 %v2821_v59, %v2822_v39  ;;  %v2830_v48 = vsub.f32 %v6764_v13, %v6895_v43  ;;  %v2831_v10 = vsub.f32 %v6754_v49, %v6895_v43  ;;  %v2832_v61 = vsub.f32 %v6762_v7, %v6895_v43 }
 0x6b7   :  { %v2833_v17 = vsub.f32 %v6777_v40, %v6895_v43  ;;  %v2834_v23 = vsub.f32 %v6784_v44, %v6895_v43  ;;  %v2835_v60 = vsub.f32 %v6774_v33, %v6895_v43  ;;  %v2836_v6 = vsub.f32 %v6782_v42, %v6895_v43 }
 0x6b8   :  { %v2824_v3 = vmax.f32 %v2823_v22, 0.0  ;;  %v2837_v13 = vsub.f32 %v6797_v14, %v6895_v43  ;;  %v2838_v49 = vsub.f32 %v6804_v9, %v6895_v43  ;;  %v2839_v7 = vsub.f32 %v6794_v56, %v6895_v43 }
 0x6b9   :  { %v2840_v40 = vsub.f32 %v6802_v28, %v6895_v43  ;;  %v2841_v44 = vsub.f32 %v6817_v24, %v6895_v43  ;;  %v2842_v33 = vsub.f32 %v6824_v1, %v6895_v43  ;;  %v2843_v42 = vsub.f32 %v6814_v53, %v6895_v43 }
 0x6ba   :  { %v2857_v52 = vadd.f32 1e-10, %v2824_v3  ;;  %v2844_v14 = vsub.f32 %v6822_v37, %v6895_v43  ;;  %v2845_v9 = vsub.f32 %v6837_v18, %v6895_v43  ;;  %v2846_v56 = vsub.f32 %v6844_v30, %v6895_v43 }
 0x6bb   :  { %v2847_v28 = vsub.f32 %v6834_v51, %v6895_v43  ;;  %v2848_v24 = vsub.f32 %v6842_v63, %v6895_v43  ;;  %v2849_v1 = vsub.f32 %v6857_v35, %v6895_v43  ;;  %v2850_v53 = vsub.f32 %v6864_v27, %v6895_v43 }
 0x6bc   :  { %5174 = vrsqrt.f32 %v2857_v52  ;;  %v2851_v37 = vsub.f32 %v6854_v2, %v6895_v43  ;;  %v2852_v18 = vsub.f32 %v6862_v41, %v6895_v43  ;;  %v2853_v30 = vsub.f32 %v6877_v46, %v6895_v43 }
 0x6bd   :  { %v2855_v51 = vsub.f32 %v6874_v0, %v6895_v43  ;;  %v2856_v63 = vsub.f32 %v6882_v20, %v6895_v43 }
 0x6c6   :  { %v5175_v35 = vpop.eup %5174 }
 0x6c7   :  { %v6963_v32 = vmul.f32 %v5175_v35, %v2854_v4  ;;  %v2859_v27 = vmul.f32 %v5175_v35, %v2825_v16  ;;  %v2860_v21 = vmul.f32 %v5175_v35, %v2826_v31  ;;  %v2861_v29 = vmul.f32 %v5175_v35, %v2827_v25 }
 0x6c8   :  { %v2862_v47 = vmul.f32 %v5175_v35, %v2828_v19  ;;  %v2863_v2 = vmul.f32 %v5175_v35, %v2829_v8  ;;  %v2864_v26 = vmul.f32 %v5175_v35, %v2830_v48  ;;  %v2865_v50 = vmul.f32 %v5175_v35, %v2831_v10 }
 0x6c9   :  { %v2866_v41 = vmul.f32 %v5175_v35, %v2832_v61  ;;  %v2867_v62 = vmul.f32 %v5175_v35, %v2833_v17  ;;  %v2868_v5 = vmul.f32 %v5175_v35, %v2834_v23  ;;  %v2869_v46 = vmul.f32 %v5175_v35, %v2835_v60 }
 0x6ca   :  { %v2870_v11 = vmul.f32 %v5175_v35, %v2836_v6  ;;  %v2871_v57 = vmul.f32 %v5175_v35, %v2837_v13  ;;  %v2872_v0 = vmul.f32 %v5175_v35, %v2838_v49  ;;  %v2873_v36 = vmul.f32 %v5175_v35, %v2839_v7 }
 0x6cb   :  { %v2874_v58 = vmul.f32 %v5175_v35, %v2840_v40  ;;  %v2875_v20 = vmul.f32 %v5175_v35, %v2841_v44  ;;  %v2876_v55 = vmul.f32 %v5175_v35, %v2842_v33  ;;  %v2877_v15 = vmul.f32 %v5175_v35, %v2843_v42 }
 0x6cc   :  { %v2878_v34 = vmul.f32 %v5175_v35, %v2844_v14  ;;  %v2879_v38 = vmul.f32 %v5175_v35, %v2845_v9  ;;  %v2880_v12 = vmul.f32 %v5175_v35, %v2846_v56  ;;  %v2881_v54 = vmul.f32 %v5175_v35, %v2847_v28 }
 0x6cd   :  { %v2882_v43 = vmul.f32 %v5175_v35, %v2848_v24  ;;  %v2883_v45 = vmul.f32 %v5175_v35, %v2849_v1  ;;  %v2884_v59 = vmul.f32 %v5175_v35, %v2850_v53  ;;  %v2885_v39 = vmul.f32 %v5175_v35, %v2851_v37 }
 0x6ce   :  { %v2886_v4 = vmul.f32 %v5175_v35, %v2852_v18  ;;  %v2887_v16 = vmul.f32 %v5175_v35, %v2853_v30  ;;  %v2889_v31 = vmul.f32 %v5175_v35, %v2855_v51  ;;  %v2890_v25 = vmul.f32 %v5175_v35, %v2856_v63 }
 0x6cf   :  { %v2893_v19 = vmax.f32 %v2861_v29, 0.0  ;;  %v2894_v8 = vmax.f32 %v2862_v47, 0.0  ;;  %v2891_v22 = vmax.f32 %v2859_v27, 0.0  ;;  %v2892_v48 = vmax.f32 %v2860_v21, 0.0 }
 0x6d0   :  { %v2895_v10 = vmax.f32 %v2863_v2, 0.0  ;;  %v2896_v61 = vmax.f32 %v2864_v26, 0.0  ;;  %v2897_v17 = vmax.f32 %v2865_v50, 0.0  ;;  %v2898_v23 = vmax.f32 %v2866_v41, 0.0 }
 0x6d1   :  { %v2940_v60 = vpack.c.bf16 %v2894_v8, %v2893_v19  ;;  %v2939_v6 = vpack.c.bf16 %v2892_v48, %v2891_v22  ;;  %v2899_v3 = vmax.f32 %v2867_v62, 0.0  ;;  %v2900_v13 = vmax.f32 %v2868_v5, 0.0 }
 0x6d2   :  { %v2941_v49 = vpack.c.bf16 %v2896_v61, %v2895_v10  ;;  %v2942_v7 = vpack.c.bf16 %v2898_v23, %v2897_v17  ;;  %v2901_v40 = vmax.f32 %v2869_v46, 0.0  ;;  %v2902_v44 = vmax.f32 %v2870_v11, 0.0 }
 0x6d3   :  { %4810 = vmatprep.mubr.bf16.mxu0 %v2939_v6  ;;  %v2943_v33 = vpack.c.bf16 %v2900_v13, %v2899_v3  ;;  %v2903_v42 = vmax.f32 %v2871_v57, 0.0  ;;  %v2904_v52 = vmax.f32 %v2872_v0, 0.0  ;;  %v2905_v14 = vmax.f32 %v2873_v36, 0.0 }
 0x6d4   :  { %4811 = vmatmul.mubr.bf16.vlgmr.msra.gmra.mrb[80].mxu0 %v2940_v60  ;;  %v2944_v9 = vpack.c.bf16 %v2902_v44, %v2901_v40  ;;  %v2906_v56 = vmax.f32 %v2874_v58, 0.0  ;;  %v2907_v28 = vmax.f32 %v2875_v20, 0.0  ;;  %v2908_v24 = vmax.f32 %v2876_v55, 0.0  ;;  %v5022_v20 = vld [vmem:[#allocation8 + $0x1c0] sm:$0xff]   ;;  %v5024_v55 = vld [vmem:[#allocation8 + $0x1d0] sm:$0xff]  }
 0x6d5   :  { %4814 = vmatprep.mubr.bf16.mxu0 %v2941_v49  ;;  %v2945_v1 = vpack.c.bf16 %v2904_v52, %v2903_v42  ;;  %v2909_v53 = vmax.f32 %v2877_v15, 0.0  ;;  %v2910_v37 = vmax.f32 %v2878_v34, 0.0  ;;  %v2911_v18 = vmax.f32 %v2879_v38, 0.0  ;;  %4842 = vmatprep.subr.bf16.mxu1 %v5022_v20  ;;  %v5025_v15 = vld [vmem:[#allocation8 + $0x1d8] sm:$0xff]   ;;  %v5026_v34 = vld [vmem:[#allocation8 + $0x1e0] sm:$0xff]   ;;  %v5027_v38 = vld [vmem:[#allocation8 + $0x1e8] sm:$0xff]  }
 0x6d6   :  { %v2946_v30 = vpack.c.bf16 %v2906_v56, %v2905_v14  ;;  %v2947_v51 = vpack.c.bf16 %v2908_v24, %v2907_v28  ;;  %v2912_v63 = vmax.f32 %v2880_v12, 0.0  ;;  %v2913_v35 = vmax.f32 %v2881_v54, 0.0  ;;  %4843 = vmatpush3.bf16.msra.mxu1 %v5022_v20  ;;  %v5028_v12 = vld [vmem:[#allocation8 + $0x1f0] sm:$0xff]   ;;  %v5029_v54 = vld [vmem:[#allocation8 + $0x1f8] sm:$0xff]  }
 0x6d7   :  { %v2948_v27 = vpack.c.bf16 %v2910_v37, %v2909_v53  ;;  %v2914_v21 = vmax.f32 %v2882_v43, 0.0  ;;  %v2915_v29 = vmax.f32 %v2883_v45, 0.0  ;;  %v2916_v47 = vmax.f32 %v2884_v59, 0.0 }
 0x6d8   :  { %v2949_v2 = vpack.c.bf16 %v2912_v63, %v2911_v18  ;;  %v2917_v26 = vmax.f32 %v2885_v39, 0.0  ;;  %v2918_v50 = vmax.f32 %v2886_v4, 0.0  ;;  %v2919_v41 = vmax.f32 %v2887_v16, 0.0 }
 0x6d9   :  { %v2950_v62 = vpack.c.bf16 %v2914_v21, %v2913_v35  ;;  %v2951_v5 = vpack.c.bf16 %v2916_v47, %v2915_v29  ;;  %v2920_v46 = vmax.f32 %v6963_v32, 0.0  ;;  %v2921_v11 = vmax.f32 %v2889_v31, 0.0  ;;  %v5023_v32 = vld [vmem:[#allocation8 + $0x1c8] sm:$0xff]  }
 0x6da   :  { %v2952_v57 = vpack.c.bf16 %v2918_v50, %v2917_v26  ;;  %v2922_v0 = vmax.f32 %v2890_v25, 0.0  ;;  %4844 = vmatprep.subr.bf16.mxu1 %v5023_v32 }
 0x6db   :  { %v2953_v36 = vpack.c.bf16 %v2920_v46, %v2919_v41  ;;  %4845 = vmatpush3.bf16.msra.mxu1 %v5023_v32 }
 0x6dc   :  { %4815 = vmatmul.mubr.bf16.gmra.mrb[84].mxu0 %v2942_v7  ;;  %v2954_v58 = vpack.c.bf16 %v2922_v0, %v2921_v11  ;;  %4846 = vmatprep.subr.bf16.mxu1 %v5024_v55 }
 0x6dd   :  { %4818 = vmatprep.mubr.bf16.mxu0 %v2943_v33 }
 0x6df   :  { %4847 = vmatpush3.bf16.msra.mxu1 %v5024_v55 }
 0x6e0   :  { %4848 = vmatprep.subr.bf16.mxu1 %v5025_v15 }
 0x6e3   :  { %4849 = vmatpush3.bf16.msra.mxu1 %v5025_v15 }
 0x6e4   :  { %4819 = vmatmul.mubr.bf16.gmra.mrb[88].mxu0 %v2944_v9  ;;  %4850 = vmatprep.subr.bf16.mxu1 %v5026_v34 }
 0x6e5   :  { %4822 = vmatprep.mubr.bf16.mxu0 %v2945_v1 }
 0x6e7   :  { %4851 = vmatpush3.bf16.msra.mxu1 %v5026_v34 }
 0x6e8   :  { %4852 = vmatprep.subr.bf16.mxu1 %v5027_v38 }
 0x6eb   :  { %4853 = vmatpush3.bf16.msra.mxu1 %v5027_v38 }
 0x6ec   :  { %4823 = vmatmul.mubr.bf16.gmra.mrb[92].mxu0 %v2946_v30  ;;  %4854 = vmatprep.subr.bf16.mxu1 %v5028_v12 }
 0x6ed   :  { %4826 = vmatprep.mubr.bf16.mxu0 %v2947_v51 }
 0x6ef   :  { %4855 = vmatpush3.bf16.msra.mxu1 %v5028_v12 }
 0x6f0   :  { %4856 = vmatprep.subr.bf16.mxu1 %v5029_v54 }
 0x6f3   :  { %4857 = vmatpush3.bf16.msra.mxu1 %v5029_v54 }
 0x6f4   :  { %4827 = vmatmul.mubr.bf16.gmra.mrb[96].mxu0 %v2948_v27 }
 0x6f5   :  { %4830 = vmatprep.mubr.bf16.mxu0 %v2949_v2 }
 0x6fc   :  { %4831 = vmatmul.mubr.bf16.gmra.mrb[100].mxu0 %v2950_v62 }
 0x6fd   :  { %4834 = vmatprep.mubr.bf16.mxu0 %v2951_v5 }
 0x704   :  { %4835 = vmatmul.mubr.bf16.gmra.mrb[104].mxu0 %v2952_v57 }
 0x705   :  { %4838 = vmatprep.mubr.bf16.mxu0 %v2953_v36 }
 0x70c   :  { %4839 = vmatmul.mubr.bf16.gmra.mrb[108].mxu0 %v2954_v58 }
 0x7a7   :  { %v6966_v43 = vpop.f32.mrb[80].mxu0 }
 0x7a8   :  { %v6968_v45 = vpop.f32.mrb[81].mxu0  ;;  %v3204_v25 = vmul.f32 %v6966_v43, %v6966_v43 }
 0x7a9   :  { %v6970_v59 = vpop.f32.mrb[82].mxu0  ;;  %v3202_v4 = vmul.f32 %v6968_v45, %v6968_v45 }
 0x7aa   :  { %v6972_v39 = vpop.f32.mrb[83].mxu0  ;;  %v3205_v22 = vmul.f32 %v6970_v59, %v6970_v59 }
 0x7ab   :  { %v3164_v16 = vadd.f32 %v6972_v39, %v6968_v45  ;;  %v3203_v31 = vmul.f32 %v6972_v39, %v6972_v39 }
 0x7ad   :  { %v3165_v19 = vadd.f32 %v6966_v43, %v3164_v16  ;;  %v3234_v8 = vadd.f32 %v3203_v31, %v3202_v4 }
 0x7af   :  { %v3235_v48 = vadd.f32 %v3234_v8, %v3204_v25  ;;  %v6985_v10 = vpop.f32.mrb[84].mxu0  ;;  %v3166_v61 = vadd.f32 %v6970_v59, %v3165_v19 }
 0x7b0   :  { %v6988_v17 = vpop.f32.mrb[85].mxu0  ;;  %v3208_v44 = vmul.f32 %v6985_v10, %v6985_v10 }
 0x7b1   :  { %v3167_v23 = vadd.f32 %v3166_v61, %v6988_v17  ;;  %v3206_v60 = vmul.f32 %v6988_v17, %v6988_v17  ;;  %v3236_v6 = vadd.f32 %v3235_v48, %v3205_v22  ;;  %v6993_v3 = vpop.f32.mrb[86].mxu0 }
 0x7b2   :  { %v6995_v13 = vpop.f32.mrb[87].mxu0  ;;  %v3209_v52 = vmul.f32 %v6993_v3, %v6993_v3 }
 0x7b3   :  { %v3237_v49 = vadd.f32 %v3236_v6, %v3206_v60  ;;  %v3168_v7 = vadd.f32 %v3167_v23, %v6995_v13  ;;  %v3207_v40 = vmul.f32 %v6995_v13, %v6995_v13 }
 0x7b5   :  { %v3169_v33 = vadd.f32 %v6985_v10, %v3168_v7  ;;  %v3238_v42 = vadd.f32 %v3237_v49, %v3207_v40 }
 0x7b7   :  { %v3239_v14 = vadd.f32 %v3238_v42, %v3208_v44  ;;  %v7005_v9 = vpop.f32.mrb[88].mxu0  ;;  %v3170_v56 = vadd.f32 %v6993_v3, %v3169_v33 }
 0x7b8   :  { %v7008_v28 = vpop.f32.mrb[89].mxu0  ;;  %v3212_v35 = vmul.f32 %v7005_v9, %v7005_v9 }
 0x7b9   :  { %v3171_v24 = vadd.f32 %v3170_v56, %v7008_v28  ;;  %v3210_v1 = vmul.f32 %v7008_v28, %v7008_v28  ;;  %v3240_v53 = vadd.f32 %v3239_v14, %v3209_v52  ;;  %v7013_v37 = vpop.f32.mrb[90].mxu0 }
 0x7ba   :  { %v7015_v18 = vpop.f32.mrb[91].mxu0  ;;  %v3213_v29 = vmul.f32 %v7013_v37, %v7013_v37 }
 0x7bb   :  { %v3241_v30 = vadd.f32 %v3240_v53, %v3210_v1  ;;  %v3172_v51 = vadd.f32 %v3171_v24, %v7015_v18  ;;  %v3211_v63 = vmul.f32 %v7015_v18, %v7015_v18 }
 0x7bd   :  { %v3173_v27 = vadd.f32 %v7005_v9, %v3172_v51  ;;  %v3242_v21 = vadd.f32 %v3241_v30, %v3211_v63 }
 0x7bf   :  { %v3243_v47 = vadd.f32 %v3242_v21, %v3212_v35  ;;  %v7025_v2 = vpop.f32.mrb[92].mxu0  ;;  %v3174_v26 = vadd.f32 %v7013_v37, %v3173_v27 }
 0x7c0   :  { %v7028_v50 = vpop.f32.mrb[93].mxu0  ;;  %v3216_v58 = vmul.f32 %v7025_v2, %v7025_v2 }
 0x7c1   :  { %v3175_v41 = vadd.f32 %v3174_v26, %v7028_v50  ;;  %v3214_v62 = vmul.f32 %v7028_v50, %v7028_v50  ;;  %v3244_v5 = vadd.f32 %v3243_v47, %v3213_v29  ;;  %v7033_v46 = vpop.f32.mrb[94].mxu0 }
 0x7c2   :  { %v7035_v11 = vpop.f32.mrb[95].mxu0  ;;  %v3217_v55 = vmul.f32 %v7033_v46, %v7033_v46 }
 0x7c3   :  { %v3245_v57 = vadd.f32 %v3244_v5, %v3214_v62  ;;  %v3176_v0 = vadd.f32 %v3175_v41, %v7035_v11  ;;  %v3215_v36 = vmul.f32 %v7035_v11, %v7035_v11 }
 0x7c5   :  { %v3177_v20 = vadd.f32 %v7025_v2, %v3176_v0  ;;  %v3246_v32 = vadd.f32 %v3245_v57, %v3215_v36 }
 0x7c7   :  { %v3247_v15 = vadd.f32 %v3246_v32, %v3216_v58  ;;  %v7045_v34 = vpop.f32.mrb[96].mxu0  ;;  %v3178_v38 = vadd.f32 %v7033_v46, %v3177_v20 }
 0x7c8   :  { %v7048_v12 = vpop.f32.mrb[97].mxu0  ;;  %v3220_v48 = vmul.f32 %v7045_v34, %v7045_v34 }
 0x7c9   :  { %v3179_v54 = vadd.f32 %v3178_v38, %v7048_v12  ;;  %v3218_v4 = vmul.f32 %v7048_v12, %v7048_v12  ;;  %v3248_v16 = vadd.f32 %v3247_v15, %v3217_v55  ;;  %v7053_v31 = vpop.f32.mrb[98].mxu0 }
 0x7ca   :  { %v7055_v25 = vpop.f32.mrb[99].mxu0  ;;  %v3221_v60 = vmul.f32 %v7053_v31, %v7053_v31 }
 0x7cb   :  { %v3249_v19 = vadd.f32 %v3248_v16, %v3218_v4  ;;  %v3180_v8 = vadd.f32 %v3179_v54, %v7055_v25  ;;  %v3219_v22 = vmul.f32 %v7055_v25, %v7055_v25 }
 0x7cd   :  { %v3181_v61 = vadd.f32 %v7045_v34, %v3180_v8  ;;  %v3250_v23 = vadd.f32 %v3249_v19, %v3219_v22 }
 0x7cf   :  { %v3251_v6 = vadd.f32 %v3250_v23, %v3220_v48  ;;  %v7065_v49 = vpop.f32.mrb[100].mxu0  ;;  %v3182_v7 = vadd.f32 %v7053_v31, %v3181_v61 }
 0x7d0   :  { %v7068_v40 = vpop.f32.mrb[101].mxu0  ;;  %v3224_v53 = vmul.f32 %v7065_v49, %v7065_v49 }
 0x7d1   :  { %v3183_v44 = vadd.f32 %v3182_v7, %v7068_v40  ;;  %v3222_v33 = vmul.f32 %v7068_v40, %v7068_v40  ;;  %v3252_v42 = vadd.f32 %v3251_v6, %v3221_v60  ;;  %v7073_v52 = vpop.f32.mrb[102].mxu0 }
 0x7d2   :  { %v7075_v14 = vpop.f32.mrb[103].mxu0  ;;  %v3225_v63 = vmul.f32 %v7073_v52, %v7073_v52 }
 0x7d3   :  { %v3253_v56 = vadd.f32 %v3252_v42, %v3222_v33  ;;  %v3184_v24 = vadd.f32 %v3183_v44, %v7075_v14  ;;  %v3223_v1 = vmul.f32 %v7075_v14, %v7075_v14 }
 0x7d5   :  { %v3185_v30 = vadd.f32 %v7065_v49, %v3184_v24  ;;  %v3254_v51 = vadd.f32 %v3253_v56, %v3223_v1 }
 0x7d7   :  { %v3255_v35 = vadd.f32 %v3254_v51, %v3224_v53  ;;  %v7085_v27 = vpop.f32.mrb[104].mxu0  ;;  %v3186_v21 = vadd.f32 %v7073_v52, %v3185_v30 }
 0x7d8   :  { %v7088_v29 = vpop.f32.mrb[105].mxu0  ;;  %v3228_v58 = vmul.f32 %v7085_v27, %v7085_v27 }
 0x7d9   :  { %v3187_v47 = vadd.f32 %v3186_v21, %v7088_v29  ;;  %v3226_v26 = vmul.f32 %v7088_v29, %v7088_v29  ;;  %v3256_v41 = vadd.f32 %v3255_v35, %v3225_v63  ;;  %v7093_v62 = vpop.f32.mrb[106].mxu0 }
 0x7da   :  { %v7095_v5 = vpop.f32.mrb[107].mxu0  ;;  %v3229_v55 = vmul.f32 %v7093_v62, %v7093_v62 }
 0x7db   :  { %v3257_v57 = vadd.f32 %v3256_v41, %v3226_v26  ;;  %v3188_v0 = vadd.f32 %v3187_v47, %v7095_v5  ;;  %v3227_v36 = vmul.f32 %v7095_v5, %v7095_v5 }
 0x7dd   :  { %v3189_v20 = vadd.f32 %v7085_v27, %v3188_v0  ;;  %v3258_v32 = vadd.f32 %v3257_v57, %v3227_v36 }
 0x7df   :  { %v3259_v15 = vadd.f32 %v3258_v32, %v3228_v58  ;;  %v7105_v38 = vpop.f32.mrb[108].mxu0  ;;  %v3190_v54 = vadd.f32 %v7093_v62, %v3189_v20 }
 0x7e0   :  { %v7108_v4 = vpop.f32.mrb[109].mxu0  ;;  %v3232_v6 = vmul.f32 %v7105_v38, %v7105_v38 }
 0x7e1   :  { %v3191_v16 = vadd.f32 %v3190_v54, %v7108_v4  ;;  %v3230_v19 = vmul.f32 %v7108_v4, %v7108_v4  ;;  %v3260_v8 = vadd.f32 %v3259_v15, %v3229_v55  ;;  %v7113_v22 = vpop.f32.mrb[110].mxu0 }
 0x7e2   :  { %v7115_v48 = vpop.f32.mrb[111].mxu0  ;;  %v3233_v33 = vmul.f32 %v7113_v22, %v7113_v22 }
 0x7e3   :  { %v3261_v61 = vadd.f32 %v3260_v8, %v3230_v19  ;;  %v3192_v23 = vadd.f32 %v3191_v16, %v7115_v48  ;;  %v3231_v60 = vmul.f32 %v7115_v48, %v7115_v48 }
 0x7e5   :  { %v3193_v7 = vadd.f32 %v7105_v38, %v3192_v23  ;;  %v3262_v44 = vadd.f32 %v3261_v61, %v3231_v60 }
 0x7e7   :  { %v3194_v42 = vadd.f32 %v7113_v22, %v3193_v7  ;;  %v3263_v56 = vadd.f32 %v3262_v44, %v3232_v6 }
 0x7e9   :  { %v3195_v24 = vrot.slane %v3194_v42, 4  ;;  %v3264_v1 = vadd.f32 %v3263_v56, %v3233_v33 }
 0x7eb   :  { %v3196_v53 = vadd.f32 %v3195_v24, %v3194_v42  ;;  %v3265_v30 = vrot.slane %v3264_v1, 4 }
 0x7ed   :  { %v3197_v51 = vrot.slane %v3196_v53, 2  ;;  %v3266_v63 = vadd.f32 %v3265_v30, %v3264_v1 }
 0x7ef   :  { %v3198_v35 = vadd.f32 %v3197_v51, %v3196_v53  ;;  %v3267_v21 = vrot.slane %v3266_v63, 2 }
 0x7f1   :  { %v3199_v47 = vrot.slane %v3198_v35, 1  ;;  %v3268_v26 = vadd.f32 %v3267_v21, %v3266_v63 }
 0x7f3   :  { %v3200_v41 = vadd.f32 %v3199_v47, %v3198_v35  ;;  %v3269_v57 = vrot.slane %v3268_v26, 1 }
 0x7f5   :  { %v7126_v0 = vmul.f32 0.00390625, %v3200_v41  ;;  %v3270_v36 = vadd.f32 %v3269_v57, %v3268_v26 }
 0x7f7   :  { %v3271_v58 = vmul.f32 0.00390625, %v3270_v36  ;;  %v3272_v20 = vmul.f32 %v7126_v0, %v7126_v0  ;;  %v3304_v32 = vsub.f32 %v7115_v48, %v7126_v0  ;;  %v3275_v55 = vsub.f32 %v6968_v45, %v7126_v0 }
 0x7f8   :  { %v3276_v15 = vsub.f32 %v6972_v39, %v7126_v0  ;;  %v3277_v54 = vsub.f32 %v6966_v43, %v7126_v0  ;;  %v3278_v16 = vsub.f32 %v6970_v59, %v7126_v0  ;;  %v3279_v19 = vsub.f32 %v6988_v17, %v7126_v0 }
 0x7f9   :  { %v3273_v8 = vsub.f32 %v3271_v58, %v3272_v20  ;;  %v3280_v61 = vsub.f32 %v6995_v13, %v7126_v0  ;;  %v3281_v48 = vsub.f32 %v6985_v10, %v7126_v0  ;;  %v3282_v45 = vsub.f32 %v6993_v3, %v7126_v0 }
 0x7fa   :  { %v3283_v39 = vsub.f32 %v7008_v28, %v7126_v0  ;;  %v3284_v43 = vsub.f32 %v7015_v18, %v7126_v0  ;;  %v3285_v59 = vsub.f32 %v7005_v9, %v7126_v0  ;;  %v3286_v17 = vsub.f32 %v7013_v37, %v7126_v0 }
 0x7fb   :  { %v3274_v23 = vmax.f32 %v3273_v8, 0.0  ;;  %v3287_v13 = vsub.f32 %v7028_v50, %v7126_v0  ;;  %v3288_v10 = vsub.f32 %v7035_v11, %v7126_v0  ;;  %v3289_v3 = vsub.f32 %v7025_v2, %v7126_v0 }
 0x7fc   :  { %v3290_v28 = vsub.f32 %v7033_v46, %v7126_v0  ;;  %v3291_v18 = vsub.f32 %v7048_v12, %v7126_v0  ;;  %v3292_v9 = vsub.f32 %v7055_v25, %v7126_v0  ;;  %v3293_v37 = vsub.f32 %v7045_v34, %v7126_v0 }
 0x7fd   :  { %v3307_v60 = vadd.f32 1e-10, %v3274_v23  ;;  %v3294_v50 = vsub.f32 %v7053_v31, %v7126_v0  ;;  %v3295_v11 = vsub.f32 %v7068_v40, %v7126_v0  ;;  %v3296_v2 = vsub.f32 %v7075_v14, %v7126_v0 }
 0x7fe   :  { %v3297_v46 = vsub.f32 %v7065_v49, %v7126_v0  ;;  %v3298_v12 = vsub.f32 %v7073_v52, %v7126_v0  ;;  %v3299_v25 = vsub.f32 %v7088_v29, %v7126_v0  ;;  %v3300_v34 = vsub.f32 %v7095_v5, %v7126_v0 }
 0x7ff   :  { %5176 = vrsqrt.f32 %v3307_v60  ;;  %v3301_v31 = vsub.f32 %v7085_v27, %v7126_v0  ;;  %v3302_v40 = vsub.f32 %v7093_v62, %v7126_v0  ;;  %v3303_v14 = vsub.f32 %v7108_v4, %v7126_v0 }
 0x800   :  { %v3305_v49 = vsub.f32 %v7105_v38, %v7126_v0  ;;  %v3306_v52 = vsub.f32 %v7113_v22, %v7126_v0 }
 0x809   :  { %v5177_v29 = vpop.eup %5176 }
 0x80a   :  { %v7194_v6 = vmul.f32 %v5177_v29, %v3304_v32  ;;  %v3309_v5 = vmul.f32 %v5177_v29, %v3275_v55  ;;  %v3310_v7 = vmul.f32 %v5177_v29, %v3276_v15  ;;  %v3311_v44 = vmul.f32 %v5177_v29, %v3277_v54 }
 0x80b   :  { %v3312_v33 = vmul.f32 %v5177_v29, %v3278_v16  ;;  %v3313_v27 = vmul.f32 %v5177_v29, %v3279_v19  ;;  %v3314_v42 = vmul.f32 %v5177_v29, %v3280_v61  ;;  %v3315_v56 = vmul.f32 %v5177_v29, %v3281_v48 }
 0x80c   :  { %v3316_v62 = vmul.f32 %v5177_v29, %v3282_v45  ;;  %v3317_v24 = vmul.f32 %v5177_v29, %v3283_v39  ;;  %v3318_v1 = vmul.f32 %v5177_v29, %v3284_v43  ;;  %v3319_v4 = vmul.f32 %v5177_v29, %v3285_v59 }
 0x80d   :  { %v3320_v53 = vmul.f32 %v5177_v29, %v3286_v17  ;;  %v3321_v30 = vmul.f32 %v5177_v29, %v3287_v13  ;;  %v3322_v38 = vmul.f32 %v5177_v29, %v3288_v10  ;;  %v3323_v51 = vmul.f32 %v5177_v29, %v3289_v3 }
 0x80e   :  { %v3324_v63 = vmul.f32 %v5177_v29, %v3290_v28  ;;  %v3325_v22 = vmul.f32 %v5177_v29, %v3291_v18  ;;  %v3326_v35 = vmul.f32 %v5177_v29, %v3292_v9  ;;  %v3327_v21 = vmul.f32 %v5177_v29, %v3293_v37 }
 0x80f   :  { %v3328_v47 = vmul.f32 %v5177_v29, %v3294_v50  ;;  %v3329_v26 = vmul.f32 %v5177_v29, %v3295_v11  ;;  %v3330_v41 = vmul.f32 %v5177_v29, %v3296_v2  ;;  %v3331_v57 = vmul.f32 %v5177_v29, %v3297_v46 }
 0x810   :  { %v3332_v0 = vmul.f32 %v5177_v29, %v3298_v12  ;;  %v3333_v36 = vmul.f32 %v5177_v29, %v3299_v25  ;;  %v3334_v58 = vmul.f32 %v5177_v29, %v3300_v34  ;;  %v3335_v20 = vmul.f32 %v5177_v29, %v3301_v31 }
 0x811   :  { %v3336_v32 = vmul.f32 %v5177_v29, %v3302_v40  ;;  %v3337_v55 = vmul.f32 %v5177_v29, %v3303_v14  ;;  %v3339_v15 = vmul.f32 %v5177_v29, %v3305_v49  ;;  %v3340_v54 = vmul.f32 %v5177_v29, %v3306_v52 }
 0x812   :  { %v3343_v16 = vmax.f32 %v3311_v44, 0.0  ;;  %v3344_v19 = vmax.f32 %v3312_v33, 0.0  ;;  %v3341_v8 = vmax.f32 %v3309_v5, 0.0  ;;  %v3342_v61 = vmax.f32 %v3310_v7, 0.0 }
 0x813   :  { %v3345_v48 = vmax.f32 %v3313_v27, 0.0  ;;  %v3346_v45 = vmax.f32 %v3314_v42, 0.0  ;;  %v3347_v39 = vmax.f32 %v3315_v56, 0.0  ;;  %v3348_v43 = vmax.f32 %v3316_v62, 0.0 }
 0x814   :  { %v3390_v59 = vpack.c.bf16 %v3344_v19, %v3343_v16  ;;  %v3389_v17 = vpack.c.bf16 %v3342_v61, %v3341_v8  ;;  %v3349_v23 = vmax.f32 %v3317_v24, 0.0  ;;  %v3350_v13 = vmax.f32 %v3318_v1, 0.0 }
 0x815   :  { %v3391_v10 = vpack.c.bf16 %v3346_v45, %v3345_v48  ;;  %v3392_v3 = vpack.c.bf16 %v3348_v43, %v3347_v39  ;;  %v3351_v28 = vmax.f32 %v3319_v4, 0.0  ;;  %v3352_v18 = vmax.f32 %v3320_v53, 0.0 }
 0x816   :  { %4858 = vmatprep.mubr.bf16.mxu1 %v3389_v17  ;;  %v3393_v9 = vpack.c.bf16 %v3350_v13, %v3349_v23  ;;  %v3353_v37 = vmax.f32 %v3321_v30, 0.0  ;;  %v3354_v60 = vmax.f32 %v3322_v38, 0.0  ;;  %v3355_v50 = vmax.f32 %v3323_v51, 0.0 }
 0x817   :  { %4859 = vmatmul.mubr.bf16.vlgmr.msra.gmra.mrb[112].mxu1 %v3390_v59  ;;  %v3394_v11 = vpack.c.bf16 %v3352_v18, %v3351_v28  ;;  %v3356_v2 = vmax.f32 %v3324_v63, 0.0  ;;  %v3357_v46 = vmax.f32 %v3325_v22, 0.0  ;;  %v3358_v12 = vmax.f32 %v3326_v35, 0.0  ;;  %v5030_v22 = vld [vmem:[#allocation8 + $0x200] sm:$0xff]   ;;  %v5032_v35 = vld [vmem:[#allocation8 + $0x210] sm:$0xff]  }
 0x818   :  { %4862 = vmatprep.mubr.bf16.mxu1 %v3391_v10  ;;  %v3395_v25 = vpack.c.bf16 %v3354_v60, %v3353_v37  ;;  %v3359_v34 = vmax.f32 %v3327_v21, 0.0  ;;  %v3360_v31 = vmax.f32 %v3328_v47, 0.0  ;;  %v3361_v40 = vmax.f32 %v3329_v26, 0.0  ;;  %4890 = vmatprep.subr.bf16.mxu0 %v5030_v22  ;;  %v5033_v21 = vld [vmem:[#allocation8 + $0x218] sm:$0xff]   ;;  %v5034_v47 = vld [vmem:[#allocation8 + $0x220] sm:$0xff]   ;;  %v5035_v26 = vld [vmem:[#allocation8 + $0x228] sm:$0xff]  }
 0x819   :  { %v3396_v14 = vpack.c.bf16 %v3356_v2, %v3355_v50  ;;  %v3397_v49 = vpack.c.bf16 %v3358_v12, %v3357_v46  ;;  %v3362_v52 = vmax.f32 %v3330_v41, 0.0  ;;  %v3363_v29 = vmax.f32 %v3331_v57, 0.0  ;;  %4891 = vmatpush3.bf16.msra.mxu0 %v5030_v22  ;;  %v5036_v41 = vld [vmem:[#allocation8 + $0x230] sm:$0xff]   ;;  %v5037_v57 = vld [vmem:[#allocation8 + $0x238] sm:$0xff]  }
 0x81a   :  { %v3398_v5 = vpack.c.bf16 %v3360_v31, %v3359_v34  ;;  %v3364_v7 = vmax.f32 %v3332_v0, 0.0  ;;  %v3365_v44 = vmax.f32 %v3333_v36, 0.0  ;;  %v3366_v33 = vmax.f32 %v3334_v58, 0.0 }
 0x81b   :  { %v3399_v27 = vpack.c.bf16 %v3362_v52, %v3361_v40  ;;  %v3367_v42 = vmax.f32 %v3335_v20, 0.0  ;;  %v3368_v56 = vmax.f32 %v3336_v32, 0.0  ;;  %v3369_v62 = vmax.f32 %v3337_v55, 0.0 }
 0x81c   :  { %v3400_v24 = vpack.c.bf16 %v3364_v7, %v3363_v29  ;;  %v3401_v1 = vpack.c.bf16 %v3366_v33, %v3365_v44  ;;  %v3370_v4 = vmax.f32 %v7194_v6, 0.0  ;;  %v3371_v53 = vmax.f32 %v3339_v15, 0.0  ;;  %v5031_v6 = vld [vmem:[#allocation8 + $0x208] sm:$0xff]  }
 0x81d   :  { %v3402_v30 = vpack.c.bf16 %v3368_v56, %v3367_v42  ;;  %v3372_v38 = vmax.f32 %v3340_v54, 0.0  ;;  %4892 = vmatprep.subr.bf16.mxu0 %v5031_v6 }
 0x81e   :  { %v3403_v51 = vpack.c.bf16 %v3370_v4, %v3369_v62  ;;  %4893 = vmatpush3.bf16.msra.mxu0 %v5031_v6 }
 0x81f   :  { %4863 = vmatmul.mubr.bf16.gmra.mrb[116].mxu1 %v3392_v3  ;;  %v3404_v63 = vpack.c.bf16 %v3372_v38, %v3371_v53  ;;  %4894 = vmatprep.subr.bf16.mxu0 %v5032_v35 }
 0x820   :  { %4866 = vmatprep.mubr.bf16.mxu1 %v3393_v9 }
 0x822   :  { %4895 = vmatpush3.bf16.msra.mxu0 %v5032_v35 }
 0x823   :  { %4896 = vmatprep.subr.bf16.mxu0 %v5033_v21 }
 0x826   :  { %4897 = vmatpush3.bf16.msra.mxu0 %v5033_v21 }
 0x827   :  { %4867 = vmatmul.mubr.bf16.gmra.mrb[120].mxu1 %v3394_v11  ;;  %4898 = vmatprep.subr.bf16.mxu0 %v5034_v47 }
 0x828   :  { %4870 = vmatprep.mubr.bf16.mxu1 %v3395_v25 }
 0x82a   :  { %4899 = vmatpush3.bf16.msra.mxu0 %v5034_v47 }
 0x82b   :  { %4900 = vmatprep.subr.bf16.mxu0 %v5035_v26 }
 0x82e   :  { %4901 = vmatpush3.bf16.msra.mxu0 %v5035_v26 }
 0x82f   :  { %4871 = vmatmul.mubr.bf16.gmra.mrb[124].mxu1 %v3396_v14  ;;  %4902 = vmatprep.subr.bf16.mxu0 %v5036_v41 }
 0x830   :  { %4874 = vmatprep.mubr.bf16.mxu1 %v3397_v49 }
 0x832   :  { %4903 = vmatpush3.bf16.msra.mxu0 %v5036_v41 }
 0x833   :  { %4904 = vmatprep.subr.bf16.mxu0 %v5037_v57 }
 0x836   :  { %4905 = vmatpush3.bf16.msra.mxu0 %v5037_v57 }
 0x837   :  { %4875 = vmatmul.mubr.bf16.gmra.mrb[128].mxu1 %v3398_v5 }
 0x838   :  { %4878 = vmatprep.mubr.bf16.mxu1 %v3399_v27 }
 0x83f   :  { %4879 = vmatmul.mubr.bf16.gmra.mrb[132].mxu1 %v3400_v24 }
 0x840   :  { %4882 = vmatprep.mubr.bf16.mxu1 %v3401_v1 }
 0x847   :  { %4883 = vmatmul.mubr.bf16.gmra.mrb[136].mxu1 %v3402_v30 }
 0x848   :  { %4886 = vmatprep.mubr.bf16.mxu1 %v3403_v51 }
 0x84f   :  { %4887 = vmatmul.mubr.bf16.gmra.mrb[140].mxu1 %v3404_v63 }
 0x8ea   :  { %v7197_v0 = vpop.f32.mrb[112].mxu1 }
 0x8eb   :  { %v7199_v36 = vpop.f32.mrb[113].mxu1  ;;  %v3654_v54 = vmul.f32 %v7197_v0, %v7197_v0 }
 0x8ec   :  { %v7201_v58 = vpop.f32.mrb[114].mxu1  ;;  %v3652_v32 = vmul.f32 %v7199_v36, %v7199_v36 }
 0x8ed   :  { %v7203_v20 = vpop.f32.mrb[115].mxu1  ;;  %v3655_v8 = vmul.f32 %v7201_v58, %v7201_v58 }
 0x8ee   :  { %v3614_v55 = vadd.f32 %v7203_v20, %v7199_v36  ;;  %v3653_v15 = vmul.f32 %v7203_v20, %v7203_v20 }
 0x8f0   :  { %v3615_v16 = vadd.f32 %v7197_v0, %v3614_v55  ;;  %v3684_v19 = vadd.f32 %v3653_v15, %v3652_v32 }
 0x8f2   :  { %v3685_v61 = vadd.f32 %v3684_v19, %v3654_v54  ;;  %v7216_v48 = vpop.f32.mrb[116].mxu1  ;;  %v3616_v45 = vadd.f32 %v7201_v58, %v3615_v16 }
 0x8f3   :  { %v7219_v39 = vpop.f32.mrb[117].mxu1  ;;  %v3658_v18 = vmul.f32 %v7216_v48, %v7216_v48 }
 0x8f4   :  { %v3617_v43 = vadd.f32 %v3616_v45, %v7219_v39  ;;  %v3656_v59 = vmul.f32 %v7219_v39, %v7219_v39  ;;  %v3686_v17 = vadd.f32 %v3685_v61, %v3655_v8  ;;  %v7224_v23 = vpop.f32.mrb[118].mxu1 }
 0x8f5   :  { %v7226_v13 = vpop.f32.mrb[119].mxu1  ;;  %v3659_v60 = vmul.f32 %v7224_v23, %v7224_v23 }
 0x8f6   :  { %v3687_v10 = vadd.f32 %v3686_v17, %v3656_v59  ;;  %v3618_v3 = vadd.f32 %v3617_v43, %v7226_v13  ;;  %v3657_v28 = vmul.f32 %v7226_v13, %v7226_v13 }
 0x8f8   :  { %v3619_v9 = vadd.f32 %v7216_v48, %v3618_v3  ;;  %v3688_v37 = vadd.f32 %v3687_v10, %v3657_v28 }
 0x8fa   :  { %v3689_v50 = vadd.f32 %v3688_v37, %v3658_v18  ;;  %v7236_v11 = vpop.f32.mrb[120].mxu1  ;;  %v3620_v2 = vadd.f32 %v7224_v23, %v3619_v9 }
 0x8fb   :  { %v7239_v46 = vpop.f32.mrb[121].mxu1  ;;  %v3662_v29 = vmul.f32 %v7236_v11, %v7236_v11 }
 0x8fc   :  { %v3621_v12 = vadd.f32 %v3620_v2, %v7239_v46  ;;  %v3660_v25 = vmul.f32 %v7239_v46, %v7239_v46  ;;  %v3690_v34 = vadd.f32 %v3689_v50, %v3659_v60  ;;  %v7244_v31 = vpop.f32.mrb[122].mxu1 }
 0x8fd   :  { %v7246_v40 = vpop.f32.mrb[123].mxu1  ;;  %v3663_v44 = vmul.f32 %v7244_v31, %v7244_v31 }
 0x8fe   :  { %v3691_v14 = vadd.f32 %v3690_v34, %v3660_v25  ;;  %v3622_v49 = vadd.f32 %v3621_v12, %v7246_v40  ;;  %v3661_v52 = vmul.f32 %v7246_v40, %v7246_v40 }
 0x900   :  { %v3623_v5 = vadd.f32 %v7236_v11, %v3622_v49  ;;  %v3692_v7 = vadd.f32 %v3691_v14, %v3661_v52 }
 0x902   :  { %v3693_v33 = vadd.f32 %v3692_v7, %v3662_v29  ;;  %v7256_v27 = vpop.f32.mrb[124].mxu1  ;;  %v3624_v42 = vadd.f32 %v7244_v31, %v3623_v5 }
 0x903   :  { %v7259_v56 = vpop.f32.mrb[125].mxu1  ;;  %v3666_v63 = vmul.f32 %v7256_v27, %v7256_v27 }
 0x904   :  { %v3625_v62 = vadd.f32 %v3624_v42, %v7259_v56  ;;  %v3664_v24 = vmul.f32 %v7259_v56, %v7259_v56  ;;  %v3694_v1 = vadd.f32 %v3693_v33, %v3663_v44  ;;  %v7264_v4 = vpop.f32.mrb[126].mxu1 }
 0x905   :  { %v7266_v53 = vpop.f32.mrb[127].mxu1  ;;  %v3667_v35 = vmul.f32 %v7264_v4, %v7264_v4 }
 0x906   :  { %v3695_v30 = vadd.f32 %v3694_v1, %v3664_v24  ;;  %v3626_v38 = vadd.f32 %v3625_v62, %v7266_v53  ;;  %v3665_v51 = vmul.f32 %v7266_v53, %v7266_v53 }
 0x908   :  { %v3627_v22 = vadd.f32 %v7256_v27, %v3626_v38  ;;  %v3696_v6 = vadd.f32 %v3695_v30, %v3665_v51 }
 0x90a   :  { %v3697_v21 = vadd.f32 %v3696_v6, %v3666_v63  ;;  %v7276_v47 = vpop.f32.mrb[128].mxu1  ;;  %v3628_v26 = vadd.f32 %v7264_v4, %v3627_v22 }
 0x90b   :  { %v7279_v41 = vpop.f32.mrb[129].mxu1  ;;  %v3670_v61 = vmul.f32 %v7276_v47, %v7276_v47 }
 0x90c   :  { %v3629_v57 = vadd.f32 %v3628_v26, %v7279_v41  ;;  %v3668_v32 = vmul.f32 %v7279_v41, %v7279_v41  ;;  %v3698_v55 = vadd.f32 %v3697_v21, %v3667_v35  ;;  %v7284_v15 = vpop.f32.mrb[130].mxu1 }
 0x90d   :  { %v7286_v54 = vpop.f32.mrb[131].mxu1  ;;  %v3671_v59 = vmul.f32 %v7284_v15, %v7284_v15 }
 0x90e   :  { %v3699_v16 = vadd.f32 %v3698_v55, %v3668_v32  ;;  %v3630_v19 = vadd.f32 %v3629_v57, %v7286_v54  ;;  %v3669_v8 = vmul.f32 %v7286_v54, %v7286_v54 }
 0x910   :  { %v3631_v45 = vadd.f32 %v7276_v47, %v3630_v19  ;;  %v3700_v43 = vadd.f32 %v3699_v16, %v3669_v8 }
 0x912   :  { %v3701_v17 = vadd.f32 %v3700_v43, %v3670_v61  ;;  %v7296_v10 = vpop.f32.mrb[132].mxu1  ;;  %v3632_v3 = vadd.f32 %v7284_v15, %v3631_v45 }
 0x913   :  { %v7299_v28 = vpop.f32.mrb[133].mxu1  ;;  %v3674_v34 = vmul.f32 %v7296_v10, %v7296_v10 }
 0x914   :  { %v3633_v18 = vadd.f32 %v3632_v3, %v7299_v28  ;;  %v3672_v9 = vmul.f32 %v7299_v28, %v7299_v28  ;;  %v3702_v37 = vadd.f32 %v3701_v17, %v3671_v59  ;;  %v7304_v60 = vpop.f32.mrb[134].mxu1 }
 0x915   :  { %v7306_v50 = vpop.f32.mrb[135].mxu1  ;;  %v3675_v52 = vmul.f32 %v7304_v60, %v7304_v60 }
 0x916   :  { %v3703_v2 = vadd.f32 %v3702_v37, %v3672_v9  ;;  %v3634_v12 = vadd.f32 %v3633_v18, %v7306_v50  ;;  %v3673_v25 = vmul.f32 %v7306_v50, %v7306_v50 }
 0x918   :  { %v3635_v14 = vadd.f32 %v7296_v10, %v3634_v12  ;;  %v3704_v49 = vadd.f32 %v3703_v2, %v3673_v25 }
 0x91a   :  { %v3705_v29 = vadd.f32 %v3704_v49, %v3674_v34  ;;  %v7316_v5 = vpop.f32.mrb[136].mxu1  ;;  %v3636_v7 = vadd.f32 %v7304_v60, %v3635_v14 }
 0x91b   :  { %v7319_v44 = vpop.f32.mrb[137].mxu1  ;;  %v3678_v63 = vmul.f32 %v7316_v5, %v7316_v5 }
 0x91c   :  { %v3637_v33 = vadd.f32 %v3636_v7, %v7319_v44  ;;  %v3676_v42 = vmul.f32 %v7319_v44, %v7319_v44  ;;  %v3706_v62 = vadd.f32 %v3705_v29, %v3675_v52  ;;  %v7324_v24 = vpop.f32.mrb[138].mxu1 }
 0x91d   :  { %v7326_v1 = vpop.f32.mrb[139].mxu1  ;;  %v3679_v35 = vmul.f32 %v7324_v24, %v7324_v24 }
 0x91e   :  { %v3707_v30 = vadd.f32 %v3706_v62, %v3676_v42  ;;  %v3638_v38 = vadd.f32 %v3637_v33, %v7326_v1  ;;  %v3677_v51 = vmul.f32 %v7326_v1, %v7326_v1 }
 0x920   :  { %v3639_v22 = vadd.f32 %v7316_v5, %v3638_v38  ;;  %v3708_v6 = vadd.f32 %v3707_v30, %v3677_v51 }
 0x922   :  { %v3709_v21 = vadd.f32 %v3708_v6, %v3678_v63  ;;  %v7336_v26 = vpop.f32.mrb[140].mxu1  ;;  %v3640_v57 = vadd.f32 %v7324_v24, %v3639_v22 }
 0x923   :  { %v7339_v32 = vpop.f32.mrb[141].mxu1  ;;  %v3682_v17 = vmul.f32 %v7336_v26, %v7336_v26 }
 0x924   :  { %v3641_v55 = vadd.f32 %v3640_v57, %v7339_v32  ;;  %v3680_v16 = vmul.f32 %v7339_v32, %v7339_v32  ;;  %v3710_v19 = vadd.f32 %v3709_v21, %v3679_v35  ;;  %v7344_v8 = vpop.f32.mrb[142].mxu1 }
 0x925   :  { %v7346_v61 = vpop.f32.mrb[143].mxu1  ;;  %v3683_v9 = vmul.f32 %v7344_v8, %v7344_v8 }
 0x926   :  { %v3711_v45 = vadd.f32 %v3710_v19, %v3680_v16  ;;  %v3642_v43 = vadd.f32 %v3641_v55, %v7346_v61  ;;  %v3681_v59 = vmul.f32 %v7346_v61, %v7346_v61 }
 0x928   :  { %v3643_v3 = vadd.f32 %v7336_v26, %v3642_v43  ;;  %v3712_v18 = vadd.f32 %v3711_v45, %v3681_v59 }
 0x92a   :  { %v3644_v37 = vadd.f32 %v7344_v8, %v3643_v3  ;;  %v3713_v2 = vadd.f32 %v3712_v18, %v3682_v17 }
 0x92c   :  { %v3645_v12 = vrot.slane %v3644_v37, 4  ;;  %v3714_v25 = vadd.f32 %v3713_v2, %v3683_v9 }
 0x92e   :  { %v3646_v34 = vadd.f32 %v3645_v12, %v3644_v37  ;;  %v3715_v14 = vrot.slane %v3714_v25, 4 }
 0x930   :  { %v3647_v49 = vrot.slane %v3646_v34, 2  ;;  %v3716_v52 = vadd.f32 %v3715_v14, %v3714_v25 }
 0x932   :  { %v3648_v29 = vadd.f32 %v3647_v49, %v3646_v34  ;;  %v3717_v7 = vrot.slane %v3716_v52, 2 }
 0x934   :  { %v3649_v33 = vrot.slane %v3648_v29, 1  ;;  %v3718_v42 = vadd.f32 %v3717_v7, %v3716_v52 }
 0x936   :  { %v3650_v62 = vadd.f32 %v3649_v33, %v3648_v29  ;;  %v3719_v30 = vrot.slane %v3718_v42, 1 }
 0x938   :  { %v7357_v38 = vmul.f32 0.00390625, %v3650_v62  ;;  %v3720_v51 = vadd.f32 %v3719_v30, %v3718_v42 }
 0x93a   :  { %v3721_v63 = vmul.f32 0.00390625, %v3720_v51  ;;  %v3722_v22 = vmul.f32 %v7357_v38, %v7357_v38  ;;  %v3754_v6 = vsub.f32 %v7346_v61, %v7357_v38  ;;  %v3725_v35 = vsub.f32 %v7199_v36, %v7357_v38 }
 0x93b   :  { %v3726_v21 = vsub.f32 %v7203_v20, %v7357_v38  ;;  %v3727_v57 = vsub.f32 %v7197_v0, %v7357_v38  ;;  %v3728_v55 = vsub.f32 %v7201_v58, %v7357_v38  ;;  %v3729_v16 = vsub.f32 %v7219_v39, %v7357_v38 }
 0x93c   :  { %v3723_v19 = vsub.f32 %v3721_v63, %v3722_v22  ;;  %v3730_v45 = vsub.f32 %v7226_v13, %v7357_v38  ;;  %v3731_v61 = vsub.f32 %v7216_v48, %v7357_v38  ;;  %v3732_v36 = vsub.f32 %v7224_v23, %v7357_v38 }
 0x93d   :  { %v3733_v20 = vsub.f32 %v7239_v46, %v7357_v38  ;;  %v3734_v0 = vsub.f32 %v7246_v40, %v7357_v38  ;;  %v3735_v58 = vsub.f32 %v7236_v11, %v7357_v38  ;;  %v3736_v39 = vsub.f32 %v7244_v31, %v7357_v38 }
 0x93e   :  { %v3724_v43 = vmax.f32 %v3723_v19, 0.0  ;;  %v3737_v13 = vsub.f32 %v7259_v56, %v7357_v38  ;;  %v3738_v48 = vsub.f32 %v7266_v53, %v7357_v38  ;;  %v3739_v23 = vsub.f32 %v7256_v27, %v7357_v38 }
 0x93f   :  { %v3740_v46 = vsub.f32 %v7264_v4, %v7357_v38  ;;  %v3741_v40 = vsub.f32 %v7279_v41, %v7357_v38  ;;  %v3742_v11 = vsub.f32 %v7286_v54, %v7357_v38  ;;  %v3743_v31 = vsub.f32 %v7276_v47, %v7357_v38 }
 0x940   :  { %v3757_v59 = vadd.f32 1e-10, %v3724_v43  ;;  %v3744_v56 = vsub.f32 %v7284_v15, %v7357_v38  ;;  %v3745_v53 = vsub.f32 %v7299_v28, %v7357_v38  ;;  %v3746_v27 = vsub.f32 %v7306_v50, %v7357_v38 }
 0x941   :  { %v3747_v4 = vsub.f32 %v7296_v10, %v7357_v38  ;;  %v3748_v41 = vsub.f32 %v7304_v60, %v7357_v38  ;;  %v3749_v54 = vsub.f32 %v7319_v44, %v7357_v38  ;;  %v3750_v47 = vsub.f32 %v7326_v1, %v7357_v38 }
 0x942   :  { %5178 = vrsqrt.f32 %v3757_v59  ;;  %v3751_v15 = vsub.f32 %v7316_v5, %v7357_v38  ;;  %v3752_v28 = vsub.f32 %v7324_v24, %v7357_v38  ;;  %v3753_v50 = vsub.f32 %v7339_v32, %v7357_v38 }
 0x943   :  { %v3755_v10 = vsub.f32 %v7336_v26, %v7357_v38  ;;  %v3756_v60 = vsub.f32 %v7344_v8, %v7357_v38 }
 0x94c   :  { %v5179_v44 = vpop.eup %5178 }
 0x94d   :  { %v7425_v17 = vmul.f32 %v5179_v44, %v3754_v6  ;;  %v3759_v1 = vmul.f32 %v5179_v44, %v3725_v35  ;;  %v3760_v3 = vmul.f32 %v5179_v44, %v3726_v21  ;;  %v3761_v18 = vmul.f32 %v5179_v44, %v3727_v57 }
 0x94e   :  { %v3762_v9 = vmul.f32 %v5179_v44, %v3728_v55  ;;  %v3763_v5 = vmul.f32 %v5179_v44, %v3729_v16  ;;  %v3764_v37 = vmul.f32 %v5179_v44, %v3730_v45  ;;  %v3765_v2 = vmul.f32 %v5179_v44, %v3731_v61 }
 0x94f   :  { %v3820_v24 = vmax.f32 %v7425_v17, 0.0  ;;  %v3766_v12 = vmul.f32 %v5179_v44, %v3732_v36  ;;  %v3767_v32 = vmul.f32 %v5179_v44, %v3733_v20  ;;  %v3768_v25 = vmul.f32 %v5179_v44, %v3734_v0 }
 0x950   :  { %v3769_v34 = vmul.f32 %v5179_v44, %v3735_v58  ;;  %v3770_v26 = vmul.f32 %v5179_v44, %v3736_v39  ;;  %v3771_v14 = vmul.f32 %v5179_v44, %v3737_v13  ;;  %v3772_v49 = vmul.f32 %v5179_v44, %v3738_v48 }
 0x951   :  { %v3773_v8 = vmul.f32 %v5179_v44, %v3739_v23  ;;  %v3774_v52 = vmul.f32 %v5179_v44, %v3740_v46  ;;  %v3775_v29 = vmul.f32 %v5179_v44, %v3741_v40  ;;  %v3776_v7 = vmul.f32 %v5179_v44, %v3742_v11 }
 0x952   :  { %v3777_v33 = vmul.f32 %v5179_v44, %v3743_v31  ;;  %v3778_v42 = vmul.f32 %v5179_v44, %v3744_v56  ;;  %v3779_v62 = vmul.f32 %v5179_v44, %v3745_v53  ;;  %v3780_v30 = vmul.f32 %v5179_v44, %v3746_v27 }
 0x953   :  { %v3781_v38 = vmul.f32 %v5179_v44, %v3747_v4  ;;  %v3782_v51 = vmul.f32 %v5179_v44, %v3748_v41  ;;  %v3783_v63 = vmul.f32 %v5179_v44, %v3749_v54  ;;  %v3784_v22 = vmul.f32 %v5179_v44, %v3750_v47 }
 0x954   :  { %v3785_v6 = vmul.f32 %v5179_v44, %v3751_v15  ;;  %v3786_v35 = vmul.f32 %v5179_v44, %v3752_v28  ;;  %v3787_v21 = vmul.f32 %v5179_v44, %v3753_v50  ;;  %v3789_v57 = vmul.f32 %v5179_v44, %v3755_v10 }
 0x955   :  { %v3790_v55 = vmul.f32 %v5179_v44, %v3756_v60  ;;  %v3793_v16 = vmax.f32 %v3761_v18, 0.0  ;;  %v3794_v19 = vmax.f32 %v3762_v9, 0.0  ;;  %v3791_v45 = vmax.f32 %v3759_v1, 0.0 }
 0x956   :  { %v3792_v61 = vmax.f32 %v3760_v3, 0.0  ;;  %v3795_v36 = vmax.f32 %v3763_v5, 0.0  ;;  %v3796_v20 = vmax.f32 %v3764_v37, 0.0  ;;  %v3797_v0 = vmax.f32 %v3765_v2, 0.0 }
 0x957   :  { %v3840_v58 = vpack.c.bf16 %v3794_v19, %v3793_v16  ;;  %v3798_v39 = vmax.f32 %v3766_v12, 0.0  ;;  %v3799_v43 = vmax.f32 %v3767_v32, 0.0  ;;  %v3800_v13 = vmax.f32 %v3768_v25, 0.0 }
 0x958   :  { %v3839_v48 = vpack.c.bf16 %v3792_v61, %v3791_v45  ;;  %v3841_v23 = vpack.c.bf16 %v3796_v20, %v3795_v36  ;;  %v3801_v46 = vmax.f32 %v3769_v34, 0.0  ;;  %v3802_v40 = vmax.f32 %v3770_v26, 0.0 }
 0x959   :  { %v3842_v11 = vpack.c.bf16 %v3798_v39, %v3797_v0  ;;  %v3843_v31 = vpack.c.bf16 %v3800_v13, %v3799_v43  ;;  %v3803_v59 = vmax.f32 %v3771_v14, 0.0  ;;  %v3804_v56 = vmax.f32 %v3772_v49, 0.0 }
 0x95a   :  { %4906 = vmatprep.mubr.bf16.mxu0 %v3839_v48  ;;  %v3844_v53 = vpack.c.bf16 %v3802_v40, %v3801_v46  ;;  %v3805_v27 = vmax.f32 %v3773_v8, 0.0  ;;  %v3806_v4 = vmax.f32 %v3774_v52, 0.0  ;;  %v3807_v41 = vmax.f32 %v3775_v29, 0.0  ;;  %v7430_v29 = vld [vmem:[#allocation10 + $0x8] ss:$0 sm:$0xff] }
 0x95b   :  { %4907 = vmatmul.mubr.bf16.vlgmr.msra.gmra.mrb[112].mxu0 %v3840_v58  ;;  %v3845_v54 = vpack.c.bf16 %v3804_v56, %v3803_v59  ;;  %v3808_v47 = vmax.f32 %v3776_v7, 0.0  ;;  %v3809_v15 = vmax.f32 %v3777_v33, 0.0  ;;  %v3810_v28 = vmax.f32 %v3778_v42, 0.0 }
 0x95c   :  { %4910 = vmatprep.mubr.bf16.mxu0 %v3841_v23  ;;  %v3846_v50 = vpack.c.bf16 %v3806_v4, %v3805_v27  ;;  %v3811_v10 = vmax.f32 %v3779_v62, 0.0  ;;  %v3812_v60 = vmax.f32 %v3780_v30, 0.0  ;;  %v3813_v44 = vmax.f32 %v3781_v38, 0.0 }
 0x95d   :  { %v3847_v1 = vpack.c.bf16 %v3808_v47, %v3807_v41  ;;  %v3848_v3 = vpack.c.bf16 %v3810_v28, %v3809_v15  ;;  %v3814_v18 = vmax.f32 %v3782_v51, 0.0  ;;  %v3815_v9 = vmax.f32 %v3783_v63, 0.0 }
 0x95e   :  { %v3849_v5 = vpack.c.bf16 %v3812_v60, %v3811_v10  ;;  %v3816_v37 = vmax.f32 %v3784_v22, 0.0  ;;  %v3817_v2 = vmax.f32 %v3785_v6, 0.0  ;;  %v3818_v12 = vmax.f32 %v3786_v35, 0.0 }
 0x95f   :  { %v3850_v32 = vpack.c.bf16 %v3814_v18, %v3813_v44  ;;  %v3819_v25 = vmax.f32 %v3787_v21, 0.0  ;;  %v3821_v34 = vmax.f32 %v3789_v57, 0.0  ;;  %v3822_v26 = vmax.f32 %v3790_v55, 0.0 }
 0x960   :  { %v3851_v14 = vpack.c.bf16 %v3816_v37, %v3815_v9  ;;  %v3852_v49 = vpack.c.bf16 %v3818_v12, %v3817_v2 }
 0x961   :  { %v3853_v8 = vpack.c.bf16 %v3820_v24, %v3819_v25  ;;  %v3854_v52 = vpack.c.bf16 %v3822_v26, %v3821_v34 }
 0x963   :  { %4911 = vmatmul.mubr.bf16.gmra.mrb[116].mxu0 %v3842_v11 }
 0x964   :  { %4914 = vmatprep.mubr.bf16.mxu0 %v3843_v31 }
 0x96b   :  { %4915 = vmatmul.mubr.bf16.gmra.mrb[120].mxu0 %v3844_v53 }
 0x96c   :  { %4918 = vmatprep.mubr.bf16.mxu0 %v3845_v54 }
 0x973   :  { %4919 = vmatmul.mubr.bf16.gmra.mrb[124].mxu0 %v3846_v50 }
 0x974   :  { %4922 = vmatprep.mubr.bf16.mxu0 %v3847_v1 }
 0x97b   :  { %4923 = vmatmul.mubr.bf16.gmra.mrb[128].mxu0 %v3848_v3 }
 0x97c   :  { %4926 = vmatprep.mubr.bf16.mxu0 %v3849_v5 }
 0x983   :  { %4927 = vmatmul.mubr.bf16.gmra.mrb[132].mxu0 %v3850_v32 }
 0x984   :  { %4930 = vmatprep.mubr.bf16.mxu0 %v3851_v14 }
 0x98b   :  { %4931 = vmatmul.mubr.bf16.gmra.mrb[136].mxu0 %v3852_v49 }
 0x98c   :  { %4934 = vmatprep.mubr.bf16.mxu0 %v3853_v8 }
 0x993   :  { %4935 = vmatmul.mubr.bf16.gmra.mrb[140].mxu0 %v3854_v52 }
 0xa2e   :  { %v4908_v7 = vpop.f32.mrb[112].mxu0 }
 0xa2f   :  { %v3951_v17 = vadd.f32 %v4908_v7, %v7430_v29  ;;  %v3942_v24 = vpop.f32.mrb[113].mxu0 }
 0xa30   :  { %v3943_v33 = vadd.f32 %v7430_v29, %v3942_v24  ;;  %v4909_v42 = vpop.f32.mrb[114].mxu0 }
 0xa31   :  { %v4071_v62 = vmax.f32 %v3951_v17, 0.0  ;;  %v3954_v30 = vadd.f32 %v4909_v42, %v7430_v29  ;;  %v3945_v38 = vpop.f32.mrb[115].mxu0 }
 0xa32   :  { %v4069_v51 = vmax.f32 %v3943_v33, 0.0  ;;  %v3946_v63 = vadd.f32 %v7430_v29, %v3945_v38 }
 0xa33   :  { %4135 = vst [vmem:[#allocation11 + $0x28] sm:$0xff] %v4071_v62  ;;  %v4072_v22 = vmax.f32 %v3954_v30, 0.0 }
 0xa34   :  { %4133 = vst [vmem:[#allocation11 + $0x8] sm:$0xff] %v4069_v51  ;;  %v4070_v6 = vmax.f32 %v3946_v63, 0.0 }
 0xa35   :  { %4136 = vst [vmem:[#allocation11 + $0x38] sm:$0xff] %v4072_v22 }
 0xa36   :  { %4134 = vst [vmem:[#allocation11 + $0x18] sm:$0xff] %v4070_v6  ;;  %v4912_v35 = vpop.f32.mrb[116].mxu0 }
 0xa37   :  { %v3967_v21 = vadd.f32 %v4912_v35, %v7430_v29  ;;  %v3958_v57 = vpop.f32.mrb[117].mxu0 }
 0xa38   :  { %v3959_v55 = vadd.f32 %v7430_v29, %v3958_v57  ;;  %v4913_v16 = vpop.f32.mrb[118].mxu0 }
 0xa39   :  { %v4075_v19 = vmax.f32 %v3967_v21, 0.0  ;;  %v3970_v45 = vadd.f32 %v4913_v16, %v7430_v29  ;;  %v3961_v61 = vpop.f32.mrb[119].mxu0 }
 0xa3a   :  { %v4073_v36 = vmax.f32 %v3959_v55, 0.0  ;;  %v3962_v20 = vadd.f32 %v7430_v29, %v3961_v61 }
 0xa3b   :  { %4139 = vst [vmem:[#allocation11 + $0x68] sm:$0xff] %v4075_v19  ;;  %v4076_v0 = vmax.f32 %v3970_v45, 0.0 }
 0xa3c   :  { %4137 = vst [vmem:[#allocation11 + $0x48] sm:$0xff] %v4073_v36  ;;  %v4074_v58 = vmax.f32 %v3962_v20, 0.0 }
 0xa3d   :  { %4140 = vst [vmem:[#allocation11 + $0x78] sm:$0xff] %v4076_v0 }
 0xa3e   :  { %4138 = vst [vmem:[#allocation11 + $0x58] sm:$0xff] %v4074_v58  ;;  %v4916_v39 = vpop.f32.mrb[120].mxu0 }
 0xa3f   :  { %v3983_v43 = vadd.f32 %v4916_v39, %v7430_v29  ;;  %v3974_v13 = vpop.f32.mrb[121].mxu0 }
 0xa40   :  { %v3975_v48 = vadd.f32 %v7430_v29, %v3974_v13  ;;  %v4917_v23 = vpop.f32.mrb[122].mxu0 }
 0xa41   :  { %v4079_v46 = vmax.f32 %v3983_v43, 0.0  ;;  %v3986_v40 = vadd.f32 %v4917_v23, %v7430_v29  ;;  %v3977_v11 = vpop.f32.mrb[123].mxu0 }
 0xa42   :  { %v4077_v31 = vmax.f32 %v3975_v48, 0.0  ;;  %v3978_v59 = vadd.f32 %v7430_v29, %v3977_v11 }
 0xa43   :  { %4143 = vst [vmem:[#allocation11 + $0xa8] sm:$0xff] %v4079_v46  ;;  %v4080_v56 = vmax.f32 %v3986_v40, 0.0 }
 0xa44   :  { %4141 = vst [vmem:[#allocation11 + $0x88] sm:$0xff] %v4077_v31  ;;  %v4078_v53 = vmax.f32 %v3978_v59, 0.0 }
 0xa45   :  { %4144 = vst [vmem:[#allocation11 + $0xb8] sm:$0xff] %v4080_v56 }
 0xa46   :  { %4142 = vst [vmem:[#allocation11 + $0x98] sm:$0xff] %v4078_v53  ;;  %v4920_v27 = vpop.f32.mrb[124].mxu0 }
 0xa47   :  { %v3999_v4 = vadd.f32 %v4920_v27, %v7430_v29  ;;  %v3990_v41 = vpop.f32.mrb[125].mxu0 }
 0xa48   :  { %v3991_v54 = vadd.f32 %v7430_v29, %v3990_v41  ;;  %v4921_v47 = vpop.f32.mrb[126].mxu0 }
 0xa49   :  { %v4083_v15 = vmax.f32 %v3999_v4, 0.0  ;;  %v4002_v28 = vadd.f32 %v4921_v47, %v7430_v29  ;;  %v3993_v50 = vpop.f32.mrb[127].mxu0 }
 0xa4a   :  { %v4081_v10 = vmax.f32 %v3991_v54, 0.0  ;;  %v3994_v60 = vadd.f32 %v7430_v29, %v3993_v50 }
 0xa4b   :  { %4147 = vst [vmem:[#allocation11 + $0xe8] sm:$0xff] %v4083_v15  ;;  %v4084_v44 = vmax.f32 %v4002_v28, 0.0 }
 0xa4c   :  { %4145 = vst [vmem:[#allocation11 + $0xc8] sm:$0xff] %v4081_v10  ;;  %v4082_v1 = vmax.f32 %v3994_v60, 0.0 }
 0xa4d   :  { %4148 = vst [vmem:[#allocation11 + $0xf8] sm:$0xff] %v4084_v44 }
 0xa4e   :  { %4146 = vst [vmem:[#allocation11 + $0xd8] sm:$0xff] %v4082_v1  ;;  %v4924_v3 = vpop.f32.mrb[128].mxu0 }
 0xa4f   :  { %v4015_v18 = vadd.f32 %v4924_v3, %v7430_v29  ;;  %v4006_v9 = vpop.f32.mrb[129].mxu0 }
 0xa50   :  { %v4007_v5 = vadd.f32 %v7430_v29, %v4006_v9  ;;  %v4925_v37 = vpop.f32.mrb[130].mxu0 }
 0xa51   :  { %v4087_v2 = vmax.f32 %v4015_v18, 0.0  ;;  %v4018_v12 = vadd.f32 %v4925_v37, %v7430_v29  ;;  %v4009_v32 = vpop.f32.mrb[131].mxu0 }
 0xa52   :  { %v4085_v25 = vmax.f32 %v4007_v5, 0.0  ;;  %v4010_v34 = vadd.f32 %v7430_v29, %v4009_v32 }
 0xa53   :  { %4151 = vst [vmem:[#allocation11 + $0x128] sm:$0xff] %v4087_v2  ;;  %v4088_v26 = vmax.f32 %v4018_v12, 0.0 }
 0xa54   :  { %4149 = vst [vmem:[#allocation11 + $0x108] sm:$0xff] %v4085_v25  ;;  %v4086_v14 = vmax.f32 %v4010_v34, 0.0 }
 0xa55   :  { %4152 = vst [vmem:[#allocation11 + $0x138] sm:$0xff] %v4088_v26 }
 0xa56   :  { %4150 = vst [vmem:[#allocation11 + $0x118] sm:$0xff] %v4086_v14  ;;  %v4928_v49 = vpop.f32.mrb[132].mxu0 }
 0xa57   :  { %v4031_v8 = vadd.f32 %v4928_v49, %v7430_v29  ;;  %v4022_v52 = vpop.f32.mrb[133].mxu0 }
 0xa58   :  { %v4023_v7 = vadd.f32 %v7430_v29, %v4022_v52  ;;  %v4929_v17 = vpop.f32.mrb[134].mxu0 }
 0xa59   :  { %v4091_v24 = vmax.f32 %v4031_v8, 0.0  ;;  %v4034_v33 = vadd.f32 %v4929_v17, %v7430_v29  ;;  %v4025_v42 = vpop.f32.mrb[135].mxu0 }
 0xa5a   :  { %v4089_v62 = vmax.f32 %v4023_v7, 0.0  ;;  %v4026_v30 = vadd.f32 %v7430_v29, %v4025_v42 }
 0xa5b   :  { %4155 = vst [vmem:[#allocation11 + $0x168] sm:$0xff] %v4091_v24  ;;  %v4092_v38 = vmax.f32 %v4034_v33, 0.0 }
 0xa5c   :  { %4153 = vst [vmem:[#allocation11 + $0x148] sm:$0xff] %v4089_v62  ;;  %v4090_v51 = vmax.f32 %v4026_v30, 0.0 }
 0xa5d   :  { %4156 = vst [vmem:[#allocation11 + $0x178] sm:$0xff] %v4092_v38 }
 0xa5e   :  { %4154 = vst [vmem:[#allocation11 + $0x158] sm:$0xff] %v4090_v51  ;;  %v4932_v63 = vpop.f32.mrb[136].mxu0 }
 0xa5f   :  { %v4047_v22 = vadd.f32 %v4932_v63, %v7430_v29  ;;  %v4038_v6 = vpop.f32.mrb[137].mxu0 }
 0xa60   :  { %v4039_v35 = vadd.f32 %v7430_v29, %v4038_v6  ;;  %v4933_v21 = vpop.f32.mrb[138].mxu0 }
 0xa61   :  { %v4095_v57 = vmax.f32 %v4047_v22, 0.0  ;;  %v4050_v55 = vadd.f32 %v4933_v21, %v7430_v29  ;;  %v4041_v16 = vpop.f32.mrb[139].mxu0 }
 0xa62   :  { %v4093_v19 = vmax.f32 %v4039_v35, 0.0  ;;  %v4042_v45 = vadd.f32 %v7430_v29, %v4041_v16 }
 0xa63   :  { %4159 = vst [vmem:[#allocation11 + $0x1a8] sm:$0xff] %v4095_v57  ;;  %v4096_v61 = vmax.f32 %v4050_v55, 0.0 }
 0xa64   :  { %4157 = vst [vmem:[#allocation11 + $0x188] sm:$0xff] %v4093_v19  ;;  %v4094_v36 = vmax.f32 %v4042_v45, 0.0 }
 0xa65   :  { %4160 = vst [vmem:[#allocation11 + $0x1b8] sm:$0xff] %v4096_v61 }
 0xa66   :  { %4158 = vst [vmem:[#allocation11 + $0x198] sm:$0xff] %v4094_v36  ;;  %v4936_v20 = vpop.f32.mrb[140].mxu0 }
 0xa67   :  { %v4063_v0 = vadd.f32 %v4936_v20, %v7430_v29  ;;  %v4054_v58 = vpop.f32.mrb[141].mxu0 }
 0xa68   :  { %v4055_v39 = vadd.f32 %v7430_v29, %v4054_v58  ;;  %v4937_v43 = vpop.f32.mrb[142].mxu0 }
 0xa69   :  { %v4099_v13 = vmax.f32 %v4063_v0, 0.0  ;;  %v4066_v48 = vadd.f32 %v4937_v43, %v7430_v29  ;;  %v4057_v23 = vpop.f32.mrb[143].mxu0 }
 0xa6a   :  { %v4097_v46 = vmax.f32 %v4055_v39, 0.0  ;;  %v4058_v40 = vadd.f32 %v7430_v29, %v4057_v23 }
 0xa6b   :  { %4163 = vst [vmem:[#allocation11 + $0x1e8] sm:$0xff] %v4099_v13  ;;  %v4100_v11 = vmax.f32 %v4066_v48, 0.0 }
 0xa6c   :  { %4161 = vst [vmem:[#allocation11 + $0x1c8] sm:$0xff] %v4097_v46  ;;  %v4098_v31 = vmax.f32 %v4058_v40, 0.0 }
 0xa6d   :  { %4164 = vst [vmem:[#allocation11 + $0x1f8] sm:$0xff] %v4100_v11 }
 0xa6e   :  { %4162 = vst [vmem:[#allocation11 + $0x1d8] sm:$0xff] %v4098_v31 }
 0xa6f   :  { %5301 = shalt.err (!%p5298_p2)
}
 0xa70   :  { %s5302_s3 = scalar_lea.hbm %s7481_s5, 8192 }
 0xa71   :  { %p5303_p3 = scmp.ne.s32.totalorder %s7481_s5, %s5302_s3  ;;  %p5306_p4 = scmp.lt.u32.totalorder %s5302_s3, %s7481_s5 }
 0xa73   :  { %p5308_p5 = pnand %p5306_p4, %p5303_p3 }
 0xa75   :  { %5311 = shalt.err (!%p5308_p5)
}
 0xa76   :  { %s5330_s12 = smov 256   ;;  %s5331_s13 = smov 16  }
 0xa77   :  { %4176 = dma.vmem_to_hbm [thread:$0]  %s4171_s30, 8192, %s7481_s5, [#allocation4], %s5330_s12, %s5330_s12, %s5331_s13  }
 0xa78   :  { %5318 = dma.done.wait [#allocation4], 8192  }
 0xa79   :  { %5319 = vsyncadd [#allocation4], 4294959104 }
 0xa7a   :  { %4180 = vsyncpa [#allocation3], 1 }
 0xa7b   :  { %4181 = vsyncpa [#allocation6], 1 }
 0xa7c   :  { %4182 = vsyncpa [#allocation9], 1 }
 0xa7d   :  { %4183 = vsyncpa [#allocation4], 1 }

</bundles_post_ra>
